<compile_context>
chip_gen: v7x
topology: tpu7x:2x2x1
jax: 0.10.0
libtpu: 0.0.40
codegen_flags: <defaults>
</compile_context>

<pallas_src>
import functools

import jax
import jax.numpy as jnp
from jax import lax
from jax.experimental import pallas as pl
from jax.experimental.pallas import tpu as pltpu


# ----------------------------- Pallas kernel ------------------------------- #

def _conv3x3(pad_val, w_ref, shift, H, W, C):
    """3x3 'same' conv on an already zero-padded (H+2, W+2, C) value.

    Weights carry the folded BN scale; `shift` is the folded BN shift (1, C).
    Returns the pre-activation as a lane-dense (H*W, C) float32 value.
    """
    acc = jnp.zeros((H * W, C), jnp.float32)
    for dy in range(3):
        for dx in range(3):
            patch = pad_val[dy:dy + H, dx:dx + W, :].reshape(H * W, C)
            acc = acc + jnp.dot(patch, w_ref[dy, dx],
                                preferred_element_type=jnp.float32)
    return acc + shift


def basic_block_kernel(x_ref, w1_ref, t1_ref, w2_ref, t2_ref, o_ref,
                       xpad_ref, ypad_ref):
    """Fused BasicBlock for one batch element.

    x_ref : (1, H, W, C)    input (doubles as the residual; read once)
    w*_ref: (3, 3, C, C)    HWIO conv weights with BN scale folded in
    t*_ref: (1, C)          folded BN shifts
    o_ref : (1, H, W, C)    output
    *pad_ref: (H+2, W+2, C) VMEM scratch used for in-kernel zero padding
    """
    _, H, W, C = x_ref.shape

    x = x_ref[0]                                            # (H, W, C)

    # In-kernel zero padding for conv1 (stays entirely in VMEM).
    xpad_ref[...] = jnp.zeros_like(xpad_ref)
    xpad_ref[pl.ds(1, H), pl.ds(1, W), :] = x

    # conv1 (+ folded BN) + ReLU; intermediate activation never touches HBM.
    y = jnp.maximum(_conv3x3(xpad_ref[...], w1_ref, t1_ref[...], H, W, C), 0.0)

    # In-kernel zero padding for conv2.
    ypad_ref[...] = jnp.zeros_like(ypad_ref)
    ypad_ref[pl.ds(1, H), pl.ds(1, W), :] = y.reshape(H, W, C)

    # conv2 (+ folded BN) + residual + ReLU.
    out = _conv3x3(ypad_ref[...], w2_ref, t2_ref[...], H, W, C)
    out = jnp.maximum(out + x.reshape(H * W, C), 0.0)
    o_ref[0] = out.reshape(H, W, C).astype(o_ref.dtype)


# ------------------------------ JAX wrapper -------------------------------- #

def _fold_bn(w, b, gamma, beta, mean, var, eps=1e-5):
    """Fold inference BatchNorm into the conv: returns (w * scale, shift)."""
    scale = gamma / jnp.sqrt(var + eps)                     # (C,)
    w_folded = w * scale[None, None, None, :]               # scale per out-ch
    shift = beta + (b - mean) * scale
    return w_folded, shift


def _pad_channels(a, cp, axes):
    pads = [(0, 0)] * a.ndim
    for ax in axes:
        pads[ax] = (0, cp - a.shape[ax])
    return jnp.pad(a, pads)


@jax.jit
def basic_block_forward(x_nchw, params):
    """Forward pass of BasicBlock. Input/output are NCHW float32."""
    x = jnp.transpose(x_nchw, (0, 2, 3, 1)).astype(jnp.float32)    # NHWC
    N, H, W, C = x.shape
    Cp = ((C + 127) // 128) * 128        # lane-dense / MXU-aligned channels

    w1, t1 = _fold_bn(params["w1"], params["b1"], params["g1"],
                      params["be1"], params["m1"], params["v1"])
    w2, t2 = _fold_bn(params["w2"], params["b2"], params["g2"],
                      params["be2"], params["m2"], params["v2"])

    xp = _pad_channels(x, Cp, (3,))
    w1p = _pad_channels(w1, Cp, (2, 3))
    w2p = _pad_channels(w2, Cp, (2, 3))
    t1p = _pad_channels(t1, Cp, (0,)).reshape(1, Cp)
    t2p = _pad_channels(t2, Cp, (0,)).reshape(1, Cp)

    flops = 2 * 2 * 9 * N * H * W * Cp * Cp               # two 3x3 convs
    bytes_accessed = 4 * (2 * N * H * W * Cp               # x in, out
                          + 2 * 9 * Cp * Cp                # two weight tensors
                          + 2 * Cp)                        # shifts

    out = pl.pallas_call(
        basic_block_kernel,
        out_shape=jax.ShapeDtypeStruct((N, H, W, Cp), jnp.float32),
        grid_spec=pltpu.PrefetchScalarGridSpec(
            num_scalar_prefetch=0,
            grid=(N,),
            in_specs=[
                pl.BlockSpec((1, H, W, Cp), lambda n: (n, 0, 0, 0)),
                pl.BlockSpec((3, 3, Cp, Cp), lambda n: (0, 0, 0, 0)),
                pl.BlockSpec((1, Cp), lambda n: (0, 0)),
                pl.BlockSpec((3, 3, Cp, Cp), lambda n: (0, 0, 0, 0)),
                pl.BlockSpec((1, Cp), lambda n: (0, 0)),
            ],
            out_specs=pl.BlockSpec((1, H, W, Cp), lambda n: (n, 0, 0, 0)),
            scratch_shapes=[pltpu.VMEM((H + 2, W + 2, Cp), jnp.float32),
                            pltpu.VMEM((H + 2, W + 2, Cp), jnp.float32)],
        ),
        compiler_params=pltpu.CompilerParams(
            dimension_semantics=("parallel",),
            vmem_limit_bytes=32 * 1024 * 1024,
        ),
        cost_estimate=pl.CostEstimate(flops=flops, transcendentals=0,
                                      bytes_accessed=bytes_accessed),
    )(xp, w1p, t1p, w2p, t2p)

    out = out[..., :C]                                     # drop channel pad
    return jnp.transpose(out, (0, 3, 1, 2))                # back to NCHW


# --------------------------- Pure-JAX reference ----------------------------- #

def _ref_forward(x_nchw, params):
    x = jnp.transpose(x_nchw, (0, 2, 3, 1)).astype(jnp.float32)
    dn = ("NHWC", "HWIO", "NHWC")

    def conv_bn(inp, w, b, g, be, m, v):
        c = lax.conv_general_dilated(inp, w, (1, 1), "SAME",
                                     dimension_numbers=dn) + b
        return (c - m) / jnp.sqrt(v + 1e-5) * g + be

    h = jax.nn.relu(conv_bn(x, params["w1"], params["b1"], params["g1"],
                            params["be1"], params["m1"], params["v1"]))
    o = jax.nn.relu(conv_bn(h, params["w2"], params["b2"], params["g2"],
                            params["be2"], params["m2"], params["v2"]) + x)
    return jnp.transpose(o, (0, 3, 1, 2))


# ---------------------------------- main ----------------------------------- #

def _init_params(key, C):
    ks = jax.random.split(key, 12)
    u = functools.partial(jax.random.uniform, minval=-0.3, maxval=0.3)
    return {
        # conv weights in HWIO (3, 3, C_in, C_out)
        "w1": u(ks[0], (3, 3, C, C), jnp.float32),
        "b1": u(ks[1], (C,), jnp.float32),
        "g1": jax.random.uniform(ks[2], (C,), jnp.float32, 0.5, 1.5),
        "be1": u(ks[3], (C,), jnp.float32),
        "m1": u(ks[4], (C,), jnp.float32),
        "v1": jax.random.uniform(ks[5], (C,), jnp.float32, 0.5, 1.5),
        "w2": u(ks[6], (3, 3, C, C), jnp.float32),
        "b2": u(ks[7], (C,), jnp.float32),
        "g2": jax.random.uniform(ks[8], (C,), jnp.float32, 0.5, 1.5),
        "be2": u(ks[9], (C,), jnp.float32),
        "m2": u(ks[10], (C,), jnp.float32),
        "v2": jax.random.uniform(ks[11], (C,), jnp.float32, 0.5, 1.5),
    }


if __name__ == "__main__":
    key = jax.random.PRNGKey(0)
    k_x, k_p = jax.random.split(key)

    N, C, H, W = 2, 4, 16, 16
    x = jax.random.normal(k_x, (N, C, H, W), jnp.float32)
    params = _init_params(k_p, C)

    out = basic_block_forward(x, params)
    out = jax.block_until_ready(out)

    ref = _ref_forward(x, params)
    assert out.shape == (N, C, H, W)
    assert jnp.max(jnp.abs(out - ref)) < 5e-4, "mismatch vs pure-JAX reference"

    print("KERNEL_OK")
</pallas_src>

<mosaic_0001>
module attributes {stable_mosaic.version = 11 : i64} {
  func.func @basic_block_kernel(%arg0: i32, %arg1: memref<1x16x16x128xf32, #tpu.memory_space<vmem>>, %arg2: memref<3x3x128x128xf32, #tpu.memory_space<vmem>>, %arg3: memref<1x128xf32, #tpu.memory_space<vmem>>, %arg4: memref<3x3x128x128xf32, #tpu.memory_space<vmem>>, %arg5: memref<1x128xf32, #tpu.memory_space<vmem>>, %arg6: memref<1x16x16x128xf32, #tpu.memory_space<vmem>>, %arg7: memref<18x18x128xf32, #tpu.memory_space<vmem>>, %arg8: memref<18x18x128xf32, #tpu.memory_space<vmem>>) attributes {dimension_semantics = [#tpu.dimension_semantics<parallel>], iteration_bounds = array<i64: 2>, scalar_prefetch = 0 : i64, scratch_operands = 2 : i64, tpu.core_type = #tpu.core_type<tc>, window_params = [{transform_indices = @transform_0, window_bounds = array<i64: 1, 16, 16, 128>}, {pipeline_mode = #tpu.pipeline_mode<synchronous>, transform_indices = @transform_1, window_bounds = array<i64: 3, 3, 128, 128>}, {pipeline_mode = #tpu.pipeline_mode<synchronous>, transform_indices = @transform_2, window_bounds = array<i64: 1, 128>}, {pipeline_mode = #tpu.pipeline_mode<synchronous>, transform_indices = @transform_3, window_bounds = array<i64: 3, 3, 128, 128>}, {pipeline_mode = #tpu.pipeline_mode<synchronous>, transform_indices = @transform_4, window_bounds = array<i64: 1, 128>}, {transform_indices = @transform_5, window_bounds = array<i64: 1, 16, 16, 128>}]} {
    %c0 = arith.constant 0 : index
    %c0_0 = arith.constant 0 : index
    %c0_1 = arith.constant 0 : index
    %c0_2 = arith.constant 0 : index
    %0 = vector.load %arg1[%c0, %c0_0, %c0_1, %c0_2] : memref<1x16x16x128xf32, #tpu.memory_space<vmem>>, vector<1x16x16x128xf32>
    %1 = vector.shape_cast %0 : vector<1x16x16x128xf32> to vector<16x16x128xf32>
    %cst = arith.constant 0.000000e+00 : f32
    %2 = vector.broadcast %cst : f32 to vector<18x18x128xf32>
    %c0_3 = arith.constant 0 : index
    %c0_4 = arith.constant 0 : index
    %c0_5 = arith.constant 0 : index
    %3 = vector.load %arg7[%c0_3, %c0_4, %c0_5] : memref<18x18x128xf32, #tpu.memory_space<vmem>>, vector<18x18x128xf32>
    tpu.vector_store %arg7[%c0_3, %c0_4, %c0_5], %2 {strides = array<i32>} : memref<18x18x128xf32, #tpu.memory_space<vmem>>, vector<18x18x128xf32>,
    %c1 = arith.constant 1 : index
    %c1_6 = arith.constant 1 : index
    %c0_7 = arith.constant 0 : index
    %4 = vector.load %arg7[%c1, %c1_6, %c0_7] : memref<18x18x128xf32, #tpu.memory_space<vmem>>, vector<16x16x128xf32>
    tpu.vector_store %arg7[%c1, %c1_6, %c0_7], %1 {strides = array<i32>} : memref<18x18x128xf32, #tpu.memory_space<vmem>>, vector<16x16x128xf32>,
    %c0_8 = arith.constant 0 : index
    %c0_9 = arith.constant 0 : index
    %c0_10 = arith.constant 0 : index
    %5 = vector.load %arg7[%c0_8, %c0_9, %c0_10] : memref<18x18x128xf32, #tpu.memory_space<vmem>>, vector<18x18x128xf32>
    %c0_11 = arith.constant 0 : index
    %c0_12 = arith.constant 0 : index
    %6 = vector.load %arg3[%c0_11, %c0_12] : memref<1x128xf32, #tpu.memory_space<vmem>>, vector<1x128xf32>
    %cst_13 = arith.constant 0.000000e+00 : f32
    %7 = vector.broadcast %cst_13 : f32 to vector<256x128xf32>
    %8 = vector.extract_strided_slice %5 {offsets = [0, 0, 0], sizes = [16, 16, 128], strides = [1, 1, 1]} : vector<18x18x128xf32> to vector<16x16x128xf32>
    %9 = vector.shape_cast %8 : vector<16x16x128xf32> to vector<256x128xf32>
    %c0_14 = arith.constant 0 : index
    %c0_15 = arith.constant 0 : index
    %c0_16 = arith.constant 0 : index
    %c0_17 = arith.constant 0 : index
    %10 = vector.load %arg2[%c0_14, %c0_15, %c0_16, %c0_17] : memref<3x3x128x128xf32, #tpu.memory_space<vmem>>, vector<1x1x128x128xf32>
    %11 = vector.shape_cast %10 : vector<1x1x128x128xf32> to vector<128x128xf32>
    %cst_18 = arith.constant dense<0.000000e+00> : vector<256x128xf32>
    %12 = tpu.matmul %9, %11, %cst_18 {dimension_numbers = #tpu.dot_dimension_numbers<[1], [0], [0], [1], [0, 0, 1, 1], [], []>} : vector<256x128xf32>, vector<128x128xf32>, vector<256x128xf32> -> vector<256x128xf32>
    %13 = arith.addf %7, %12 : vector<256x128xf32>
    %14 = vector.extract_strided_slice %5 {offsets = [0, 1, 0], sizes = [16, 16, 128], strides = [1, 1, 1]} : vector<18x18x128xf32> to vector<16x16x128xf32>
    %15 = vector.shape_cast %14 : vector<16x16x128xf32> to vector<256x128xf32>
    %c0_19 = arith.constant 0 : index
    %c1_20 = arith.constant 1 : index
    %c0_21 = arith.constant 0 : index
    %c0_22 = arith.constant 0 : index
    %16 = vector.load %arg2[%c0_19, %c1_20, %c0_21, %c0_22] : memref<3x3x128x128xf32, #tpu.memory_space<vmem>>, vector<1x1x128x128xf32>
    %17 = vector.shape_cast %16 : vector<1x1x128x128xf32> to vector<128x128xf32>
    %cst_23 = arith.constant dense<0.000000e+00> : vector<256x128xf32>
    %18 = tpu.matmul %15, %17, %cst_23 {dimension_numbers = #tpu.dot_dimension_numbers<[1], [0], [0], [1], [0, 0, 1, 1], [], []>} : vector<256x128xf32>, vector<128x128xf32>, vector<256x128xf32> -> vector<256x128xf32>
    %19 = arith.addf %13, %18 : vector<256x128xf32>
    %20 = vector.extract_strided_slice %5 {offsets = [0, 2, 0], sizes = [16, 16, 128], strides = [1, 1, 1]} : vector<18x18x128xf32> to vector<16x16x128xf32>
    %21 = vector.shape_cast %20 : vector<16x16x128xf32> to vector<256x128xf32>
    %c0_24 = arith.constant 0 : index
    %c2 = arith.constant 2 : index
    %c0_25 = arith.constant 0 : index
    %c0_26 = arith.constant 0 : index
    %22 = vector.load %arg2[%c0_24, %c2, %c0_25, %c0_26] : memref<3x3x128x128xf32, #tpu.memory_space<vmem>>, vector<1x1x128x128xf32>
    %23 = vector.shape_cast %22 : vector<1x1x128x128xf32> to vector<128x128xf32>
    %cst_27 = arith.constant dense<0.000000e+00> : vector<256x128xf32>
    %24 = tpu.matmul %21, %23, %cst_27 {dimension_numbers = #tpu.dot_dimension_numbers<[1], [0], [0], [1], [0, 0, 1, 1], [], []>} : vector<256x128xf32>, vector<128x128xf32>, vector<256x128xf32> -> vector<256x128xf32>
    %25 = arith.addf %19, %24 : vector<256x128xf32>
    %26 = vector.extract_strided_slice %5 {offsets = [1, 0, 0], sizes = [16, 16, 128], strides = [1, 1, 1]} : vector<18x18x128xf32> to vector<16x16x128xf32>
    %27 = vector.shape_cast %26 : vector<16x16x128xf32> to vector<256x128xf32>
    %c1_28 = arith.constant 1 : index
    %c0_29 = arith.constant 0 : index
    %c0_30 = arith.constant 0 : index
    %c0_31 = arith.constant 0 : index
    %28 = vector.load %arg2[%c1_28, %c0_29, %c0_30, %c0_31] : memref<3x3x128x128xf32, #tpu.memory_space<vmem>>, vector<1x1x128x128xf32>
    %29 = vector.shape_cast %28 : vector<1x1x128x128xf32> to vector<128x128xf32>
    %cst_32 = arith.constant dense<0.000000e+00> : vector<256x128xf32>
    %30 = tpu.matmul %27, %29, %cst_32 {dimension_numbers = #tpu.dot_dimension_numbers<[1], [0], [0], [1], [0, 0, 1, 1], [], []>} : vector<256x128xf32>, vector<128x128xf32>, vector<256x128xf32> -> vector<256x128xf32>
    %31 = arith.addf %25, %30 : vector<256x128xf32>
    %32 = vector.extract_strided_slice %5 {offsets = [1, 1, 0], sizes = [16, 16, 128], strides = [1, 1, 1]} : vector<18x18x128xf32> to vector<16x16x128xf32>
    %33 = vector.shape_cast %32 : vector<16x16x128xf32> to vector<256x128xf32>
    %c1_33 = arith.constant 1 : index
    %c1_34 = arith.constant 1 : index
    %c0_35 = arith.constant 0 : index
    %c0_36 = arith.constant 0 : index
    %34 = vector.load %arg2[%c1_33, %c1_34, %c0_35, %c0_36] : memref<3x3x128x128xf32, #tpu.memory_space<vmem>>, vector<1x1x128x128xf32>
    %35 = vector.shape_cast %34 : vector<1x1x128x128xf32> to vector<128x128xf32>
    %cst_37 = arith.constant dense<0.000000e+00> : vector<256x128xf32>
    %36 = tpu.matmul %33, %35, %cst_37 {dimension_numbers = #tpu.dot_dimension_numbers<[1], [0], [0], [1], [0, 0, 1, 1], [], []>} : vector<256x128xf32>, vector<128x128xf32>, vector<256x128xf32> -> vector<256x128xf32>
    %37 = arith.addf %31, %36 : vector<256x128xf32>
    %38 = vector.extract_strided_slice %5 {offsets = [1, 2, 0], sizes = [16, 16, 128], strides = [1, 1, 1]} : vector<18x18x128xf32> to vector<16x16x128xf32>
    %39 = vector.shape_cast %38 : vector<16x16x128xf32> to vector<256x128xf32>
    %c1_38 = arith.constant 1 : index
    %c2_39 = arith.constant 2 : index
    %c0_40 = arith.constant 0 : index
    %c0_41 = arith.constant 0 : index
    %40 = vector.load %arg2[%c1_38, %c2_39, %c0_40, %c0_41] : memref<3x3x128x128xf32, #tpu.memory_space<vmem>>, vector<1x1x128x128xf32>
    %41 = vector.shape_cast %40 : vector<1x1x128x128xf32> to vector<128x128xf32>
    %cst_42 = arith.constant dense<0.000000e+00> : vector<256x128xf32>
    %42 = tpu.matmul %39, %41, %cst_42 {dimension_numbers = #tpu.dot_dimension_numbers<[1], [0], [0], [1], [0, 0, 1, 1], [], []>} : vector<256x128xf32>, vector<128x128xf32>, vector<256x128xf32> -> vector<256x128xf32>
    %43 = arith.addf %37, %42 : vector<256x128xf32>
    %44 = vector.extract_strided_slice %5 {offsets = [2, 0, 0], sizes = [16, 16, 128], strides = [1, 1, 1]} : vector<18x18x128xf32> to vector<16x16x128xf32>
    %45 = vector.shape_cast %44 : vector<16x16x128xf32> to vector<256x128xf32>
    %c2_43 = arith.constant 2 : index
    %c0_44 = arith.constant 0 : index
    %c0_45 = arith.constant 0 : index
    %c0_46 = arith.constant 0 : index
    %46 = vector.load %arg2[%c2_43, %c0_44, %c0_45, %c0_46] : memref<3x3x128x128xf32, #tpu.memory_space<vmem>>, vector<1x1x128x128xf32>
    %47 = vector.shape_cast %46 : vector<1x1x128x128xf32> to vector<128x128xf32>
    %cst_47 = arith.constant dense<0.000000e+00> : vector<256x128xf32>
    %48 = tpu.matmul %45, %47, %cst_47 {dimension_numbers = #tpu.dot_dimension_numbers<[1], [0], [0], [1], [0, 0, 1, 1], [], []>} : vector<256x128xf32>, vector<128x128xf32>, vector<256x128xf32> -> vector<256x128xf32>
    %49 = arith.addf %43, %48 : vector<256x128xf32>
    %50 = vector.extract_strided_slice %5 {offsets = [2, 1, 0], sizes = [16, 16, 128], strides = [1, 1, 1]} : vector<18x18x128xf32> to vector<16x16x128xf32>
    %51 = vector.shape_cast %50 : vector<16x16x128xf32> to vector<256x128xf32>
    %c2_48 = arith.constant 2 : index
    %c1_49 = arith.constant 1 : index
    %c0_50 = arith.constant 0 : index
    %c0_51 = arith.constant 0 : index
    %52 = vector.load %arg2[%c2_48, %c1_49, %c0_50, %c0_51] : memref<3x3x128x128xf32, #tpu.memory_space<vmem>>, vector<1x1x128x128xf32>
    %53 = vector.shape_cast %52 : vector<1x1x128x128xf32> to vector<128x128xf32>
    %cst_52 = arith.constant dense<0.000000e+00> : vector<256x128xf32>
    %54 = tpu.matmul %51, %53, %cst_52 {dimension_numbers = #tpu.dot_dimension_numbers<[1], [0], [0], [1], [0, 0, 1, 1], [], []>} : vector<256x128xf32>, vector<128x128xf32>, vector<256x128xf32> -> vector<256x128xf32>
    %55 = arith.addf %49, %54 : vector<256x128xf32>
    %56 = vector.extract_strided_slice %5 {offsets = [2, 2, 0], sizes = [16, 16, 128], strides = [1, 1, 1]} : vector<18x18x128xf32> to vector<16x16x128xf32>
    %57 = vector.shape_cast %56 : vector<16x16x128xf32> to vector<256x128xf32>
    %c2_53 = arith.constant 2 : index
    %c2_54 = arith.constant 2 : index
    %c0_55 = arith.constant 0 : index
    %c0_56 = arith.constant 0 : index
    %58 = vector.load %arg2[%c2_53, %c2_54, %c0_55, %c0_56] : memref<3x3x128x128xf32, #tpu.memory_space<vmem>>, vector<1x1x128x128xf32>
    %59 = vector.shape_cast %58 : vector<1x1x128x128xf32> to vector<128x128xf32>
    %cst_57 = arith.constant dense<0.000000e+00> : vector<256x128xf32>
    %60 = tpu.matmul %57, %59, %cst_57 {dimension_numbers = #tpu.dot_dimension_numbers<[1], [0], [0], [1], [0, 0, 1, 1], [], []>} : vector<256x128xf32>, vector<128x128xf32>, vector<256x128xf32> -> vector<256x128xf32>
    %61 = arith.addf %55, %60 : vector<256x128xf32>
    %62 = vector.broadcast %6 : vector<1x128xf32> to vector<256x128xf32>
    %63 = arith.addf %61, %62 : vector<256x128xf32>
    %cst_58 = arith.constant 0.000000e+00 : f32
    %64 = vector.broadcast %cst_58 : f32 to vector<256x128xf32>
    %65 = arith.maximumf %63, %64 : vector<256x128xf32>
    %cst_59 = arith.constant 0.000000e+00 : f32
    %66 = vector.broadcast %cst_59 : f32 to vector<18x18x128xf32>
    %c0_60 = arith.constant 0 : index
    %c0_61 = arith.constant 0 : index
    %c0_62 = arith.constant 0 : index
    %67 = vector.load %arg8[%c0_60, %c0_61, %c0_62] : memref<18x18x128xf32, #tpu.memory_space<vmem>>, vector<18x18x128xf32>
    tpu.vector_store %arg8[%c0_60, %c0_61, %c0_62], %66 {strides = array<i32>} : memref<18x18x128xf32, #tpu.memory_space<vmem>>, vector<18x18x128xf32>,
    %68 = vector.shape_cast %65 : vector<256x128xf32> to vector<16x16x128xf32>
    %c1_63 = arith.constant 1 : index
    %c1_64 = arith.constant 1 : index
    %c0_65 = arith.constant 0 : index
    %69 = vector.load %arg8[%c1_63, %c1_64, %c0_65] : memref<18x18x128xf32, #tpu.memory_space<vmem>>, vector<16x16x128xf32>
    tpu.vector_store %arg8[%c1_63, %c1_64, %c0_65], %68 {strides = array<i32>} : memref<18x18x128xf32, #tpu.memory_space<vmem>>, vector<16x16x128xf32>,
    %c0_66 = arith.constant 0 : index
    %c0_67 = arith.constant 0 : index
    %c0_68 = arith.constant 0 : index
    %70 = vector.load %arg8[%c0_66, %c0_67, %c0_68] : memref<18x18x128xf32, #tpu.memory_space<vmem>>, vector<18x18x128xf32>
    %c0_69 = arith.constant 0 : index
    %c0_70 = arith.constant 0 : index
    %71 = vector.load %arg5[%c0_69, %c0_70] : memref<1x128xf32, #tpu.memory_space<vmem>>, vector<1x128xf32>
    %cst_71 = arith.constant 0.000000e+00 : f32
    %72 = vector.broadcast %cst_71 : f32 to vector<256x128xf32>
    %73 = vector.extract_strided_slice %70 {offsets = [0, 0, 0], sizes = [16, 16, 128], strides = [1, 1, 1]} : vector<18x18x128xf32> to vector<16x16x128xf32>
    %74 = vector.shape_cast %73 : vector<16x16x128xf32> to vector<256x128xf32>
    %c0_72 = arith.constant 0 : index
    %c0_73 = arith.constant 0 : index
    %c0_74 = arith.constant 0 : index
    %c0_75 = arith.constant 0 : index
    %75 = vector.load %arg4[%c0_72, %c0_73, %c0_74, %c0_75] : memref<3x3x128x128xf32, #tpu.memory_space<vmem>>, vector<1x1x128x128xf32>
    %76 = vector.shape_cast %75 : vector<1x1x128x128xf32> to vector<128x128xf32>
    %cst_76 = arith.constant dense<0.000000e+00> : vector<256x128xf32>
    %77 = tpu.matmul %74, %76, %cst_76 {dimension_numbers = #tpu.dot_dimension_numbers<[1], [0], [0], [1], [0, 0, 1, 1], [], []>} : vector<256x128xf32>, vector<128x128xf32>, vector<256x128xf32> -> vector<256x128xf32>
    %78 = arith.addf %72, %77 : vector<256x128xf32>
    %79 = vector.extract_strided_slice %70 {offsets = [0, 1, 0], sizes = [16, 16, 128], strides = [1, 1, 1]} : vector<18x18x128xf32> to vector<16x16x128xf32>
    %80 = vector.shape_cast %79 : vector<16x16x128xf32> to vector<256x128xf32>
    %c0_77 = arith.constant 0 : index
    %c1_78 = arith.constant 1 : index
    %c0_79 = arith.constant 0 : index
    %c0_80 = arith.constant 0 : index
    %81 = vector.load %arg4[%c0_77, %c1_78, %c0_79, %c0_80] : memref<3x3x128x128xf32, #tpu.memory_space<vmem>>, vector<1x1x128x128xf32>
    %82 = vector.shape_cast %81 : vector<1x1x128x128xf32> to vector<128x128xf32>
    %cst_81 = arith.constant dense<0.000000e+00> : vector<256x128xf32>
    %83 = tpu.matmul %80, %82, %cst_81 {dimension_numbers = #tpu.dot_dimension_numbers<[1], [0], [0], [1], [0, 0, 1, 1], [], []>} : vector<256x128xf32>, vector<128x128xf32>, vector<256x128xf32> -> vector<256x128xf32>
    %84 = arith.addf %78, %83 : vector<256x128xf32>
    %85 = vector.extract_strided_slice %70 {offsets = [0, 2, 0], sizes = [16, 16, 128], strides = [1, 1, 1]} : vector<18x18x128xf32> to vector<16x16x128xf32>
    %86 = vector.shape_cast %85 : vector<16x16x128xf32> to vector<256x128xf32>
    %c0_82 = arith.constant 0 : index
    %c2_83 = arith.constant 2 : index
    %c0_84 = arith.constant 0 : index
    %c0_85 = arith.constant 0 : index
    %87 = vector.load %arg4[%c0_82, %c2_83, %c0_84, %c0_85] : memref<3x3x128x128xf32, #tpu.memory_space<vmem>>, vector<1x1x128x128xf32>
    %88 = vector.shape_cast %87 : vector<1x1x128x128xf32> to vector<128x128xf32>
    %cst_86 = arith.constant dense<0.000000e+00> : vector<256x128xf32>
    %89 = tpu.matmul %86, %88, %cst_86 {dimension_numbers = #tpu.dot_dimension_numbers<[1], [0], [0], [1], [0, 0, 1, 1], [], []>} : vector<256x128xf32>, vector<128x128xf32>, vector<256x128xf32> -> vector<256x128xf32>
    %90 = arith.addf %84, %89 : vector<256x128xf32>
    %91 = vector.extract_strided_slice %70 {offsets = [1, 0, 0], sizes = [16, 16, 128], strides = [1, 1, 1]} : vector<18x18x128xf32> to vector<16x16x128xf32>
    %92 = vector.shape_cast %91 : vector<16x16x128xf32> to vector<256x128xf32>
    %c1_87 = arith.constant 1 : index
    %c0_88 = arith.constant 0 : index
    %c0_89 = arith.constant 0 : index
    %c0_90 = arith.constant 0 : index
    %93 = vector.load %arg4[%c1_87, %c0_88, %c0_89, %c0_90] : memref<3x3x128x128xf32, #tpu.memory_space<vmem>>, vector<1x1x128x128xf32>
    %94 = vector.shape_cast %93 : vector<1x1x128x128xf32> to vector<128x128xf32>
    %cst_91 = arith.constant dense<0.000000e+00> : vector<256x128xf32>
    %95 = tpu.matmul %92, %94, %cst_91 {dimension_numbers = #tpu.dot_dimension_numbers<[1], [0], [0], [1], [0, 0, 1, 1], [], []>} : vector<256x128xf32>, vector<128x128xf32>, vector<256x128xf32> -> vector<256x128xf32>
    %96 = arith.addf %90, %95 : vector<256x128xf32>
    %97 = vector.extract_strided_slice %70 {offsets = [1, 1, 0], sizes = [16, 16, 128], strides = [1, 1, 1]} : vector<18x18x128xf32> to vector<16x16x128xf32>
    %98 = vector.shape_cast %97 : vector<16x16x128xf32> to vector<256x128xf32>
    %c1_92 = arith.constant 1 : index
    %c1_93 = arith.constant 1 : index
    %c0_94 = arith.constant 0 : index
    %c0_95 = arith.constant 0 : index
    %99 = vector.load %arg4[%c1_92, %c1_93, %c0_94, %c0_95] : memref<3x3x128x128xf32, #tpu.memory_space<vmem>>, vector<1x1x128x128xf32>
    %100 = vector.shape_cast %99 : vector<1x1x128x128xf32> to vector<128x128xf32>
    %cst_96 = arith.constant dense<0.000000e+00> : vector<256x128xf32>
    %101 = tpu.matmul %98, %100, %cst_96 {dimension_numbers = #tpu.dot_dimension_numbers<[1], [0], [0], [1], [0, 0, 1, 1], [], []>} : vector<256x128xf32>, vector<128x128xf32>, vector<256x128xf32> -> vector<256x128xf32>
    %102 = arith.addf %96, %101 : vector<256x128xf32>
    %103 = vector.extract_strided_slice %70 {offsets = [1, 2, 0], sizes = [16, 16, 128], strides = [1, 1, 1]} : vector<18x18x128xf32> to vector<16x16x128xf32>
    %104 = vector.shape_cast %103 : vector<16x16x128xf32> to vector<256x128xf32>
    %c1_97 = arith.constant 1 : index
    %c2_98 = arith.constant 2 : index
    %c0_99 = arith.constant 0 : index
    %c0_100 = arith.constant 0 : index
    %105 = vector.load %arg4[%c1_97, %c2_98, %c0_99, %c0_100] : memref<3x3x128x128xf32, #tpu.memory_space<vmem>>, vector<1x1x128x128xf32>
    %106 = vector.shape_cast %105 : vector<1x1x128x128xf32> to vector<128x128xf32>
    %cst_101 = arith.constant dense<0.000000e+00> : vector<256x128xf32>
    %107 = tpu.matmul %104, %106, %cst_101 {dimension_numbers = #tpu.dot_dimension_numbers<[1], [0], [0], [1], [0, 0, 1, 1], [], []>} : vector<256x128xf32>, vector<128x128xf32>, vector<256x128xf32> -> vector<256x128xf32>
    %108 = arith.addf %102, %107 : vector<256x128xf32>
    %109 = vector.extract_strided_slice %70 {offsets = [2, 0, 0], sizes = [16, 16, 128], strides = [1, 1, 1]} : vector<18x18x128xf32> to vector<16x16x128xf32>
    %110 = vector.shape_cast %109 : vector<16x16x128xf32> to vector<256x128xf32>
    %c2_102 = arith.constant 2 : index
    %c0_103 = arith.constant 0 : index
    %c0_104 = arith.constant 0 : index
    %c0_105 = arith.constant 0 : index
    %111 = vector.load %arg4[%c2_102, %c0_103, %c0_104, %c0_105] : memref<3x3x128x128xf32, #tpu.memory_space<vmem>>, vector<1x1x128x128xf32>
    %112 = vector.shape_cast %111 : vector<1x1x128x128xf32> to vector<128x128xf32>
    %cst_106 = arith.constant dense<0.000000e+00> : vector<256x128xf32>
    %113 = tpu.matmul %110, %112, %cst_106 {dimension_numbers = #tpu.dot_dimension_numbers<[1], [0], [0], [1], [0, 0, 1, 1], [], []>} : vector<256x128xf32>, vector<128x128xf32>, vector<256x128xf32> -> vector<256x128xf32>
    %114 = arith.addf %108, %113 : vector<256x128xf32>
    %115 = vector.extract_strided_slice %70 {offsets = [2, 1, 0], sizes = [16, 16, 128], strides = [1, 1, 1]} : vector<18x18x128xf32> to vector<16x16x128xf32>
    %116 = vector.shape_cast %115 : vector<16x16x128xf32> to vector<256x128xf32>
    %c2_107 = arith.constant 2 : index
    %c1_108 = arith.constant 1 : index
    %c0_109 = arith.constant 0 : index
    %c0_110 = arith.constant 0 : index
    %117 = vector.load %arg4[%c2_107, %c1_108, %c0_109, %c0_110] : memref<3x3x128x128xf32, #tpu.memory_space<vmem>>, vector<1x1x128x128xf32>
    %118 = vector.shape_cast %117 : vector<1x1x128x128xf32> to vector<128x128xf32>
    %cst_111 = arith.constant dense<0.000000e+00> : vector<256x128xf32>
    %119 = tpu.matmul %116, %118, %cst_111 {dimension_numbers = #tpu.dot_dimension_numbers<[1], [0], [0], [1], [0, 0, 1, 1], [], []>} : vector<256x128xf32>, vector<128x128xf32>, vector<256x128xf32> -> vector<256x128xf32>
    %120 = arith.addf %114, %119 : vector<256x128xf32>
    %121 = vector.extract_strided_slice %70 {offsets = [2, 2, 0], sizes = [16, 16, 128], strides = [1, 1, 1]} : vector<18x18x128xf32> to vector<16x16x128xf32>
    %122 = vector.shape_cast %121 : vector<16x16x128xf32> to vector<256x128xf32>
    %c2_112 = arith.constant 2 : index
    %c2_113 = arith.constant 2 : index
    %c0_114 = arith.constant 0 : index
    %c0_115 = arith.constant 0 : index
    %123 = vector.load %arg4[%c2_112, %c2_113, %c0_114, %c0_115] : memref<3x3x128x128xf32, #tpu.memory_space<vmem>>, vector<1x1x128x128xf32>
    %124 = vector.shape_cast %123 : vector<1x1x128x128xf32> to vector<128x128xf32>
    %cst_116 = arith.constant dense<0.000000e+00> : vector<256x128xf32>
    %125 = tpu.matmul %122, %124, %cst_116 {dimension_numbers = #tpu.dot_dimension_numbers<[1], [0], [0], [1], [0, 0, 1, 1], [], []>} : vector<256x128xf32>, vector<128x128xf32>, vector<256x128xf32> -> vector<256x128xf32>
    %126 = arith.addf %120, %125 : vector<256x128xf32>
    %127 = vector.broadcast %71 : vector<1x128xf32> to vector<256x128xf32>
    %128 = arith.addf %126, %127 : vector<256x128xf32>
    %129 = vector.shape_cast %1 : vector<16x16x128xf32> to vector<256x128xf32>
    %130 = arith.addf %128, %129 : vector<256x128xf32>
    %cst_117 = arith.constant 0.000000e+00 : f32
    %131 = vector.broadcast %cst_117 : f32 to vector<256x128xf32>
    %132 = arith.maximumf %130, %131 : vector<256x128xf32>
    %133 = vector.shape_cast %132 : vector<256x128xf32> to vector<16x16x128xf32>
    %c0_118 = arith.constant 0 : index
    %c0_119 = arith.constant 0 : index
    %c0_120 = arith.constant 0 : index
    %c0_121 = arith.constant 0 : index
    %134 = vector.load %arg6[%c0_118, %c0_119, %c0_120, %c0_121] : memref<1x16x16x128xf32, #tpu.memory_space<vmem>>, vector<1x16x16x128xf32>
    %135 = vector.shape_cast %134 : vector<1x16x16x128xf32> to vector<16x16x128xf32>
    %136 = vector.shape_cast %133 : vector<16x16x128xf32> to vector<1x16x16x128xf32>
    tpu.vector_store %arg6[%c0_118, %c0_119, %c0_120, %c0_121], %136 {strides = array<i32>} : memref<1x16x16x128xf32, #tpu.memory_space<vmem>>, vector<1x16x16x128xf32>,
    return
  }
  func.func @transform_0(%arg0: i32) -> (i32, i32, i32, i32) {
    %c0_i32 = arith.constant 0 : i32
    %c0_i32_0 = arith.constant 0 : i32
    %c0_i32_1 = arith.constant 0 : i32
    %c0_i32_2 = arith.constant 0 : i32
    return %arg0, %c0_i32, %c0_i32_0, %c0_i32_1 : i32, i32, i32, i32
  }
  func.func @transform_1(%arg0: i32) -> (i32, i32, i32, i32) {
    %c0_i32 = arith.constant 0 : i32
    %c0_i32_0 = arith.constant 0 : i32
    %c0_i32_1 = arith.constant 0 : i32
    %c0_i32_2 = arith.constant 0 : i32
    %c0_i32_3 = arith.constant 0 : i32
    return %c0_i32, %c0_i32_0, %c0_i32_1, %c0_i32_2 : i32, i32, i32, i32
  }
  func.func @transform_2(%arg0: i32) -> (i32, i32) {
    %c0_i32 = arith.constant 0 : i32
    %c0_i32_0 = arith.constant 0 : i32
    %c0_i32_1 = arith.constant 0 : i32
    return %c0_i32, %c0_i32_0 : i32, i32
  }
  func.func @transform_3(%arg0: i32) -> (i32, i32, i32, i32) {
    %c0_i32 = arith.constant 0 : i32
    %c0_i32_0 = arith.constant 0 : i32
    %c0_i32_1 = arith.constant 0 : i32
    %c0_i32_2 = arith.constant 0 : i32
    %c0_i32_3 = arith.constant 0 : i32
    return %c0_i32, %c0_i32_0, %c0_i32_1, %c0_i32_2 : i32, i32, i32, i32
  }
  func.func @transform_4(%arg0: i32) -> (i32, i32) {
    %c0_i32 = arith.constant 0 : i32
    %c0_i32_0 = arith.constant 0 : i32
    %c0_i32_1 = arith.constant 0 : i32
    return %c0_i32, %c0_i32_0 : i32, i32
  }
  func.func @transform_5(%arg0: i32) -> (i32, i32, i32, i32) {
    %c0_i32 = arith.constant 0 : i32
    %c0_i32_0 = arith.constant 0 : i32
    %c0_i32_1 = arith.constant 0 : i32
    %c0_i32_2 = arith.constant 0 : i32
    return %arg0, %c0_i32, %c0_i32_0, %c0_i32_1 : i32, i32, i32, i32
  }
}

</mosaic_0001>

<bundles_post_ra>
// kernel: basic_block_forward.1
= control target key start
LH: loop header
LB: loop body
LE: loop exit
PB: predicated region body
PF: predicated region fallthrough
CT: control target
= control target key end

     0   :  { %s10018_s18 = smov 0   ;;  %s12502_s0 = inlined_call_operand.vmem [shape: f32[2,16,16,128], index: 0, kind: input, shape index: {}]   ;;  %s12503_s1 = inlined_call_operand.vmem [shape: f32[3,3,128,128], index: 1, kind: input, shape index: {}]   ;;  %s12504_s2 = inlined_call_operand.vmem [shape: f32[1,128], index: 2, kind: input, shape index: {}]   ;;  %s12505_s3 = inlined_call_operand.vmem [shape: f32[3,3,128,128], index: 3, kind: input, shape index: {}]   ;;  %s12506_s4 = inlined_call_operand.vmem [shape: f32[1,128], index: 4, kind: input, shape index: {}]   ;;  %s12507_s5 = inlined_call_operand.vmem [shape: f32[2,16,16,128], index: 5, kind: output, shape index: {}]  }
   0x1 LB: > { %s6216_s19 = sadd.s32 4294967295, %s9985_s18   ;;  %p6220_p0 = scmp.ge.s32.totalorder %s9985_s18, 1  ;;  %s9985_s18 = sphi %s10018_s18, %s15_s18  }
   0x2   : > { %p187_p1 = scmp.lt.s32.totalorder %s9985_s18, 3 }
   0x4   : > { %p188_p2 = pnand %p6220_p0, %p187_p1 }
   0x6   : > { %191 = sbr.rel (%p188_p2) target bundleno = 1603 (0x643), region = 40 }
   0xd   : > { %v6225_v0 = vld [vmem:[%s12503_s1 + $0x80] sm:$0xff]  ;;  %v6226_v1 = vld [vmem:[%s12503_s1 + $0x88] sm:$0xff]  ;;  %v10035_v2 = vld [vmem:[%s12503_s1 + $0x90] sm:$0xff]  ;;  %vm463_vm0 = vcmask 1046528   ;;  %p10039_p3 = scmp.lt.s32.totalorder %s6216_s19, 1  ;;  %v12508_v5 = vmov 0.0  }
   0xe   : > { %v10043_v3 = vpack.c.bf16 %v6226_v1, %v6225_v0  ;;  %v10048_v4 = vld [vmem:[%s12503_s1 + $0x98] sm:$0xff]  ;;  %257 = vst [vmem:[#allocation2] sm:$0xff] %v12508_v5  ;;  %v10052_v6 = vrot.slane %v12508_v5, 1  ;;  %259 = vst [vmem:[#allocation2 + $0x10] sm:$0x3] %v12508_v5  ;;  %v6229_v8 = vld [vmem:[%s12503_s1 + $0xa0] sm:$0xff] }
   0xf   : > { %260 = vst [vmem:[#allocation2 + $0x18] sm:$0xff] %v12508_v5  ;;  %261 = vst [vmem:[#allocation2 + $0x20] sm:$0xff] %v12508_v5  ;;  %v8795_v7 = vpack.c.bf16 %v10048_v4, %v10035_v2  ;;  %v6230_v9 = vld [vmem:[%s12503_s1 + $0xa8] sm:$0xff]  ;;  %s12860_s19 = smov (!%p10039_p3, %s6216_s19), 1  ;;  %v6231_v11 = vld [vmem:[%s12503_s1 + $0xb0] sm:$0xff]  ;;  %vm1043_vm1 = vcmask 1045504  }
  0x10   : > { %262 = vst [vmem:[#allocation2 + $0x28] sm:$0x3] %v12508_v5  ;;  %263 = vst [vmem:[#allocation2 + $0x30] sm:$0xff] %v12508_v5  ;;  %8792 = vmatprep.subr.bf16.mxu0 %v10043_v3  ;;  %7383 = vmatprep.mubr.f32.mxu0 %v10052_v6  ;;  %s6485_s8 = sshll.u32 %s12860_s19, 8  ;;  %v8799_v10 = vpack.c.bf16 %v6230_v9, %v6229_v8  ;;  %v6232_v12 = vld [vmem:[%s12503_s1 + $0xb8] sm:$0xff]  ;;  %v6233_v20 = vld [vmem:[%s12503_s1 + $0xc0] sm:$0xff] }
  0x11   : > { %264 = vst [vmem:[#allocation2 + $0x38] sm:$0xff] %v12508_v5  ;;  %265 = vst [vmem:[#allocation2 + $0x40] sm:$0x3] %v12508_v5  ;;  %8794 = vmatpush3.bf16.msra.mxu0 %v10043_v3  ;;  %s10183_s15 = scalar_lea.vmem %s12502_s0, %s6485_s8  ;;  %v8803_v19 = vpack.c.bf16 %v6232_v12, %v6231_v11  ;;  %v6234_v23 = vld [vmem:[%s12503_s1 + $0xc8] sm:$0xff]  ;;  %v6235_v33 = vld [vmem:[%s12503_s1 + $0xd0] sm:$0xff]  ;;  %s12435_s13 = scalar_lea.vmem %s12507_s5, %s6485_s8 }
  0x12   : > { %266 = vst [vmem:[#allocation2 + $0x48] sm:$0xff] %v12508_v5  ;;  %267 = vst [vmem:[#allocation2 + $0x50] sm:$0xff] %v12508_v5  ;;  %8796 = vmatprep.subr.bf16.mxu0 %v8795_v7  ;;  %v225_v13 = vld [vmem:[%s10183_s15] sm:$0xff]  ;;  %v226_v14 = vld [vmem:[%s10183_s15 + $0x8] sm:$0xff]  ;;  %v8807_v30 = vpack.c.bf16 %v6234_v23, %v6233_v20 }
  0x13   : > { %268 = vst [vmem:[#allocation2 + $0x58] sm:$0x3] %v12508_v5  ;;  %269 = vst [vmem:[#allocation2 + $0x60] sm:$0xff] %v12508_v5  ;;  %v227_v15 = vld [vmem:[%s10183_s15 + $0x10] sm:$0xff]  ;;  %v228_v16 = vld [vmem:[%s10183_s15 + $0x18] sm:$0xff] }
  0x14   : > { %270 = vst [vmem:[#allocation2 + $0x68] sm:$0xff] %v12508_v5  ;;  %271 = vst [vmem:[#allocation2 + $0x70] sm:$0x3] %v12508_v5  ;;  %v229_v17 = vld [vmem:[%s10183_s15 + $0x20] sm:$0xff]  ;;  %v230_v18 = vld [vmem:[%s10183_s15 + $0x28] sm:$0xff] }
  0x15   : > { %272 = vst [vmem:[#allocation2 + $0x78] sm:$0xff] %v12508_v5  ;;  %273 = vst [vmem:[#allocation2 + $0x80] sm:$0xff] %v12508_v5  ;;  %8798 = vmatpush3.bf16.msra.mxu0 %v8795_v7  ;;  %v231_v21 = vld [vmem:[%s10183_s15 + $0x30] sm:$0xff]  ;;  %v232_v22 = vld [vmem:[%s10183_s15 + $0x38] sm:$0xff] }
  0x16   : > { %274 = vst [vmem:[#allocation2 + $0x88] sm:$0x3] %v12508_v5  ;;  %275 = vst [vmem:[#allocation2 + $0x90] sm:$0xff] %v12508_v5  ;;  %8800 = vmatprep.subr.bf16.mxu0 %v8799_v10  ;;  %v233_v24 = vld [vmem:[%s10183_s15 + $0x40] sm:$0xff]  ;;  %v234_v25 = vld [vmem:[%s10183_s15 + $0x48] sm:$0xff] }
  0x17   : > { %276 = vst [vmem:[#allocation2 + $0x98] sm:$0xff] %v12508_v5  ;;  %277 = vst [vmem:[#allocation2 + $0xa0] sm:$0x3] %v12508_v5  ;;  %v235_v26 = vld [vmem:[%s10183_s15 + $0x50] sm:$0xff]  ;;  %v236_v27 = vld [vmem:[%s10183_s15 + $0x58] sm:$0xff] }
  0x18   : > { %278 = vst [vmem:[#allocation2 + $0xa8] sm:$0xff] %v12508_v5  ;;  %279 = vst [vmem:[#allocation2 + $0xb0] sm:$0xff] %v12508_v5  ;;  %v237_v28 = vld [vmem:[%s10183_s15 + $0x60] sm:$0xff]  ;;  %v238_v29 = vld [vmem:[%s10183_s15 + $0x68] sm:$0xff] }
  0x19   : > { %280 = vst [vmem:[#allocation2 + $0xb8] sm:$0x3] %v12508_v5  ;;  %281 = vst [vmem:[#allocation2 + $0xc0] sm:$0xff] %v12508_v5  ;;  %8802 = vmatpush3.bf16.msra.mxu0 %v8799_v10  ;;  %v239_v31 = vld [vmem:[%s10183_s15 + $0x70] sm:$0xff]  ;;  %v240_v32 = vld [vmem:[%s10183_s15 + $0x78] sm:$0xff] }
  0x1a   : > { %282 = vst [vmem:[#allocation2 + $0xc8] sm:$0xff] %v12508_v5  ;;  %283 = vst [vmem:[#allocation2 + $0xd0] sm:$0x3] %v12508_v5  ;;  %8804 = vmatprep.subr.bf16.mxu0 %v8803_v19  ;;  %v6236_v34 = vld [vmem:[%s12503_s1 + $0xd8] sm:$0xff]  ;;  %v6237_v36 = vld [vmem:[%s12503_s1 + $0xe0] sm:$0xff] }
  0x1b   : > { %284 = vst [vmem:[#allocation2 + $0xd8] sm:$0xff] %v12508_v5  ;;  %285 = vst [vmem:[#allocation2 + $0xe0] sm:$0xff] %v12508_v5  ;;  %v8811_v35 = vpack.c.bf16 %v6236_v34, %v6235_v33  ;;  %v6238_v37 = vld [vmem:[%s12503_s1 + $0xe8] sm:$0xff]  ;;  %v6239_v39 = vld [vmem:[%s12503_s1 + $0xf0] sm:$0xff] }
  0x1c   : > { %286 = vst [vmem:[#allocation2 + $0xe8] sm:$0x3] %v12508_v5  ;;  %287 = vst [vmem:[#allocation2 + $0xf0] sm:$0xff] %v12508_v5  ;;  %v8815_v38 = vpack.c.bf16 %v6238_v37, %v6237_v36  ;;  %v6240_v40 = vld [vmem:[%s12503_s1 + $0xf8] sm:$0xff]  ;;  %v241_v41 = vld [vmem:[%s10183_s15 + $0x80] sm:$0xff] }
  0x1d   : > { %288 = vst [vmem:[#allocation2 + $0xf8] sm:$0xff] %v12508_v5  ;;  %289 = vst [vmem:[#allocation2 + $0x100] sm:$0x3] %v12508_v5  ;;  %8806 = vmatpush3.bf16.msra.mxu0 %v8803_v19  ;;  %v242_v42 = vld [vmem:[%s10183_s15 + $0x88] sm:$0xff]  ;;  %v243_v43 = vld [vmem:[%s10183_s15 + $0x90] sm:$0xff]  ;;  %v8819_v48 = vpack.c.bf16 %v6240_v40, %v6239_v39 }
  0x1e   : > { %290 = vst [vmem:[#allocation2 + $0x108] sm:$0xff] %v12508_v5  ;;  %291 = vst [vmem:[#allocation2 + $0x110] sm:$0xff] %v12508_v5  ;;  %8808 = vmatprep.subr.bf16.mxu0 %v8807_v30  ;;  %v10228_v44 = vld [vmem:[#allocation2 + $0x10] sm:$0x3]  ;;  %v399_v45 = vld [vmem:[%s12503_s1] sm:$0xff] }
  0x1f   : > { %292 = vst [vmem:[#allocation2 + $0x118] sm:$0x3] %v12508_v5  ;;  %293 = vst [vmem:[#allocation2 + $0x120] sm:$0xff] %v12508_v5  ;;  %v400_v46 = vld [vmem:[%s12503_s1 + $0x8] sm:$0xff]  ;;  %v244_v47 = vld [vmem:[%s10183_s15 + $0x98] sm:$0xff]  ;;  %v467_v58 = vrot.slane %v10228_v44, 1 }
  0x20   : > { %294 = vst [vmem:[#allocation2 + $0x128] sm:$0xff] %v12508_v5  ;;  %295 = vst [vmem:[#allocation2 + $0x130] sm:$0x3] %v12508_v5  ;;  %v245_v49 = vld [vmem:[%s10183_s15 + $0xa0] sm:$0xff]  ;;  %v246_v50 = vld [vmem:[%s10183_s15 + $0xa8] sm:$0xff]  ;;  %v8823_v61 = vpack.c.bf16 %v400_v46, %v399_v45 }
  0x21   : > { %296 = vst [vmem:[#allocation2 + $0x138] sm:$0xff] %v12508_v5  ;;  %297 = vst [vmem:[#allocation2 + $0x140] sm:$0xff] %v12508_v5  ;;  %8810 = vmatpush3.bf16.msra.mxu0 %v8807_v30  ;;  %v247_v51 = vld [vmem:[%s10183_s15 + $0xb0] sm:$0xff]  ;;  %v248_v54 = vld [vmem:[%s10183_s15 + $0xb8] sm:$0xff]  ;;  %v468_v8 = vsel %vm463_vm0, %v10052_v6, %v467_v58 }
  0x22   : > { %298 = vst [vmem:[#allocation2 + $0x148] sm:$0x3] %v12508_v5  ;;  %299 = vst [vmem:[#allocation2 + $0x150] sm:$0xff] %v12508_v5  ;;  %8812 = vmatprep.subr.bf16.mxu0 %v8811_v35  ;;  %v249_v55 = vld [vmem:[%s10183_s15 + $0xc0] sm:$0xff]  ;;  %v250_v56 = vld [vmem:[%s10183_s15 + $0xc8] sm:$0xff] }
  0x23   : > { %300 = vst [vmem:[#allocation2 + $0x158] sm:$0xff] %v12508_v5  ;;  %301 = vst [vmem:[#allocation2 + $0x160] sm:$0x3] %v12508_v5  ;;  %v251_v57 = vld [vmem:[%s10183_s15 + $0xd0] sm:$0xff]  ;;  %v252_v60 = vld [vmem:[%s10183_s15 + $0xd8] sm:$0xff] }
  0x24   : > { %302 = vst [vmem:[#allocation2 + $0x168] sm:$0xff] %v12508_v5  ;;  %303 = vst [vmem:[#allocation2 + $0x170] sm:$0xff] %v12508_v5  ;;  %v401_v59 = vld [vmem:[%s12503_s1 + $0x10] sm:$0xff]  ;;  %v253_v1 = vld [vmem:[%s10183_s15 + $0xe0] sm:$0xff] }
  0x25   : > { %304 = vst [vmem:[#allocation2 + $0x178] sm:$0x3] %v12508_v5  ;;  %305 = vst [vmem:[#allocation2 + $0x180] sm:$0xff] %v12508_v5  ;;  %8814 = vmatpush3.bf16.msra.mxu0 %v8811_v35  ;;  %v254_v2 = vld [vmem:[%s10183_s15 + $0xe8] sm:$0xff]  ;;  %v402_v7 = vld [vmem:[%s12503_s1 + $0x18] sm:$0xff] }
  0x26   : > { %306 = vst [vmem:[#allocation2 + $0x188] sm:$0xff] %v12508_v5  ;;  %307 = vst [vmem:[#allocation2 + $0x190] sm:$0x3] %v12508_v5  ;;  %8816 = vmatprep.subr.bf16.mxu0 %v8815_v38  ;;  %v407_v36 = vld [vmem:[%s12503_s1 + $0x40] sm:$0xff]  ;;  %v408_v39 = vld [vmem:[%s12503_s1 + $0x48] sm:$0xff] }
  0x27   : > { %310 = vst [vmem:[#allocation2 + $0x1a8] sm:$0x3] %v12508_v5  ;;  %3180 = vst [vmem:[#allocation3 + $0x10] sm:$0x3] %v12508_v5 }
  0x28   : > { %3181 = vst [vmem:[#allocation3 + $0x18] sm:$0xff] %v12508_v5  ;;  %3182 = vst [vmem:[#allocation3 + $0x20] sm:$0xff] %v12508_v5 }
  0x29   : > { %3183 = vst [vmem:[#allocation3 + $0x28] sm:$0x3] %v12508_v5  ;;  %3184 = vst [vmem:[#allocation3 + $0x30] sm:$0xff] %v12508_v5  ;;  %8818 = vmatpush3.bf16.msra.mxu0 %v8815_v38 }
  0x2a   : > { %3185 = vst [vmem:[#allocation3 + $0x38] sm:$0xff] %v12508_v5  ;;  %3186 = vst [vmem:[#allocation3 + $0x40] sm:$0x3] %v12508_v5  ;;  %8820 = vmatprep.subr.bf16.mxu0 %v8819_v48 }
  0x2b   : > { %3187 = vst [vmem:[#allocation3 + $0x48] sm:$0xff] %v12508_v5  ;;  %3188 = vst [vmem:[#allocation3 + $0x50] sm:$0xff] %v12508_v5 }
  0x2c   : > { %3189 = vst [vmem:[#allocation3 + $0x58] sm:$0x3] %v12508_v5  ;;  %3190 = vst [vmem:[#allocation3 + $0x60] sm:$0xff] %v12508_v5 }
  0x2d   : > { %3191 = vst [vmem:[#allocation3 + $0x68] sm:$0xff] %v12508_v5  ;;  %3192 = vst [vmem:[#allocation3 + $0x70] sm:$0x3] %v12508_v5  ;;  %8822 = vmatpush3.bf16.msra.mxu0 %v8819_v48  ;;  %v8839_v48 = vpack.c.bf16 %v408_v39, %v407_v36 }
  0x2e   : > { %3193 = vst [vmem:[#allocation3 + $0x78] sm:$0xff] %v12508_v5  ;;  %3194 = vst [vmem:[#allocation3 + $0x80] sm:$0xff] %v12508_v5  ;;  %8824 = vmatprep.subr.bf16.mxu0 %v8823_v61 }
  0x2f   : > { %3195 = vst [vmem:[#allocation3 + $0x88] sm:$0x3] %v12508_v5  ;;  %3196 = vst [vmem:[#allocation3 + $0x90] sm:$0xff] %v12508_v5 }
  0x30   : > { %3197 = vst [vmem:[#allocation3 + $0x98] sm:$0xff] %v12508_v5  ;;  %3198 = vst [vmem:[#allocation3 + $0xa0] sm:$0x3] %v12508_v5  ;;  %7384 = vmatmul.mubr.f32.vlgmr.msra.gmra.mrb[0].mxu0 %v468_v8 }
  0x31   : > { %3199 = vst [vmem:[#allocation3 + $0xa8] sm:$0xff] %v12508_v5  ;;  %3200 = vst [vmem:[#allocation3 + $0xb0] sm:$0xff] %v12508_v5  ;;  %8826 = vmatpush3.bf16.msra.mxu0 %v8823_v61 }
  0x32   : > { %3201 = vst [vmem:[#allocation3 + $0xb8] sm:$0x3] %v12508_v5  ;;  %3202 = vst [vmem:[#allocation3 + $0xc0] sm:$0xff] %v12508_v5 }
  0x33   : > { %3203 = vst [vmem:[#allocation3 + $0xc8] sm:$0xff] %v12508_v5  ;;  %3204 = vst [vmem:[#allocation3 + $0xd0] sm:$0x3] %v12508_v5 }
  0x34   : > { %3205 = vst [vmem:[#allocation3 + $0xd8] sm:$0xff] %v12508_v5  ;;  %3206 = vst [vmem:[#allocation3 + $0xe0] sm:$0xff] %v12508_v5 }
  0x35   : > { %3207 = vst [vmem:[#allocation3 + $0xe8] sm:$0x3] %v12508_v5  ;;  %3208 = vst [vmem:[#allocation3 + $0xf0] sm:$0xff] %v12508_v5 }
  0x36   : > { %3209 = vst [vmem:[#allocation3 + $0xf8] sm:$0xff] %v12508_v5  ;;  %3210 = vst [vmem:[#allocation3 + $0x100] sm:$0x3] %v12508_v5 }
  0x37   : > { %3211 = vst [vmem:[#allocation3 + $0x108] sm:$0xff] %v12508_v5  ;;  %3212 = vst [vmem:[#allocation3 + $0x110] sm:$0xff] %v12508_v5 }
  0x38   : > { %3213 = vst [vmem:[#allocation3 + $0x118] sm:$0x3] %v12508_v5  ;;  %3214 = vst [vmem:[#allocation3 + $0x120] sm:$0xff] %v12508_v5 }
  0x39   : > { %3215 = vst [vmem:[#allocation3 + $0x128] sm:$0xff] %v12508_v5  ;;  %3216 = vst [vmem:[#allocation3 + $0x130] sm:$0x3] %v12508_v5 }
  0x3a   : > { %3217 = vst [vmem:[#allocation3 + $0x138] sm:$0xff] %v12508_v5  ;;  %3218 = vst [vmem:[#allocation3 + $0x140] sm:$0xff] %v12508_v5 }
  0x3b   : > { %3219 = vst [vmem:[#allocation3 + $0x148] sm:$0x3] %v12508_v5  ;;  %3220 = vst [vmem:[#allocation3 + $0x150] sm:$0xff] %v12508_v5 }
  0x3c   : > { %3221 = vst [vmem:[#allocation3 + $0x158] sm:$0xff] %v12508_v5  ;;  %3222 = vst [vmem:[#allocation3 + $0x160] sm:$0x3] %v12508_v5 }
  0x3d   : > { %3223 = vst [vmem:[#allocation3 + $0x168] sm:$0xff] %v12508_v5  ;;  %3224 = vst [vmem:[#allocation3 + $0x170] sm:$0xff] %v12508_v5 }
  0x3e   : > { %3225 = vst [vmem:[#allocation3 + $0x178] sm:$0x3] %v12508_v5  ;;  %3226 = vst [vmem:[#allocation3 + $0x180] sm:$0xff] %v12508_v5 }
  0x3f   : > { %3227 = vst [vmem:[#allocation3 + $0x188] sm:$0xff] %v12508_v5  ;;  %3228 = vst [vmem:[#allocation3 + $0x190] sm:$0x3] %v12508_v5 }
  0x40   : > { %3231 = vst [vmem:[#allocation3 + $0x1a8] sm:$0x3] %v12508_v5  ;;  %312 = vst [vmem:[#allocation2 + $0x19] sm:$0xff] %v225_v13 }
  0x41   : > { %313 = vst [vmem:[#allocation2 + $0x21] sm:$0xff] %v226_v14  ;;  %314 = vst [vmem:[#allocation2 + $0x31] sm:$0xff] %v227_v15  ;;  %v8827_v14 = vpack.c.bf16 %v402_v7, %v401_v59  ;;  %v403_v15 = vld [vmem:[%s12503_s1 + $0x20] sm:$0xff] }
  0x42   : > { %315 = vst [vmem:[#allocation2 + $0x39] sm:$0xff] %v228_v16  ;;  %316 = vst [vmem:[#allocation2 + $0x49] sm:$0xff] %v229_v17  ;;  %v404_v17 = vld [vmem:[%s12503_s1 + $0x28] sm:$0xff] }
  0x43   : > { %317 = vst [vmem:[#allocation2 + $0x51] sm:$0xff] %v230_v18  ;;  %318 = vst [vmem:[#allocation2 + $0x61] sm:$0xff] %v231_v21  ;;  %8828 = vmatprep.subr.bf16.mxu0 %v8827_v14 }
  0x44   : > { %319 = vst [vmem:[#allocation2 + $0x69] sm:$0xff] %v232_v22  ;;  %320 = vst [vmem:[#allocation2 + $0x79] sm:$0xff] %v233_v24  ;;  %v8831_v24 = vpack.c.bf16 %v404_v17, %v403_v15  ;;  %8830 = vmatpush3.bf16.msra.mxu0 %v8827_v14 }
  0x45   : > { %321 = vst [vmem:[#allocation2 + $0x81] sm:$0xff] %v234_v25  ;;  %322 = vst [vmem:[#allocation2 + $0x91] sm:$0xff] %v235_v26  ;;  %v405_v25 = vld [vmem:[%s12503_s1 + $0x30] sm:$0xff] }
  0x46   : > { %323 = vst [vmem:[#allocation2 + $0x99] sm:$0xff] %v236_v27  ;;  %324 = vst [vmem:[#allocation2 + $0xa9] sm:$0xff] %v237_v28  ;;  %v406_v28 = vld [vmem:[%s12503_s1 + $0x38] sm:$0xff]  ;;  %8832 = vmatprep.subr.bf16.mxu0 %v8831_v24 }
  0x47   : > { %325 = vst [vmem:[#allocation2 + $0xb1] sm:$0xff] %v238_v29  ;;  %326 = vst [vmem:[#allocation2 + $0xc1] sm:$0xff] %v239_v31  ;;  %v10240_v52 = vld [vmem:[#allocation2 + $0x18] sm:$0xff]  ;;  %v8835_v35 = vpack.c.bf16 %v406_v28, %v405_v25 }
  0x48   : > { %327 = vst [vmem:[#allocation2 + $0xc9] sm:$0xff] %v240_v32  ;;  %328 = vst [vmem:[#allocation2 + $0xd9] sm:$0xff] %v241_v41  ;;  %v10242_v53 = vld [vmem:[#allocation2 + $0x20] sm:$0xff]  ;;  %v469_v62 = vrot.slane %v10240_v52, 1  ;;  %v10255_v0 = vld [vmem:[#allocation2 + $0x28] sm:$0x3]  ;;  %8834 = vmatpush3.bf16.msra.mxu0 %v8831_v24 }
  0x49   : > { %329 = vst [vmem:[#allocation2 + $0xe1] sm:$0xff] %v242_v42  ;;  %330 = vst [vmem:[#allocation2 + $0xf1] sm:$0xff] %v243_v43  ;;  %v470_v63 = vrot.slane %v10242_v53, 1  ;;  %v10259_v3 = vld [vmem:[#allocation2 + $0x30] sm:$0xff]  ;;  %v10261_v4 = vld [vmem:[#allocation2 + $0x38] sm:$0xff]  ;;  %v472_v9 = vrot.slane %v10255_v0, 1  ;;  %8836 = vmatprep.subr.bf16.mxu0 %v8835_v35 }
  0x4a   : > { %331 = vst [vmem:[#allocation2 + $0xf9] sm:$0xff] %v244_v47  ;;  %332 = vst [vmem:[#allocation2 + $0x109] sm:$0xff] %v245_v49  ;;  %v474_v11 = vrot.slane %v10259_v3, 1  ;;  %v475_v12 = vrot.slane %v10261_v4, 1  ;;  %v10274_v13 = vld [vmem:[#allocation2 + $0x40] sm:$0x3] }
  0x4b   : > { %333 = vst [vmem:[#allocation2 + $0x111] sm:$0xff] %v246_v50  ;;  %334 = vst [vmem:[#allocation2 + $0x121] sm:$0xff] %v247_v51  ;;  %v10270_v10 = vsel %vm463_vm0, %v469_v62, %v470_v63  ;;  %v10279_v16 = vld [vmem:[#allocation2 + $0x48] sm:$0xff]  ;;  %v10281_v6 = vld [vmem:[#allocation2 + $0x50] sm:$0xff]  ;;  %v10288_v18 = vsel %vm463_vm0, %v470_v63, %v472_v9  ;;  %v477_v19 = vrot.slane %v10274_v13, 1 }
  0x4c   : > { %335 = vst [vmem:[#allocation2 + $0x129] sm:$0xff] %v248_v54  ;;  %336 = vst [vmem:[#allocation2 + $0x139] sm:$0xff] %v249_v55  ;;  %7386 = vmatprep.mubr.f32.mxu0 %v10270_v10  ;;  %v10292_v20 = vsel %vm463_vm0, %v474_v11, %v475_v12  ;;  %v479_v21 = vrot.slane %v10279_v16, 1  ;;  %v480_v22 = vrot.slane %v10281_v6, 1  ;;  %v10296_v23 = vld [vmem:[#allocation2 + $0x58] sm:$0x3]  ;;  %8838 = vmatpush3.bf16.msra.mxu0 %v8835_v35 }
  0x4d   : > { %337 = vst [vmem:[#allocation2 + $0x141] sm:$0xff] %v250_v56  ;;  %338 = vst [vmem:[#allocation2 + $0x151] sm:$0xff] %v251_v57  ;;  %v10301_v26 = vld [vmem:[#allocation2 + $0x60] sm:$0xff]  ;;  %v10303_v27 = vld [vmem:[#allocation2 + $0x68] sm:$0xff]  ;;  %7387 = vmatmul.mubr.f32.gmra.mrb[2].mxu0 %v10288_v18  ;;  %v10311_v29 = vsel %vm463_vm0, %v475_v12, %v477_v19  ;;  %v482_v30 = vrot.slane %v10296_v23, 1  ;;  %8840 = vmatprep.subr.bf16.mxu0 %v8839_v48 }
  0x4e   : > { %339 = vst [vmem:[#allocation2 + $0x159] sm:$0xff] %v252_v60  ;;  %340 = vst [vmem:[#allocation2 + $0x169] sm:$0xff] %v253_v1  ;;  %7389 = vmatprep.mubr.f32.mxu0 %v10292_v20  ;;  %v10315_v31 = vsel %vm463_vm0, %v479_v21, %v480_v22  ;;  %v484_v32 = vrot.slane %v10301_v26, 1  ;;  %v485_v33 = vrot.slane %v10303_v27, 1  ;;  %v10319_v34 = vld [vmem:[#allocation2 + $0x70] sm:$0x3] }
  0x4f   : > { %341 = vst [vmem:[#allocation2 + $0x171] sm:$0xff] %v254_v2  ;;  %12672 = vst [vmem:[#allocation4_spill] sm:$0xff] %v10315_v31  ;;  %v10324_v37 = vld [vmem:[#allocation2 + $0x78] sm:$0xff]  ;;  %v10326_v38 = vld [vmem:[#allocation2 + $0x80] sm:$0xff]  ;;  %v10334_v40 = vsel %vm463_vm0, %v480_v22, %v482_v30  ;;  %v487_v41 = vrot.slane %v10319_v34, 1 }
  0x50   : > { %12673 = vst [vmem:[#allocation5_spill] sm:$0xff] %v10334_v40  ;;  %v10338_v42 = vsel %vm463_vm0, %v484_v32, %v485_v33  ;;  %v489_v43 = vrot.slane %v10324_v37, 1  ;;  %v490_v45 = vrot.slane %v10326_v38, 1  ;;  %v10342_v46 = vld [vmem:[#allocation2 + $0x88] sm:$0x3]  ;;  %v10344_v47 = vld [vmem:[#allocation2 + $0x90] sm:$0xff]  ;;  %8842 = vmatpush3.bf16.msra.mxu0 %v8839_v48 }
  0x51   : > { %7390 = vmatmul.mubr.f32.gmra.mrb[4].mxu0 %v10311_v29  ;;  %12674 = vst [vmem:[#allocation6_spill] sm:$0xff] %v10338_v42  ;;  %v10346_v49 = vld [vmem:[#allocation2 + $0x98] sm:$0xff]  ;;  %v409_v50 = vld [vmem:[%s12503_s1 + $0x50] sm:$0xff]  ;;  %v10357_v54 = vsel %vm463_vm0, %v485_v33, %v487_v41  ;;  %v492_v55 = vrot.slane %v10342_v46, 1  ;;  %v494_v57 = vrot.slane %v10344_v47, 1  ;;  %v10367_v60 = vld [vmem:[#allocation2 + $0xa8] sm:$0xff] }
  0x52   : > { %7392 = vmatprep.mubr.f32.mxu0 %v10315_v31  ;;  %v410_v51 = vld [vmem:[%s12503_s1 + $0x58] sm:$0xff]  ;;  %12675 = vst [vmem:[#allocation7_spill] sm:$0xff] %v10357_v54  ;;  %v10361_v56 = vsel %vm463_vm0, %v489_v43, %v490_v45  ;;  %v495_v58 = vrot.slane %v10346_v49, 1  ;;  %v10365_v59 = vld [vmem:[#allocation2 + $0xa0] sm:$0x3]  ;;  %v10369_v62 = vld [vmem:[#allocation2 + $0xb0] sm:$0xff] }
  0x53   : > { %12676 = vst [vmem:[#allocation8_spill] sm:$0xff] %v10361_v56  ;;  %v8843_v61 = vpack.c.bf16 %v410_v51, %v409_v50  ;;  %v411_v63 = vld [vmem:[%s12503_s1 + $0x60] sm:$0xff]  ;;  %v412_v1 = vld [vmem:[%s12503_s1 + $0x68] sm:$0xff]  ;;  %v10380_v2 = vsel %vm463_vm0, %v490_v45, %v492_v55  ;;  %v497_v7 = vrot.slane %v10365_v59, 1  ;;  %v499_v9 = vrot.slane %v10367_v60, 1  ;;  %v413_v19 = vld [vmem:[%s12503_s1 + $0x70] sm:$0xff] }
  0x54   : > { %12677 = vst [vmem:[#allocation9_spill] sm:$0xff] %v10380_v2  ;;  %v10384_v8 = vsel %vm463_vm0, %v494_v57, %v495_v58  ;;  %v500_v11 = vrot.slane %v10369_v62, 1  ;;  %v10388_v12 = vld [vmem:[#allocation2 + $0xb8] sm:$0x3]  ;;  %v10390_v14 = vld [vmem:[#allocation2 + $0xc0] sm:$0xff]  ;;  %v8847_v15 = vpack.c.bf16 %v412_v1, %v411_v63  ;;  %v10392_v17 = vld [vmem:[#allocation2 + $0xc8] sm:$0xff] }
  0x55   : > { %7393 = vmatmul.mubr.f32.gmra.mrb[6].mxu0 %v10334_v40  ;;  %12678 = vst [vmem:[#allocation10_spill] sm:$0xff] %v10384_v8  ;;  %8844 = vmatprep.subr.bf16.mxu0 %v8843_v61  ;;  %v414_v21 = vld [vmem:[%s12503_s1 + $0x78] sm:$0xff]  ;;  %v10403_v22 = vsel %vm463_vm0, %v495_v58, %v497_v7  ;;  %v502_v24 = vrot.slane %v10388_v12, 1  ;;  %v504_v28 = vrot.slane %v10390_v14, 1  ;;  %v505_v30 = vrot.slane %v10392_v17, 1  ;;  %v6241_v35 = vld [vmem:[%s12503_s1 + $0x100] sm:$0xff] }
  0x56   : > { %7395 = vmatprep.mubr.f32.mxu0 %v10338_v42  ;;  %12679 = vst [vmem:[#allocation11_spill] sm:$0xff] %v10403_v22  ;;  %8846 = vmatpush3.bf16.msra.mxu0 %v8843_v61  ;;  %v10407_v25 = vsel %vm463_vm0, %v499_v9, %v500_v11  ;;  %v10411_v32 = vld [vmem:[#allocation2 + $0xd0] sm:$0x3]  ;;  %v8851_v33 = vpack.c.bf16 %v414_v21, %v413_v19  ;;  %v10416_v36 = vld [vmem:[#allocation2 + $0xd8] sm:$0xff]  ;;  %v10418_v39 = vld [vmem:[#allocation2 + $0xe0] sm:$0xff] }
  0x57   : > { %12680 = vst [vmem:[#allocation12_spill] sm:$0xff] %v10407_v25  ;;  %8848 = vmatprep.subr.bf16.mxu0 %v8847_v15  ;;  %v6242_v41 = vld [vmem:[%s12503_s1 + $0x108] sm:$0xff]  ;;  %v10426_v43 = vsel %vm463_vm0, %v500_v11, %v502_v24  ;;  %v507_v45 = vrot.slane %v10411_v32, 1  ;;  %v10430_v48 = vsel %vm463_vm0, %v504_v28, %v505_v30  ;;  %v509_v50 = vrot.slane %v10416_v36, 1  ;;  %v10438_v58 = vld [vmem:[#allocation2 + $0xf0] sm:$0xff]  ;;  %v10440_v61 = vld [vmem:[#allocation2 + $0xf8] sm:$0xff] }
  0x58   : > { %12681 = vst [vmem:[#allocation13_spill] sm:$0xff] %v10426_v43  ;;  %12682 = vst [vmem:[#allocation14_spill] sm:$0xff] %v10430_v48  ;;  %v510_v51 = vrot.slane %v10418_v39, 1  ;;  %v10434_v55 = vld [vmem:[#allocation2 + $0xe8] sm:$0x3]  ;;  %v10436_v57 = vpack.c.bf16 %v6242_v41, %v6241_v35  ;;  %v514_v9 = vrot.slane %v10438_v58, 1 }
  0x59   : > { %7396 = vmatmul.mubr.f32.gmra.mrb[8].mxu0 %v10357_v54  ;;  %v10445_v63 = vsel %vm463_vm0, %v505_v30, %v507_v45  ;;  %v512_v1 = vrot.slane %v10434_v55, 1  ;;  %v515_v11 = vrot.slane %v10440_v61, 1  ;;  %v10456_v19 = vld [vmem:[#allocation2 + $0x108] sm:$0xff]  ;;  %v10458_v21 = vld [vmem:[#allocation2 + $0x110] sm:$0xff]  ;;  %v10471_v41 = vld [vmem:[#allocation2 + $0x118] sm:$0x3] }
  0x5a   : > { %7398 = vmatprep.mubr.f32.mxu0 %v10361_v56  ;;  %8850 = vmatpush3.bf16.msra.mxu0 %v8847_v15  ;;  %12683 = vst [vmem:[#allocation15_spill] sm:$0xff] %v10445_v63  ;;  %v10449_v7 = vsel %vm463_vm0, %v509_v50, %v510_v51  ;;  %v10453_v15 = vld [vmem:[#allocation2 + $0x100] sm:$0x3]  ;;  %v520_v35 = vrot.slane %v10458_v21, 1  ;;  %v10475_v50 = vld [vmem:[#allocation2 + $0x128] sm:$0xff]  ;;  %v10526_v54 = vld [vmem:[#allocation2 + $0x170] sm:$0xff] }
  0x5b   : > { %8852 = vmatprep.subr.bf16.mxu0 %v8851_v33  ;;  %12684 = vst [vmem:[#allocation16_spill] sm:$0xff] %v10449_v7  ;;  %v10463_v24 = vsel %vm463_vm0, %v510_v51, %v512_v1  ;;  %v517_v28 = vrot.slane %v10453_v15, 1  ;;  %v10467_v30 = vsel %vm463_vm0, %v514_v9, %v515_v11  ;;  %v10473_v45 = vld [vmem:[#allocation2 + $0x120] sm:$0xff]  ;;  %v522_v1 = vrot.slane %v10471_v41, 1  ;;  %v10524_v56 = vld [vmem:[#allocation2 + $0x168] sm:$0xff] }
  0x5c   : > { %12685 = vst [vmem:[#allocation17_spill] sm:$0xff] %v10463_v24  ;;  %12686 = vst [vmem:[#allocation18_spill] sm:$0xff] %v10467_v30  ;;  %v524_v5 = vrot.slane %v10473_v45, 1  ;;  %v10539_v42 = vld [vmem:[#allocation2 + $0x178] sm:$0x3]  ;;  %v6261_v40 = vld [vmem:[%s12503_s1 + $0x1a0] sm:$0xff] }
  0x5d   : > { %7399 = vmatmul.mubr.f32.gmra.mrb[10].mxu0 %v10380_v2  ;;  %v10480_v51 = vsel %vm463_vm0, %v515_v11, %v517_v28  ;;  %v10497_v11 = vsel %vm463_vm0, %v520_v35, %v522_v1  ;;  %v10522_v2 = vld [vmem:[#allocation2 + $0x160] sm:$0x3]  ;;  %v6262_v31 = vld [vmem:[%s12503_s1 + $0x1a8] sm:$0xff] }
  0x5e   : > { %7401 = vmatprep.mubr.f32.mxu0 %v10384_v8  ;;  %8854 = vmatpush3.bf16.msra.mxu0 %v8851_v33  ;;  %v519_v33 = vrot.slane %v10456_v19, 1  ;;  %12687 = vst [vmem:[#allocation19_spill] sm:$0xff] %v10480_v51  ;;  %12689 = vst [vmem:[#allocation21_spill] sm:$0xff] %v10497_v11  ;;  %v10509_v8 = vld [vmem:[#allocation2 + $0x158] sm:$0xff] }
  0x5f   : > { %8856 = vmatprep.subr.bf16.mxu0 %v10436_v57 }
  0x60   : > { %v10484_v9 = vsel %vm463_vm0, %v519_v33, %v520_v35 }
  0x61   : > { %7402 = vmatmul.mubr.f32.gmra.mrb[12].mxu0 %v10403_v22  ;;  %12688 = vst [vmem:[#allocation20_spill] sm:$0xff] %v10484_v9  ;;  %v10507_v22 = vld [vmem:[#allocation2 + $0x150] sm:$0xff] }
  0x62   : > { %7404 = vmatprep.mubr.f32.mxu0 %v10407_v25  ;;  %v10505_v25 = vld [vmem:[#allocation2 + $0x148] sm:$0x3] }
  0x65   : > { %7405 = vmatmul.mubr.f32.gmra.mrb[14].mxu0 %v10426_v43  ;;  %v10492_v43 = vld [vmem:[#allocation2 + $0x140] sm:$0xff] }
  0x66   : > { %7407 = vmatprep.mubr.f32.mxu0 %v10430_v48  ;;  %v10490_v48 = vld [vmem:[#allocation2 + $0x138] sm:$0xff] }
  0x69   : > { %7408 = vmatmul.mubr.f32.gmra.mrb[16].mxu0 %v10445_v63  ;;  %v10488_v63 = vld [vmem:[#allocation2 + $0x130] sm:$0x3] }
  0x6a   : > { %7410 = vmatprep.mubr.f32.mxu0 %v10449_v7  ;;  %v525_v7 = vrot.slane %v10475_v50, 1  ;;  %v527_v28 = vrot.slane %v10488_v63, 1 }
  0x6c   : > { %v10501_v33 = vsel %vm463_vm0, %v524_v5, %v525_v7  ;;  %v10514_v35 = vsel %vm463_vm0, %v525_v7, %v527_v28  ;;  %v532_v5 = vrot.slane %v10505_v25, 1 }
  0x6d   : > { %7411 = vmatmul.mubr.f32.gmra.mrb[18].mxu0 %v10463_v24  ;;  %12690 = vst [vmem:[#allocation22_spill] sm:$0xff] %v10501_v33  ;;  %v530_v24 = vrot.slane %v10492_v43, 1  ;;  %12691 = vst [vmem:[#allocation23_spill] sm:$0xff] %v10514_v35 }
  0x6e   : > { %7413 = vmatprep.mubr.f32.mxu0 %v10467_v30  ;;  %v529_v30 = vrot.slane %v10490_v48, 1 }
  0x6f   : > { %v10531_v7 = vsel %vm463_vm0, %v530_v24, %v532_v5 }
  0x70   : > { %v10518_v1 = vsel %vm463_vm0, %v529_v30, %v530_v24  ;;  %12693 = vst [vmem:[#allocation25_spill] sm:$0xff] %v10531_v7  ;;  %v537_v30 = vrot.slane %v10522_v2, 1  ;;  %v542_v24 = vrot.slane %v10539_v42, 1 }
  0x71   : > { %7414 = vmatmul.mubr.f32.gmra.mrb[20].mxu0 %v10480_v51  ;;  %12692 = vst [vmem:[#allocation24_spill] sm:$0xff] %v10518_v1  ;;  %v535_v51 = vrot.slane %v10509_v8, 1 }
  0x72   : > { %7416 = vmatprep.mubr.f32.mxu0 %v10484_v9  ;;  %v534_v9 = vrot.slane %v10507_v22, 1 }
  0x74   : > { %v10535_v28 = vsel %vm463_vm0, %v534_v9, %v535_v51 }
  0x75   : > { %7417 = vmatmul.mubr.f32.gmra.mrb[22].mxu0 %v10497_v11  ;;  %12694 = vst [vmem:[#allocation26_spill] sm:$0xff] %v10535_v28  ;;  %v540_v11 = vrot.slane %v10526_v54, 1 }
  0x76   : > { %7419 = vmatprep.mubr.f32.mxu0 %v10501_v33  ;;  %v539_v33 = vrot.slane %v10524_v56, 1 }
  0x77   : > { %v10553_v9 = vsel %vm463_vm0, %v540_v11, %v542_v24 }
  0x78   : > { %v10548_v5 = vsel %vm463_vm0, %v539_v33, %v540_v11  ;;  %12697 = vst [vmem:[#allocation29_spill] sm:$0xff] %v10553_v9  ;;  %v6246_v11 = vld [vmem:[%s12503_s1 + $0x128] sm:$0xff] }
  0x79   : > { %7420 = vmatmul.mubr.f32.gmra.mrb[24].mxu0 %v10514_v35  ;;  %12696 = vst [vmem:[#allocation28_spill] sm:$0xff] %v10548_v5 }
  0x7a   : > { %7422 = vmatprep.mubr.f32.mxu0 %v10518_v1  ;;  %v10544_v1 = vsel %vm463_vm0, %v535_v51, %v537_v30  ;;  %v6244_v51 = vld [vmem:[%s12503_s1 + $0x118] sm:$0xff]  ;;  %v12698_v30 = vmov 0.0  }
  0x7b   : > { %12695 = vst [vmem:[#allocation27_spill] sm:$0xff] %v10544_v1 }
  0x7d   : > { %7423 = vmatmul.mubr.f32.gmra.mrb[26].mxu0 %v10531_v7  ;;  %v6243_v7 = vld [vmem:[%s12503_s1 + $0x110] sm:$0xff] }
  0x7e   : > { %7425 = vmatprep.mubr.f32.mxu0 %v10535_v28  ;;  %v8859_v33 = vpack.c.bf16 %v6244_v51, %v6243_v7  ;;  %v6247_v7 = vld [vmem:[%s12503_s1 + $0x130] sm:$0xff]  ;;  %v6248_v51 = vld [vmem:[%s12503_s1 + $0x138] sm:$0xff]  ;;  %v1055_v28 = vrot.slane %v10261_v4, 2 }
  0x81   : > { %7426 = vmatmul.mubr.f32.gmra.mrb[28].mxu0 %v10544_v1  ;;  %v1054_v1 = vrot.slane %v10259_v3, 2 }
  0x82   : > { %7428 = vmatprep.mubr.f32.mxu0 %v10548_v5  ;;  %v6245_v5 = vld [vmem:[%s12503_s1 + $0x120] sm:$0xff] }
  0x83   : > { %v8863_v24 = vpack.c.bf16 %v6246_v11, %v6245_v5  ;;  %v6250_v5 = vld [vmem:[%s12503_s1 + $0x148] sm:$0xff] }
  0x85   : > { %7429 = vmatmul.mubr.f32.gmra.mrb[30].mxu0 %v10553_v9  ;;  %v8867_v9 = vpack.c.bf16 %v6248_v51, %v6247_v7  ;;  %v6252_v7 = vld [vmem:[%s12503_s1 + $0x158] sm:$0xff] }
  0x86   : > { %7463 = vmatprep.mubr.f32.mxu0 %v12698_v30 }
  0x89   : > { %7464 = vmatmul.mubr.f32.vlgmr.msra.gmra.mrb[0].mxu0 %v12698_v30 }
  0x8a   : > { %8858 = vmatpush3.bf16.msra.mxu0 %v10436_v57  ;;  %7466 = vmatprep.mubr.f32.mxu0 %v10240_v52  ;;  %v6249_v57 = vld [vmem:[%s12503_s1 + $0x140] sm:$0xff] }
  0x8b   : > { %8860 = vmatprep.subr.bf16.mxu0 %v8859_v33  ;;  %v8871_v11 = vpack.c.bf16 %v6250_v5, %v6249_v57  ;;  %v6254_v57 = vld [vmem:[%s12503_s1 + $0x168] sm:$0xff] }
  0x8d   : > { %7467 = vmatmul.mubr.f32.gmra.mrb[2].mxu0 %v10242_v53 }
  0x8e   : > { %7469 = vmatprep.mubr.f32.mxu0 %v10259_v3  ;;  %8862 = vmatpush3.bf16.msra.mxu0 %v8859_v33  ;;  %v6251_v33 = vld [vmem:[%s12503_s1 + $0x150] sm:$0xff] }
  0x8f   : > { %8864 = vmatprep.subr.bf16.mxu0 %v8863_v24  ;;  %v8875_v51 = vpack.c.bf16 %v6252_v7, %v6251_v33  ;;  %v6256_v33 = vld [vmem:[%s12503_s1 + $0x178] sm:$0xff] }
  0x91   : > { %7470 = vmatmul.mubr.f32.gmra.mrb[4].mxu0 %v10261_v4 }
  0x92   : > { %7472 = vmatprep.mubr.f32.mxu0 %v10279_v16  ;;  %8866 = vmatpush3.bf16.msra.mxu0 %v8863_v24  ;;  %v6253_v24 = vld [vmem:[%s12503_s1 + $0x160] sm:$0xff] }
  0x93   : > { %8868 = vmatprep.subr.bf16.mxu0 %v8867_v9  ;;  %v8879_v5 = vpack.c.bf16 %v6254_v57, %v6253_v24  ;;  %v6258_v24 = vld [vmem:[%s12503_s1 + $0x188] sm:$0xff] }
  0x95   : > { %7473 = vmatmul.mubr.f32.gmra.mrb[6].mxu0 %v10281_v6 }
  0x96   : > { %7475 = vmatprep.mubr.f32.mxu0 %v10301_v26  ;;  %8870 = vmatpush3.bf16.msra.mxu0 %v8867_v9  ;;  %v6255_v9 = vld [vmem:[%s12503_s1 + $0x170] sm:$0xff] }
  0x97   : > { %8872 = vmatprep.subr.bf16.mxu0 %v8871_v11  ;;  %v8883_v7 = vpack.c.bf16 %v6256_v33, %v6255_v9  ;;  %v10637_v9 = vrot.slane %v12698_v30, 2  ;;  %v1047_v33 = vrot.slane %v10228_v44, 2  ;;  %v6260_v30 = vld [vmem:[%s12503_s1 + $0x198] sm:$0xff] }
  0x99   : > { %7476 = vmatmul.mubr.f32.gmra.mrb[8].mxu0 %v10303_v27  ;;  %12699 = vst [vmem:[#allocation30_spill] sm:$0xff] %v10637_v9  ;;  %v1048_v44 = vsel %vm1043_vm1, %v10637_v9, %v1047_v33  ;;  %v1057_v33 = vrot.slane %v10274_v13, 2 }
  0x9a   : > { %7478 = vmatprep.mubr.f32.mxu0 %v10324_v37  ;;  %8874 = vmatpush3.bf16.msra.mxu0 %v8871_v11  ;;  %v6257_v11 = vld [vmem:[%s12503_s1 + $0x180] sm:$0xff] }
  0x9b   : > { %8876 = vmatprep.subr.bf16.mxu0 %v8875_v51  ;;  %v8887_v57 = vpack.c.bf16 %v6258_v24, %v6257_v11  ;;  %v1050_v11 = vrot.slane %v10242_v53, 2  ;;  %v6259_v24 = vld [vmem:[%s12503_s1 + $0x190] sm:$0xff]  ;;  %v10685_v13 = vsel %vm1043_vm1, %v1055_v28, %v1057_v33 }
  0x9c   : > { %v8891_v35 = vpack.c.bf16 %v6260_v30, %v6259_v24  ;;  %v1059_v24 = vrot.slane %v10279_v16, 2  ;;  %v1060_v30 = vrot.slane %v10281_v6, 2  ;;  %12701 = vst [vmem:[#allocation32_spill] sm:$0xff] %v10685_v13 }
  0x9d   : > { %7479 = vmatmul.mubr.f32.gmra.mrb[10].mxu0 %v10326_v38 }
  0x9e   : > { %7481 = vmatprep.mubr.f32.mxu0 %v10344_v47  ;;  %8878 = vmatpush3.bf16.msra.mxu0 %v8875_v51  ;;  %v255_v51 = vld [vmem:[%s10183_s15 + $0xf0] sm:$0xff] }
  0x9f   : > { %8880 = vmatprep.subr.bf16.mxu0 %v8879_v5  ;;  %342 = vst [vmem:[#allocation2 + $0x181] sm:$0xff] %v255_v51  ;;  %v1052_v51 = vrot.slane %v10255_v0, 2 }
  0xa1   : > { %7482 = vmatmul.mubr.f32.gmra.mrb[12].mxu0 %v10346_v49  ;;  %v10668_v0 = vsel %vm1043_vm1, %v1050_v11, %v1052_v51 }
  0xa2   : > { %7484 = vmatprep.mubr.f32.mxu0 %v10367_v60  ;;  %8882 = vmatpush3.bf16.msra.mxu0 %v8879_v5  ;;  %v256_v5 = vld [vmem:[%s10183_s15 + $0xf8] sm:$0xff]  ;;  %12700 = vst [vmem:[#allocation31_spill] sm:$0xff] %v10668_v0 }
  0xa3   : > { %8884 = vmatprep.subr.bf16.mxu0 %v8883_v7  ;;  %343 = vst [vmem:[#allocation2 + $0x189] sm:$0xff] %v256_v5 }
  0xa5   : > { %7485 = vmatmul.mubr.f32.gmra.mrb[14].mxu0 %v10369_v62 }
  0xa6   : > { %7487 = vmatprep.mubr.f32.mxu0 %v10390_v14  ;;  %8886 = vmatpush3.bf16.msra.mxu0 %v8883_v7  ;;  %v1049_v7 = vrot.slane %v10240_v52, 2 }
  0xa7   : > { %8888 = vmatprep.subr.bf16.mxu0 %v8887_v57 }
  0xa8   : > { %v10656_v5 = vsel %vm1043_vm1, %v1049_v7, %v1050_v11  ;;  %v10672_v7 = vsel %vm1043_vm1, %v1054_v1, %v1055_v28  ;;  %v6264_v11 = vld [vmem:[%s12503_s1 + $0x1b8] sm:$0xff]  ;;  %v1062_v1 = vrot.slane %v10296_v23, 2  ;;  %v6266_v28 = vld [vmem:[%s12503_s1 + $0x1c8] sm:$0xff] }
  0xa9   : > { %7488 = vmatmul.mubr.f32.gmra.mrb[16].mxu0 %v10392_v17 }
  0xaa   : > { %7490 = vmatprep.mubr.f32.mxu0 %v10416_v36  ;;  %v10702_v23 = vsel %vm1043_vm1, %v1060_v30, %v1062_v1  ;;  %v1074_v1 = vrot.slane %v10344_v47, 2 }
  0xab   : > { %12702 = vst [vmem:[#allocation33_spill] sm:$0xff] %v10702_v23 }
  0xad   : > { %7491 = vmatmul.mubr.f32.gmra.mrb[18].mxu0 %v10418_v39 }
  0xae   : > { %7493 = vmatprep.mubr.f32.mxu0 %v10438_v58 }
  0xb1   : > { %7494 = vmatmul.mubr.f32.gmra.mrb[20].mxu0 %v10440_v61 }
  0xb2   : > { %7496 = vmatprep.mubr.f32.mxu0 %v10456_v19 }
  0xb5   : > { %7497 = vmatmul.mubr.f32.gmra.mrb[22].mxu0 %v10458_v21 }
  0xb6   : > { %7499 = vmatprep.mubr.f32.mxu0 %v10473_v45 }
  0xb9   : > { %7500 = vmatmul.mubr.f32.gmra.mrb[24].mxu0 %v10475_v50 }
  0xba   : > { %7502 = vmatprep.mubr.f32.mxu0 %v10490_v48 }
  0xbd   : > { %7503 = vmatmul.mubr.f32.gmra.mrb[26].mxu0 %v10492_v43 }
  0xbe   : > { %7505 = vmatprep.mubr.f32.mxu0 %v10507_v22 }
  0xc1   : > { %7506 = vmatmul.mubr.f32.gmra.mrb[28].mxu0 %v10509_v8 }
  0xc2   : > { %7508 = vmatprep.mubr.f32.mxu0 %v10524_v56 }
  0xc5   : > { %7509 = vmatmul.mubr.f32.gmra.mrb[30].mxu0 %v10526_v54 }
  0xc6   : > { %7543 = vmatprep.mubr.f32.mxu0 %v10637_v9  ;;  %v8895_v9 = vpack.c.bf16 %v6262_v31, %v6261_v40  ;;  %v10689_v31 = vsel %vm1043_vm1, %v1059_v24, %v1060_v30  ;;  %v1064_v40 = vrot.slane %v10301_v26, 2  ;;  %v1069_v24 = vrot.slane %v10324_v37, 2  ;;  %v6268_v30 = vld [vmem:[%s12503_s1 + $0x1d8] sm:$0xff] }
  0xc9   : > { %7544 = vmatmul.mubr.f32.vlgmr.msra.gmra.mrb[0].mxu0 %v1048_v44  ;;  %v1065_v44 = vrot.slane %v10303_v27, 2 }
  0xca   : > { %8890 = vmatpush3.bf16.msra.mxu0 %v8887_v57  ;;  %7546 = vmatprep.mubr.f32.mxu0 %v10656_v5  ;;  %v6263_v57 = vld [vmem:[%s12503_s1 + $0x1b0] sm:$0xff] }
  0xcb   : > { %8892 = vmatprep.subr.bf16.mxu0 %v8891_v35  ;;  %v8899_v51 = vpack.c.bf16 %v6264_v11, %v6263_v57  ;;  %v10706_v33 = vsel %vm1043_vm1, %v1064_v40, %v1065_v44  ;;  %v1070_v57 = vrot.slane %v10326_v38, 2  ;;  %v1075_v40 = vrot.slane %v10346_v49, 2 }
  0xcd   : > { %7547 = vmatmul.mubr.f32.gmra.mrb[2].mxu0 %v10668_v0  ;;  %v6265_v0 = vld [vmem:[%s12503_s1 + $0x1c0] sm:$0xff] }
  0xce   : > { %7549 = vmatprep.mubr.f32.mxu0 %v10672_v7  ;;  %8894 = vmatpush3.bf16.msra.mxu0 %v8891_v35  ;;  %v1067_v35 = vrot.slane %v10319_v34, 2  ;;  %v8903_v11 = vpack.c.bf16 %v6266_v28, %v6265_v0  ;;  %v10723_v0 = vsel %vm1043_vm1, %v1069_v24, %v1070_v57  ;;  %v1080_v24 = vrot.slane %v10369_v62, 2 }
  0xcf   : > { %8896 = vmatprep.subr.bf16.mxu0 %v8895_v9 }
  0xd0   : > { %v10719_v34 = vsel %vm1043_vm1, %v1065_v44, %v1067_v35  ;;  %v6270_v44 = vld [vmem:[%s12503_s1 + $0x1e8] sm:$0xff]  ;;  %v1079_v35 = vrot.slane %v10367_v60, 2 }
  0xd1   : > { %7550 = vmatmul.mubr.f32.gmra.mrb[4].mxu0 %v10685_v13  ;;  %v6267_v13 = vld [vmem:[%s12503_s1 + $0x1d0] sm:$0xff]  ;;  %12703 = vst [vmem:[#allocation34_spill] sm:$0xff] %v10719_v34 }
  0xd2   : > { %7552 = vmatprep.mubr.f32.mxu0 %v10689_v31  ;;  %8898 = vmatpush3.bf16.msra.mxu0 %v8895_v9  ;;  %v1072_v9 = vrot.slane %v10342_v46, 2  ;;  %v8907_v28 = vpack.c.bf16 %v6268_v30, %v6267_v13  ;;  %v10740_v13 = vsel %vm1043_vm1, %v1074_v1, %v1075_v40  ;;  %v1085_v1 = vrot.slane %v10392_v17, 2 }
  0xd3   : > { %8900 = vmatprep.subr.bf16.mxu0 %v8899_v51 }
  0xd4   : > { %v10736_v46 = vsel %vm1043_vm1, %v1070_v57, %v1072_v9  ;;  %v6272_v57 = vld [vmem:[%s12503_s1 + $0x1f8] sm:$0xff]  ;;  %v1084_v9 = vrot.slane %v10390_v14, 2 }
  0xd5   : > { %7553 = vmatmul.mubr.f32.gmra.mrb[6].mxu0 %v10702_v23  ;;  %v6269_v23 = vld [vmem:[%s12503_s1 + $0x1e0] sm:$0xff]  ;;  %12704 = vst [vmem:[#allocation35_spill] sm:$0xff] %v10736_v46 }
  0xd6   : > { %7555 = vmatprep.mubr.f32.mxu0 %v10706_v33  ;;  %8902 = vmatpush3.bf16.msra.mxu0 %v8899_v51  ;;  %v1077_v51 = vrot.slane %v10365_v59, 2  ;;  %v8911_v30 = vpack.c.bf16 %v6270_v44, %v6269_v23  ;;  %v10757_v23 = vsel %vm1043_vm1, %v1079_v35, %v1080_v24  ;;  %v1090_v35 = vrot.slane %v10418_v39, 2 }
  0xd7   : > { %8904 = vmatprep.subr.bf16.mxu0 %v8903_v11  ;;  %12705 = vst [vmem:[#allocation36_spill] sm:$0xff] %v10757_v23 }
  0xd8   : > { %v10753_v59 = vsel %vm1043_vm1, %v1075_v40, %v1077_v51  ;;  %v6274_v40 = vld [vmem:[%s12503_s1 + $0x208] sm:$0xff]  ;;  %v1089_v51 = vrot.slane %v10416_v36, 2 }
  0xd9   : > { %7556 = vmatmul.mubr.f32.gmra.mrb[8].mxu0 %v10719_v34  ;;  %v6271_v34 = vld [vmem:[%s12503_s1 + $0x1f0] sm:$0xff] }
  0xda   : > { %7558 = vmatprep.mubr.f32.mxu0 %v10723_v0  ;;  %8906 = vmatpush3.bf16.msra.mxu0 %v8903_v11  ;;  %v1082_v11 = vrot.slane %v10388_v12, 2  ;;  %v8915_v44 = vpack.c.bf16 %v6272_v57, %v6271_v34  ;;  %v10774_v34 = vsel %vm1043_vm1, %v1084_v9, %v1085_v1  ;;  %v1097_v9 = vrot.slane %v10453_v15, 2 }
  0xdb   : > { %8908 = vmatprep.subr.bf16.mxu0 %v8907_v28  ;;  %v1104_v15 = vrot.slane %v10473_v45, 2 }
  0xdc   : > { %v10770_v12 = vsel %vm1043_vm1, %v1080_v24, %v1082_v11  ;;  %v1092_v24 = vrot.slane %v10434_v55, 2  ;;  %v1095_v11 = vrot.slane %v10440_v61, 2 }
  0xdd   : > { %7559 = vmatmul.mubr.f32.gmra.mrb[10].mxu0 %v10736_v46  ;;  %v6273_v46 = vld [vmem:[%s12503_s1 + $0x200] sm:$0xff] }
  0xde   : > { %7561 = vmatprep.mubr.f32.mxu0 %v10740_v13  ;;  %8910 = vmatpush3.bf16.msra.mxu0 %v8907_v28  ;;  %v1087_v28 = vrot.slane %v10411_v32, 2  ;;  %v8919_v57 = vpack.c.bf16 %v6274_v40, %v6273_v46  ;;  %v10785_v32 = vsel %vm1043_vm1, %v1089_v51, %v1090_v35  ;;  %v10792_v46 = vsel %vm1043_vm1, %v1090_v35, %v1092_v24 }
  0xdf   : > { %8912 = vmatprep.subr.bf16.mxu0 %v8911_v30  ;;  %v10803_v40 = vsel %vm1043_vm1, %v1095_v11, %v1097_v9  ;;  %v1105_v35 = vrot.slane %v10475_v50, 2  ;;  %v1110_v9 = vrot.slane %v10492_v43, 2 }
  0xe1   : > { %7562 = vmatmul.mubr.f32.gmra.mrb[12].mxu0 %v10753_v59 }
  0xe2   : > { %7564 = vmatprep.mubr.f32.mxu0 %v10757_v23  ;;  %8914 = vmatpush3.bf16.msra.mxu0 %v8911_v30  ;;  %v10781_v23 = vsel %vm1043_vm1, %v1085_v1, %v1087_v28  ;;  %v1094_v30 = vrot.slane %v10438_v58, 2  ;;  %v1099_v1 = vrot.slane %v10456_v19, 2  ;;  %v1102_v28 = vrot.slane %v10471_v41, 2 }
  0xe3   : > { %8916 = vmatprep.subr.bf16.mxu0 %v8915_v44  ;;  %v1109_v41 = vrot.slane %v10490_v48, 2 }
  0xe4   : > { %v10796_v55 = vsel %vm1043_vm1, %v1094_v30, %v1095_v11  ;;  %v1107_v30 = vrot.slane %v10488_v63, 2  ;;  %v10818_v11 = vsel %vm1043_vm1, %v1104_v15, %v1105_v35  ;;  %v1114_v63 = vrot.slane %v10507_v22, 2 }
  0xe5   : > { %7565 = vmatmul.mubr.f32.gmra.mrb[14].mxu0 %v10770_v12  ;;  %12708 = vst [vmem:[#allocation39_spill] sm:$0xff] %v10818_v11 }
  0xe6   : > { %7567 = vmatprep.mubr.f32.mxu0 %v10774_v34  ;;  %8918 = vmatpush3.bf16.msra.mxu0 %v8915_v44  ;;  %v1100_v44 = vrot.slane %v10458_v21, 2 }
  0xe7   : > { %8920 = vmatprep.subr.bf16.mxu0 %v8919_v57 }
  0xe8   : > { %v10807_v51 = vsel %vm1043_vm1, %v1099_v1, %v1100_v44  ;;  %v10814_v24 = vsel %vm1043_vm1, %v1100_v44, %v1102_v28  ;;  %v10825_v1 = vsel %vm1043_vm1, %v1105_v35, %v1107_v30  ;;  %v10829_v44 = vsel %vm1043_vm1, %v1109_v41, %v1110_v9 }
  0xe9   : > { %7568 = vmatmul.mubr.f32.gmra.mrb[16].mxu0 %v10781_v23  ;;  %12706 = vst [vmem:[#allocation37_spill] sm:$0xff] %v10807_v51  ;;  %12707 = vst [vmem:[#allocation38_spill] sm:$0xff] %v10814_v24  ;;  %v1115_v28 = vrot.slane %v10509_v8, 2  ;;  %v1120_v30 = vrot.slane %v10526_v54, 2 }
  0xea   : > { %7570 = vmatprep.mubr.f32.mxu0 %v10785_v32  ;;  %12709 = vst [vmem:[#allocation40_spill] sm:$0xff] %v10825_v1  ;;  %12710 = vst [vmem:[#allocation41_spill] sm:$0xff] %v10829_v44 }
  0xeb   : > { %v10840_v35 = vsel %vm1043_vm1, %v1114_v63, %v1115_v28  ;;  %v6277_v63 = vld [vmem:[%s12503_s1 + $0x220] sm:$0xff] }
  0xec   : > { %12712 = vst [vmem:[#allocation43_spill] sm:$0xff] %v10840_v35 }
  0xed   : > { %7571 = vmatmul.mubr.f32.gmra.mrb[18].mxu0 %v10792_v46 }
  0xee   : > { %7573 = vmatprep.mubr.f32.mxu0 %v10796_v55 }
  0xf1   : > { %7574 = vmatmul.mubr.f32.gmra.mrb[20].mxu0 %v10803_v40 }
  0xf2   : > { %7576 = vmatprep.mubr.f32.mxu0 %v10807_v51  ;;  %v1112_v51 = vrot.slane %v10505_v25, 2  ;;  %v1119_v25 = vrot.slane %v10524_v56, 2 }
  0xf4   : > { %v10836_v15 = vsel %vm1043_vm1, %v1110_v9, %v1112_v51  ;;  %v10851_v51 = vsel %vm1043_vm1, %v1119_v25, %v1120_v30  ;;  %v6275_v9 = vld [vmem:[%s12503_s1 + $0x210] sm:$0xff]  ;;  %v6280_v25 = vld [vmem:[%s12503_s1 + $0x238] sm:$0xff] }
  0xf5   : > { %7577 = vmatmul.mubr.f32.gmra.mrb[22].mxu0 %v10814_v24  ;;  %12711 = vst [vmem:[#allocation42_spill] sm:$0xff] %v10836_v15  ;;  %12714 = vst [vmem:[#allocation45_spill] sm:$0xff] %v10851_v51 }
  0xf6   : > { %7579 = vmatprep.mubr.f32.mxu0 %v10818_v11  ;;  %v1117_v11 = vrot.slane %v10522_v2, 2 }
  0xf8   : > { %v10847_v41 = vsel %vm1043_vm1, %v1115_v28, %v1117_v11  ;;  %v6276_v11 = vld [vmem:[%s12503_s1 + $0x218] sm:$0xff] }
  0xf9   : > { %7580 = vmatmul.mubr.f32.gmra.mrb[24].mxu0 %v10825_v1  ;;  %12713 = vst [vmem:[#allocation44_spill] sm:$0xff] %v10847_v41 }
  0xfa   : > { %7582 = vmatprep.mubr.f32.mxu0 %v10829_v44  ;;  %v1122_v44 = vrot.slane %v10539_v42, 2  ;;  %v8923_v42 = vpack.c.bf16 %v6276_v11, %v6275_v9  ;;  %v6286_v9 = vld [vmem:[%s12503_s1 + $0x268] sm:$0xff]  ;;  %v6288_v11 = vld [vmem:[%s12503_s1 + $0x278] sm:$0xff] }
  0xfc   : > { %v10856_v2 = vsel %vm1043_vm1, %v1120_v30, %v1122_v44  ;;  %v6278_v44 = vld [vmem:[%s12503_s1 + $0x228] sm:$0xff]  ;;  %v6284_v30 = vld [vmem:[%s12503_s1 + $0x258] sm:$0xff] }
  0xfd   : > { %7583 = vmatmul.mubr.f32.gmra.mrb[26].mxu0 %v10836_v15  ;;  %12715 = vst [vmem:[#allocation46_spill] sm:$0xff] %v10856_v2  ;;  %v8927_v28 = vpack.c.bf16 %v6278_v44, %v6277_v63  ;;  %v12720_v63 = vld [vmem:[#allocation8_spill] sm:$0xff] }
  0xfe   : > { %7585 = vmatprep.mubr.f32.mxu0 %v10840_v35 }
 0x101   : > { %7586 = vmatmul.mubr.f32.gmra.mrb[28].mxu0 %v10847_v41 }
 0x102   : > { %7588 = vmatprep.mubr.f32.mxu0 %v10851_v51 }
 0x105   : > { %7589 = vmatmul.mubr.f32.gmra.mrb[30].mxu0 %v10856_v2 }
 0x106   : > { %7623 = vmatprep.mubr.f32.mxu0 %v10240_v52  ;;  %v6279_v52 = vld [vmem:[%s12503_s1 + $0x230] sm:$0xff] }
 0x109   : > { %7624 = vmatmul.mubr.f32.vlgmr.msra.gmra.mrb[0].mxu0 %v10242_v53  ;;  %v8931_v53 = vpack.c.bf16 %v6280_v25, %v6279_v52  ;;  %v6302_v52 = vld [vmem:[%s12503_s1 + $0x2e8] sm:$0xff] }
 0x10a   : > { %8922 = vmatpush3.bf16.msra.mxu0 %v8919_v57  ;;  %7626 = vmatprep.mubr.f32.mxu0 %v10259_v3  ;;  %v6281_v3 = vld [vmem:[%s12503_s1 + $0x240] sm:$0xff]  ;;  %v6282_v57 = vld [vmem:[%s12503_s1 + $0x248] sm:$0xff] }
 0x10b   : > { %8924 = vmatprep.subr.bf16.mxu0 %v8923_v42  ;;  %v12721_v25 = vld [vmem:[#allocation9_spill] sm:$0xff] }
 0x10d   : > { %7627 = vmatmul.mubr.f32.gmra.mrb[2].mxu0 %v10261_v4  ;;  %v8935_v4 = vpack.c.bf16 %v6282_v57, %v6281_v3  ;;  %v6303_v57 = vld [vmem:[%s12503_s1 + $0x2f0] sm:$0xff] }
 0x10e   : > { %7629 = vmatprep.mubr.f32.mxu0 %v10279_v16  ;;  %8926 = vmatpush3.bf16.msra.mxu0 %v8923_v42  ;;  %v6283_v16 = vld [vmem:[%s12503_s1 + $0x250] sm:$0xff]  ;;  %v6290_v42 = vld [vmem:[%s12503_s1 + $0x288] sm:$0xff] }
 0x10f   : > { %8928 = vmatprep.subr.bf16.mxu0 %v8927_v28 }
 0x111   : > { %7630 = vmatmul.mubr.f32.gmra.mrb[4].mxu0 %v10281_v6  ;;  %v8939_v6 = vpack.c.bf16 %v6284_v30, %v6283_v16  ;;  %v12723_v16 = vld [vmem:[#allocation11_spill] sm:$0xff]  ;;  %v12724_v30 = vld [vmem:[#allocation12_spill] sm:$0xff] }
 0x112   : > { %7632 = vmatprep.mubr.f32.mxu0 %v10301_v26  ;;  %8930 = vmatpush3.bf16.msra.mxu0 %v8927_v28  ;;  %v6285_v26 = vld [vmem:[%s12503_s1 + $0x260] sm:$0xff] }
 0x113   : > { %8932 = vmatprep.subr.bf16.mxu0 %v8931_v53  ;;  %v6301_v28 = vld [vmem:[%s12503_s1 + $0x2e0] sm:$0xff] }
 0x114   : > { %v8975_v3 = vpack.c.bf16 %v6302_v52, %v6301_v28  ;;  %v12741_v28 = vld [vmem:[#allocation29_spill] sm:$0xff] }
 0x115   : > { %7633 = vmatmul.mubr.f32.gmra.mrb[6].mxu0 %v10303_v27  ;;  %v8943_v27 = vpack.c.bf16 %v6286_v9, %v6285_v26  ;;  %v6305_v26 = vld [vmem:[%s12503_s1 + $0x300] sm:$0xff]  ;;  %v6306_v9 = vld [vmem:[%s12503_s1 + $0x308] sm:$0xff] }
 0x116   : > { %7635 = vmatprep.mubr.f32.mxu0 %v10324_v37  ;;  %8934 = vmatpush3.bf16.msra.mxu0 %v8931_v53  ;;  %v6287_v37 = vld [vmem:[%s12503_s1 + $0x270] sm:$0xff] }
 0x117   : > { %8936 = vmatprep.subr.bf16.mxu0 %v8935_v4  ;;  %v12722_v53 = vld [vmem:[#allocation10_spill] sm:$0xff] }
 0x119   : > { %7636 = vmatmul.mubr.f32.gmra.mrb[8].mxu0 %v10326_v38  ;;  %v8947_v38 = vpack.c.bf16 %v6288_v11, %v6287_v37  ;;  %v12726_v37 = vld [vmem:[#allocation14_spill] sm:$0xff]  ;;  %v8983_v11 = vpack.c.bf16 %v6306_v9, %v6305_v26  ;;  %v6310_v26 = vld [vmem:[%s12503_s1 + $0x328] sm:$0xff]  ;;  %v12742_v9 = vld [vmem:[#allocation31_spill] sm:$0xff] }
 0x11a   : > { %7638 = vmatprep.mubr.f32.mxu0 %v10344_v47  ;;  %8938 = vmatpush3.bf16.msra.mxu0 %v8935_v4  ;;  %v6289_v47 = vld [vmem:[%s12503_s1 + $0x280] sm:$0xff]  ;;  %v6304_v4 = vld [vmem:[%s12503_s1 + $0x2f8] sm:$0xff] }
 0x11b   : > { %8940 = vmatprep.subr.bf16.mxu0 %v8939_v6 }
 0x11d   : > { %7639 = vmatmul.mubr.f32.gmra.mrb[10].mxu0 %v10346_v49  ;;  %v8951_v49 = vpack.c.bf16 %v6290_v42, %v6289_v47  ;;  %v12728_v47 = vld [vmem:[#allocation16_spill] sm:$0xff]  ;;  %v12729_v42 = vld [vmem:[#allocation17_spill] sm:$0xff] }
 0x11e   : > { %7641 = vmatprep.mubr.f32.mxu0 %v10367_v60  ;;  %8942 = vmatpush3.bf16.msra.mxu0 %v8939_v6  ;;  %v10936_v60 = vld [vmem:[#allocation2 + $0x180] sm:$0xff]  ;;  %v8979_v6 = vpack.c.bf16 %v6304_v4, %v6303_v57  ;;  %v6308_v57 = vld [vmem:[%s12503_s1 + $0x318] sm:$0xff] }
 0x11f   : > { %8944 = vmatprep.subr.bf16.mxu0 %v8943_v27 }
 0x121   : > { %7642 = vmatmul.mubr.f32.gmra.mrb[12].mxu0 %v10369_v62  ;;  %v10940_v62 = vld [vmem:[#allocation2 + $0x188] sm:$0xff] }
 0x122   : > { %7644 = vmatprep.mubr.f32.mxu0 %v10390_v14  ;;  %8946 = vmatpush3.bf16.msra.mxu0 %v8943_v27  ;;  %v6291_v14 = vld [vmem:[%s12503_s1 + $0x290] sm:$0xff]  ;;  %v12725_v27 = vld [vmem:[#allocation13_spill] sm:$0xff] }
 0x123   : > { %8948 = vmatprep.subr.bf16.mxu0 %v8947_v38 }
 0x125   : > { %7645 = vmatmul.mubr.f32.gmra.mrb[14].mxu0 %v10392_v17  ;;  %v6292_v17 = vld [vmem:[%s12503_s1 + $0x298] sm:$0xff] }
 0x126   : > { %7647 = vmatprep.mubr.f32.mxu0 %v10416_v36  ;;  %8950 = vmatpush3.bf16.msra.mxu0 %v8947_v38  ;;  %v6296_v36 = vld [vmem:[%s12503_s1 + $0x2b8] sm:$0xff] }
 0x127   : > { %8952 = vmatprep.subr.bf16.mxu0 %v8951_v49  ;;  %v12727_v38 = vld [vmem:[#allocation15_spill] sm:$0xff] }
 0x129   : > { %7648 = vmatmul.mubr.f32.gmra.mrb[16].mxu0 %v10418_v39  ;;  %v12716_v39 = vld [vmem:[#allocation4_spill] sm:$0xff] }
 0x12a   : > { %7650 = vmatprep.mubr.f32.mxu0 %v10438_v58  ;;  %v12717_v58 = vld [vmem:[#allocation5_spill] sm:$0xff] }
 0x12d   : > { %7651 = vmatmul.mubr.f32.gmra.mrb[18].mxu0 %v10440_v61  ;;  %v12718_v61 = vld [vmem:[#allocation6_spill] sm:$0xff] }
 0x12e   : > { %7653 = vmatprep.mubr.f32.mxu0 %v10456_v19 }
 0x131   : > { %7654 = vmatmul.mubr.f32.gmra.mrb[20].mxu0 %v10458_v21  ;;  %v6299_v21 = vld [vmem:[%s12503_s1 + $0x2d0] sm:$0xff] }
 0x132   : > { %7656 = vmatprep.mubr.f32.mxu0 %v10473_v45  ;;  %v6300_v45 = vld [vmem:[%s12503_s1 + $0x2d8] sm:$0xff] }
 0x133   : > { %v8971_v44 = vpack.c.bf16 %v6300_v45, %v6299_v21  ;;  %v12740_v21 = vld [vmem:[#allocation28_spill] sm:$0xff] }
 0x135   : > { %7657 = vmatmul.mubr.f32.gmra.mrb[22].mxu0 %v10475_v50  ;;  %v12719_v50 = vld [vmem:[#allocation7_spill] sm:$0xff] }
 0x136   : > { %7659 = vmatprep.mubr.f32.mxu0 %v10490_v48  ;;  %v6298_v48 = vld [vmem:[%s12503_s1 + $0x2c8] sm:$0xff] }
 0x139   : > { %7660 = vmatmul.mubr.f32.gmra.mrb[24].mxu0 %v10492_v43  ;;  %v6297_v43 = vld [vmem:[%s12503_s1 + $0x2c0] sm:$0xff] }
 0x13a   : > { %7662 = vmatprep.mubr.f32.mxu0 %v10507_v22  ;;  %v8967_v19 = vpack.c.bf16 %v6298_v48, %v6297_v43  ;;  %v1708_v43 = vrot.slane %v10940_v62, 1  ;;  %v11020_v48 = vld [vmem:[#allocation2 + $0x190] sm:$0x3] }
 0x13b   : > { %v1710_v45 = vrot.slane %v11020_v48, 1 }
 0x13d   : > { %7663 = vmatmul.mubr.f32.gmra.mrb[26].mxu0 %v10509_v8  ;;  %v6294_v8 = vld [vmem:[%s12503_s1 + $0x2a8] sm:$0xff]  ;;  %v11031_v52 = vsel %vm463_vm0, %v1708_v43, %v1710_v45  ;;  %v12743_v45 = vld [vmem:[#allocation32_spill] sm:$0xff] }
 0x13e   : > { %7665 = vmatprep.mubr.f32.mxu0 %v10524_v56  ;;  %v8955_v56 = vpack.c.bf16 %v6292_v17, %v6291_v14  ;;  %v12731_v14 = vld [vmem:[#allocation19_spill] sm:$0xff]  ;;  %v12732_v17 = vld [vmem:[#allocation20_spill] sm:$0xff] }
 0x141   : > { %7666 = vmatmul.mubr.f32.gmra.mrb[28].mxu0 %v10526_v54  ;;  %v6293_v54 = vld [vmem:[%s12503_s1 + $0x2a0] sm:$0xff] }
 0x142   : > { %7668 = vmatprep.mubr.f32.mxu0 %v10936_v60  ;;  %v8959_v22 = vpack.c.bf16 %v6294_v8, %v6293_v54  ;;  %v12734_v54 = vld [vmem:[#allocation22_spill] sm:$0xff]  ;;  %v12735_v8 = vld [vmem:[#allocation23_spill] sm:$0xff] }
 0x145   : > { %7669 = vmatmul.mubr.f32.gmra.mrb[30].mxu0 %v10940_v62 }
 0x146   : > { %7703 = vmatprep.mubr.f32.mxu0 %v10270_v10  ;;  %v6295_v10 = vld [vmem:[%s12503_s1 + $0x2b0] sm:$0xff] }
 0x149   : > { %7704 = vmatmul.mubr.f32.vlgmr.msra.gmra.mrb[0].mxu0 %v10288_v18  ;;  %v8963_v18 = vpack.c.bf16 %v6296_v36, %v6295_v10  ;;  %v12737_v10 = vld [vmem:[#allocation25_spill] sm:$0xff]  ;;  %v12738_v36 = vld [vmem:[#allocation26_spill] sm:$0xff] }
 0x14a   : > { %8954 = vmatpush3.bf16.msra.mxu0 %v8951_v49  ;;  %7706 = vmatprep.mubr.f32.mxu0 %v10292_v20  ;;  %v12730_v49 = vld [vmem:[#allocation18_spill] sm:$0xff] }
 0x14b   : > { %8956 = vmatprep.subr.bf16.mxu0 %v8955_v56 }
 0x14d   : > { %7707 = vmatmul.mubr.f32.gmra.mrb[2].mxu0 %v10311_v29 }
 0x14e   : > { %7709 = vmatprep.mubr.f32.mxu0 %v12716_v39  ;;  %8958 = vmatpush3.bf16.msra.mxu0 %v8955_v56  ;;  %v12733_v56 = vld [vmem:[#allocation21_spill] sm:$0xff] }
 0x14f   : > { %8960 = vmatprep.subr.bf16.mxu0 %v8959_v22 }
 0x151   : > { %7710 = vmatmul.mubr.f32.gmra.mrb[4].mxu0 %v12717_v58 }
 0x152   : > { %7712 = vmatprep.mubr.f32.mxu0 %v12718_v61  ;;  %8962 = vmatpush3.bf16.msra.mxu0 %v8959_v22  ;;  %v12736_v22 = vld [vmem:[#allocation24_spill] sm:$0xff] }
 0x153   : > { %8964 = vmatprep.subr.bf16.mxu0 %v8963_v18 }
 0x155   : > { %7713 = vmatmul.mubr.f32.gmra.mrb[6].mxu0 %v12719_v50 }
 0x156   : > { %7715 = vmatprep.mubr.f32.mxu0 %v12720_v63  ;;  %8966 = vmatpush3.bf16.msra.mxu0 %v8963_v18  ;;  %v1707_v18 = vrot.slane %v10936_v60, 1 }
 0x157   : > { %8968 = vmatprep.subr.bf16.mxu0 %v8967_v19 }
 0x159   : > { %7716 = vmatmul.mubr.f32.gmra.mrb[8].mxu0 %v12721_v25 }
 0x15a   : > { %7718 = vmatprep.mubr.f32.mxu0 %v12722_v53  ;;  %8970 = vmatpush3.bf16.msra.mxu0 %v8967_v19  ;;  %v12739_v19 = vld [vmem:[#allocation27_spill] sm:$0xff] }
 0x15b   : > { %8972 = vmatprep.subr.bf16.mxu0 %v8971_v44 }
 0x15d   : > { %7719 = vmatmul.mubr.f32.gmra.mrb[10].mxu0 %v12723_v16 }
 0x15e   : > { %7721 = vmatprep.mubr.f32.mxu0 %v12724_v30  ;;  %8974 = vmatpush3.bf16.msra.mxu0 %v8971_v44  ;;  %v11026_v44 = vsel %vm463_vm0, %v1707_v18, %v1708_v43  ;;  %v6312_v43 = vld [vmem:[%s12503_s1 + $0x338] sm:$0xff] }
 0x15f   : > { %8976 = vmatprep.subr.bf16.mxu0 %v8975_v3 }
 0x161   : > { %7722 = vmatmul.mubr.f32.gmra.mrb[12].mxu0 %v12725_v27 }
 0x162   : > { %7724 = vmatprep.mubr.f32.mxu0 %v12726_v37  ;;  %8978 = vmatpush3.bf16.msra.mxu0 %v8975_v3  ;;  %v6307_v3 = vld [vmem:[%s12503_s1 + $0x310] sm:$0xff] }
 0x163   : > { %8980 = vmatprep.subr.bf16.mxu0 %v8979_v6  ;;  %v8987_v4 = vpack.c.bf16 %v6308_v57, %v6307_v3  ;;  %v6314_v57 = vld [vmem:[%s12503_s1 + $0x348] sm:$0xff] }
 0x165   : > { %7725 = vmatmul.mubr.f32.gmra.mrb[14].mxu0 %v12727_v38 }
 0x166   : > { %7727 = vmatprep.mubr.f32.mxu0 %v12728_v47  ;;  %8982 = vmatpush3.bf16.msra.mxu0 %v8979_v6  ;;  %v6309_v6 = vld [vmem:[%s12503_s1 + $0x320] sm:$0xff] }
 0x167   : > { %8984 = vmatprep.subr.bf16.mxu0 %v8983_v11  ;;  %v8991_v18 = vpack.c.bf16 %v6310_v26, %v6309_v6  ;;  %v12744_v6 = vld [vmem:[#allocation33_spill] sm:$0xff] }
 0x169   : > { %7728 = vmatmul.mubr.f32.gmra.mrb[16].mxu0 %v12729_v42 }
 0x16a   : > { %7730 = vmatprep.mubr.f32.mxu0 %v12730_v49 }
 0x16d   : > { %7731 = vmatmul.mubr.f32.gmra.mrb[18].mxu0 %v12731_v14 }
 0x16e   : > { %7733 = vmatprep.mubr.f32.mxu0 %v12732_v17 }
 0x171   : > { %7734 = vmatmul.mubr.f32.gmra.mrb[20].mxu0 %v12733_v56 }
 0x172   : > { %7736 = vmatprep.mubr.f32.mxu0 %v12734_v54 }
 0x175   : > { %7737 = vmatmul.mubr.f32.gmra.mrb[22].mxu0 %v12735_v8 }
 0x176   : > { %7739 = vmatprep.mubr.f32.mxu0 %v12736_v22 }
 0x179   : > { %7740 = vmatmul.mubr.f32.gmra.mrb[24].mxu0 %v12737_v10 }
 0x17a   : > { %7742 = vmatprep.mubr.f32.mxu0 %v12738_v36 }
 0x17d   : > { %7743 = vmatmul.mubr.f32.gmra.mrb[26].mxu0 %v12739_v19 }
 0x17e   : > { %7745 = vmatprep.mubr.f32.mxu0 %v12740_v21 }
 0x181   : > { %7746 = vmatmul.mubr.f32.gmra.mrb[28].mxu0 %v12741_v28 }
 0x182   : > { %7748 = vmatprep.mubr.f32.mxu0 %v11026_v44 }
 0x185   : > { %7749 = vmatmul.mubr.f32.gmra.mrb[30].mxu0 %v11031_v52 }
 0x186   : > { %7783 = vmatprep.mubr.f32.mxu0 %v10656_v5  ;;  %v6311_v5 = vld [vmem:[%s12503_s1 + $0x330] sm:$0xff] }
 0x187   : > { %v8995_v3 = vpack.c.bf16 %v6312_v43, %v6311_v5  ;;  %v12745_v5 = vld [vmem:[#allocation34_spill] sm:$0xff] }
 0x189   : > { %7784 = vmatmul.mubr.f32.vlgmr.msra.gmra.mrb[0].mxu0 %v12742_v9  ;;  %v6316_v9 = vld [vmem:[%s12503_s1 + $0x358] sm:$0xff] }
 0x18a   : > { %8986 = vmatpush3.bf16.msra.mxu0 %v8983_v11  ;;  %7786 = vmatprep.mubr.f32.mxu0 %v10672_v7  ;;  %v6313_v11 = vld [vmem:[%s12503_s1 + $0x340] sm:$0xff] }
 0x18b   : > { %8988 = vmatprep.subr.bf16.mxu0 %v8987_v4  ;;  %v8999_v26 = vpack.c.bf16 %v6314_v57, %v6313_v11  ;;  %v6318_v11 = vld [vmem:[%s12503_s1 + $0x368] sm:$0xff]  ;;  %v12746_v57 = vld [vmem:[#allocation35_spill] sm:$0xff] }
 0x18d   : > { %7787 = vmatmul.mubr.f32.gmra.mrb[2].mxu0 %v12743_v45 }
 0x18e   : > { %7789 = vmatprep.mubr.f32.mxu0 %v10689_v31  ;;  %8990 = vmatpush3.bf16.msra.mxu0 %v8987_v4  ;;  %v6315_v4 = vld [vmem:[%s12503_s1 + $0x350] sm:$0xff] }
 0x18f   : > { %8992 = vmatprep.subr.bf16.mxu0 %v8991_v18  ;;  %v9003_v43 = vpack.c.bf16 %v6316_v9, %v6315_v4  ;;  %v6320_v4 = vld [vmem:[%s12503_s1 + $0x378] sm:$0xff]  ;;  %v12747_v9 = vld [vmem:[#allocation36_spill] sm:$0xff] }
 0x191   : > { %7790 = vmatmul.mubr.f32.gmra.mrb[4].mxu0 %v12744_v6 }
 0x192   : > { %7792 = vmatprep.mubr.f32.mxu0 %v10706_v33  ;;  %8994 = vmatpush3.bf16.msra.mxu0 %v8991_v18  ;;  %v6317_v18 = vld [vmem:[%s12503_s1 + $0x360] sm:$0xff] }
 0x193   : > { %8996 = vmatprep.subr.bf16.mxu0 %v8995_v3 }
 0x195   : > { %7793 = vmatmul.mubr.f32.gmra.mrb[6].mxu0 %v12745_v5  ;;  %v9007_v5 = vpack.c.bf16 %v6318_v11, %v6317_v18  ;;  %v6322_v18 = vld [vmem:[%s12503_s1 + $0x388] sm:$0xff] }
 0x196   : > { %7795 = vmatprep.mubr.f32.mxu0 %v10723_v0  ;;  %8998 = vmatpush3.bf16.msra.mxu0 %v8995_v3  ;;  %v6319_v3 = vld [vmem:[%s12503_s1 + $0x370] sm:$0xff] }
 0x197   : > { %9000 = vmatprep.subr.bf16.mxu0 %v8999_v26 }
 0x199   : > { %7796 = vmatmul.mubr.f32.gmra.mrb[8].mxu0 %v12746_v57  ;;  %v9011_v57 = vpack.c.bf16 %v6320_v4, %v6319_v3  ;;  %v12749_v3 = vld [vmem:[#allocation39_spill] sm:$0xff]  ;;  %v1989_v4 = vrot.slane %v10940_v62, 2 }
 0x19a   : > { %7798 = vmatprep.mubr.f32.mxu0 %v10740_v13  ;;  %9002 = vmatpush3.bf16.msra.mxu0 %v8999_v26  ;;  %v6321_v26 = vld [vmem:[%s12503_s1 + $0x380] sm:$0xff] }
 0x19b   : > { %9004 = vmatprep.subr.bf16.mxu0 %v9003_v43  ;;  %v9015_v11 = vpack.c.bf16 %v6322_v18, %v6321_v26  ;;  %v11112_v26 = vld [vmem:[#allocation2] sm:$0xff] }
 0x19c   : > { %v11115_v18 = vrot.slane %v11112_v26, 1 }
 0x19d   : > { %7799 = vmatmul.mubr.f32.gmra.mrb[10].mxu0 %v10753_v59 }
 0x19e   : > { %7801 = vmatprep.mubr.f32.mxu0 %v12747_v9  ;;  %9006 = vmatpush3.bf16.msra.mxu0 %v9003_v43  ;;  %v12748_v43 = vld [vmem:[#allocation37_spill] sm:$0xff] }
 0x19f   : > { %9008 = vmatprep.subr.bf16.mxu0 %v9007_v5  ;;  %8103 = vmatprep.mubr.f32.mxu1 %v11115_v18 }
 0x1a1   : > { %7802 = vmatmul.mubr.f32.gmra.mrb[12].mxu0 %v10770_v12 }
 0x1a2   : > { %7804 = vmatprep.mubr.f32.mxu0 %v10774_v34  ;;  %9010 = vmatpush3.bf16.msra.mxu0 %v9007_v5  ;;  %v12750_v5 = vld [vmem:[#allocation41_spill] sm:$0xff] }
 0x1a3   : > { %9012 = vmatprep.subr.bf16.mxu0 %v9011_v57 }
 0x1a5   : > { %7805 = vmatmul.mubr.f32.gmra.mrb[14].mxu0 %v10781_v23 }
 0x1a6   : > { %7807 = vmatprep.mubr.f32.mxu0 %v10785_v32  ;;  %9014 = vmatpush3.bf16.msra.mxu0 %v9011_v57  ;;  %v1988_v57 = vrot.slane %v10936_v60, 2 }
 0x1a7   : > { %9016 = vmatprep.subr.bf16.mxu0 %v9015_v11 }
 0x1a9   : > { %7808 = vmatmul.mubr.f32.gmra.mrb[16].mxu0 %v10792_v46 }
 0x1aa   : > { %7810 = vmatprep.mubr.f32.mxu0 %v10796_v55 }
 0x1ad   : > { %7811 = vmatmul.mubr.f32.gmra.mrb[18].mxu0 %v10803_v40 }
 0x1ae   : > { %7813 = vmatprep.mubr.f32.mxu0 %v12748_v43 }
 0x1b1   : > { %7814 = vmatmul.mubr.f32.gmra.mrb[20].mxu0 %v10814_v24  ;;  %v9909_v24 = vld [vmem:[#allocation2 + $0x120] sm:$0xff] }
 0x1b2   : > { %7816 = vmatprep.mubr.f32.mxu0 %v12749_v3  ;;  %v9904_v3 = vld [vmem:[#allocation2 + $0xe0] sm:$0xff] }
 0x1b5   : > { %7817 = vmatmul.mubr.f32.gmra.mrb[22].mxu0 %v10825_v1  ;;  %v1991_v1 = vrot.slane %v11020_v48, 2  ;;  %v6324_v48 = vld [vmem:[%s12503_s1 + $0x398] sm:$0xff] }
 0x1b6   : > { %7819 = vmatprep.mubr.f32.mxu0 %v12750_v5  ;;  %v11120_v5 = vsel %vm1043_vm1, %v1988_v57, %v1989_v4  ;;  %v9889_v57 = vld [vmem:[#allocation2 + $0x30] sm:$0xff] }
 0x1b7   : > { %12751 = vst [vmem:[#allocation4_spill] sm:$0xff] %v11120_v5 }
 0x1b9   : > { %7820 = vmatmul.mubr.f32.gmra.mrb[24].mxu0 %v10836_v15 }
 0x1ba   : > { %7822 = vmatprep.mubr.f32.mxu0 %v10840_v35  ;;  %v11125_v35 = vsel %vm1043_vm1, %v1989_v4, %v1991_v1  ;;  %v6325_v1 = vld [vmem:[%s12503_s1 + $0x3a0] sm:$0xff]  ;;  %v6326_v4 = vld [vmem:[%s12503_s1 + $0x3a8] sm:$0xff] }
 0x1bb   : > { %12752 = vst [vmem:[#allocation5_spill] sm:$0xff] %v11125_v35  ;;  %v9023_v15 = vpack.c.bf16 %v6326_v4, %v6325_v1  ;;  %v9894_v1 = vld [vmem:[#allocation2 + $0x68] sm:$0xff]  ;;  %v9895_v4 = vld [vmem:[#allocation2 + $0x78] sm:$0xff] }
 0x1bd   : > { %7823 = vmatmul.mubr.f32.gmra.mrb[26].mxu0 %v10847_v41  ;;  %v6323_v41 = vld [vmem:[%s12503_s1 + $0x390] sm:$0xff] }
 0x1be   : > { %7825 = vmatprep.mubr.f32.mxu0 %v10851_v51  ;;  %v9891_v51 = vld [vmem:[#allocation2 + $0x48] sm:$0xff] }
 0x1c1   : > { %7826 = vmatmul.mubr.f32.gmra.mrb[28].mxu0 %v10856_v2  ;;  %v9019_v2 = vpack.c.bf16 %v6324_v48, %v6323_v41  ;;  %v6328_v41 = vld [vmem:[%s12503_s1 + $0x3b8] sm:$0xff]  ;;  %v9892_v48 = vld [vmem:[#allocation2 + $0x50] sm:$0xff] }
 0x1c2   : > { %7828 = vmatprep.mubr.f32.mxu0 %v11120_v5  ;;  %v9890_v5 = vld [vmem:[#allocation2 + $0x38] sm:$0xff] }
 0x1c5   : > { %7829 = vmatmul.mubr.f32.gmra.mrb[30].mxu0 %v11125_v35  ;;  %v9893_v35 = vld [vmem:[#allocation2 + $0x60] sm:$0xff] }
 0x1c6   : > { %7863 = vmatprep.mubr.f32.mxu0 %v9889_v57  ;;  %v6327_v57 = vld [vmem:[%s12503_s1 + $0x3b0] sm:$0xff] }
 0x1c9   : > { %7864 = vmatmul.mubr.f32.vlgmr.msra.gmra.mrb[0].mxu0 %v9890_v5  ;;  %v9027_v5 = vpack.c.bf16 %v6328_v41, %v6327_v57  ;;  %v9896_v57 = vld [vmem:[#allocation2 + $0x80] sm:$0xff]  ;;  %v9897_v41 = vld [vmem:[#allocation2 + $0x90] sm:$0xff] }
 0x1ca   : > { %9018 = vmatpush3.bf16.msra.mxu0 %v9015_v11  ;;  %7866 = vmatprep.mubr.f32.mxu0 %v9891_v51  ;;  %v6329_v51 = vld [vmem:[%s12503_s1 + $0x3c0] sm:$0xff]  ;;  %v6330_v11 = vld [vmem:[%s12503_s1 + $0x3c8] sm:$0xff] }
 0x1cb   : > { %9020 = vmatprep.subr.bf16.mxu0 %v9019_v2 }
 0x1cd   : > { %7867 = vmatmul.mubr.f32.gmra.mrb[2].mxu0 %v9892_v48  ;;  %v9031_v48 = vpack.c.bf16 %v6330_v11, %v6329_v51  ;;  %v6334_v51 = vld [vmem:[%s12503_s1 + $0x3e8] sm:$0xff]  ;;  %v9898_v11 = vld [vmem:[#allocation2 + $0x98] sm:$0xff] }
 0x1ce   : > { %7869 = vmatprep.mubr.f32.mxu0 %v9893_v35  ;;  %9022 = vmatpush3.bf16.msra.mxu0 %v9019_v2  ;;  %v6331_v35 = vld [vmem:[%s12503_s1 + $0x3d0] sm:$0xff]  ;;  %v6332_v2 = vld [vmem:[%s12503_s1 + $0x3d8] sm:$0xff] }
 0x1cf   : > { %9024 = vmatprep.subr.bf16.mxu0 %v9023_v15 }
 0x1d1   : > { %7870 = vmatmul.mubr.f32.gmra.mrb[4].mxu0 %v9894_v1  ;;  %v9035_v1 = vpack.c.bf16 %v6332_v2, %v6331_v35  ;;  %v6336_v35 = vld [vmem:[%s12503_s1 + $0x3f8] sm:$0xff]  ;;  %v9900_v2 = vld [vmem:[#allocation2 + $0xb0] sm:$0xff] }
 0x1d2   : > { %7872 = vmatprep.mubr.f32.mxu0 %v9895_v4  ;;  %9026 = vmatpush3.bf16.msra.mxu0 %v9023_v15  ;;  %v6333_v15 = vld [vmem:[%s12503_s1 + $0x3e0] sm:$0xff]  ;;  %v9899_v4 = vld [vmem:[#allocation2 + $0xa8] sm:$0xff] }
 0x1d3   : > { %9028 = vmatprep.subr.bf16.mxu0 %v9027_v5 }
 0x1d5   : > { %7873 = vmatmul.mubr.f32.gmra.mrb[6].mxu0 %v9896_v57  ;;  %v9039_v57 = vpack.c.bf16 %v6334_v51, %v6333_v15  ;;  %v6338_v15 = vld [vmem:[%s12503_s1 + $0x408] sm:$0xff] }
 0x1d6   : > { %7875 = vmatprep.mubr.f32.mxu0 %v9897_v41  ;;  %9030 = vmatpush3.bf16.msra.mxu0 %v9027_v5  ;;  %v6335_v5 = vld [vmem:[%s12503_s1 + $0x3f0] sm:$0xff]  ;;  %v9901_v41 = vld [vmem:[#allocation2 + $0xc0] sm:$0xff]  ;;  %v9902_v51 = vld [vmem:[#allocation2 + $0xc8] sm:$0xff] }
 0x1d7   : > { %9032 = vmatprep.subr.bf16.mxu0 %v9031_v48 }
 0x1d9   : > { %7876 = vmatmul.mubr.f32.gmra.mrb[8].mxu0 %v9898_v11  ;;  %v9043_v11 = vpack.c.bf16 %v6336_v35, %v6335_v5  ;;  %v9906_v5 = vld [vmem:[#allocation2 + $0xf8] sm:$0xff]  ;;  %v9907_v35 = vld [vmem:[#allocation2 + $0x108] sm:$0xff] }
 0x1da   : > { %7878 = vmatprep.mubr.f32.mxu0 %v9899_v4  ;;  %9034 = vmatpush3.bf16.msra.mxu0 %v9031_v48  ;;  %v6337_v48 = vld [vmem:[%s12503_s1 + $0x400] sm:$0xff]  ;;  %v9903_v4 = vld [vmem:[#allocation2 + $0xd8] sm:$0xff] }
 0x1db   : > { %9036 = vmatprep.subr.bf16.mxu0 %v9035_v1 }
 0x1dd   : > { %7879 = vmatmul.mubr.f32.gmra.mrb[10].mxu0 %v9900_v2  ;;  %v9047_v2 = vpack.c.bf16 %v6338_v15, %v6337_v48  ;;  %v9913_v48 = vld [vmem:[#allocation2 + $0x150] sm:$0xff] }
 0x1de   : > { %7881 = vmatprep.mubr.f32.mxu0 %v9901_v41  ;;  %9038 = vmatpush3.bf16.msra.mxu0 %v9035_v1  ;;  %v9905_v1 = vld [vmem:[#allocation2 + $0xf0] sm:$0xff] }
 0x1df   : > { %9040 = vmatprep.subr.bf16.mxu0 %v9039_v57  ;;  %v9908_v41 = vld [vmem:[#allocation2 + $0x110] sm:$0xff] }
 0x1e0   : > { %v9916_v15 = vld [vmem:[#allocation2 + $0x170] sm:$0xff] }
 0x1e1   : > { %7882 = vmatmul.mubr.f32.gmra.mrb[12].mxu0 %v9902_v51  ;;  %v9910_v51 = vld [vmem:[#allocation2 + $0x128] sm:$0xff] }
 0x1e2   : > { %7884 = vmatprep.mubr.f32.mxu0 %v9903_v4  ;;  %9042 = vmatpush3.bf16.msra.mxu0 %v9039_v57  ;;  %v9911_v4 = vld [vmem:[#allocation2 + $0x138] sm:$0xff]  ;;  %v9912_v57 = vld [vmem:[#allocation2 + $0x140] sm:$0xff] }
 0x1e3   : > { %9044 = vmatprep.subr.bf16.mxu0 %v9043_v11 }
 0x1e5   : > { %7885 = vmatmul.mubr.f32.gmra.mrb[14].mxu0 %v9904_v3  ;;  %v9914_v3 = vld [vmem:[#allocation2 + $0x158] sm:$0xff] }
 0x1e6   : > { %7887 = vmatprep.mubr.f32.mxu0 %v9905_v1  ;;  %9046 = vmatpush3.bf16.msra.mxu0 %v9043_v11  ;;  %v9915_v11 = vld [vmem:[#allocation2 + $0x168] sm:$0xff]  ;;  %v6340_v1 = vld [vmem:[%s12503_s1 + $0x418] sm:$0xff] }
 0x1e7   : > { %9048 = vmatprep.subr.bf16.mxu0 %v9047_v2 }
 0x1e9   : > { %7888 = vmatmul.mubr.f32.gmra.mrb[16].mxu0 %v9906_v5  ;;  %v6354_v5 = vld [vmem:[%s12505_s3 + $0x80] sm:$0xff] }
 0x1ea   : > { %7890 = vmatprep.mubr.f32.mxu0 %v9907_v35 }
 0x1ed   : > { %7891 = vmatmul.mubr.f32.gmra.mrb[18].mxu0 %v9908_v41  ;;  %v6357_v41 = vld [vmem:[%s12505_s3 + $0x98] sm:$0xff] }
 0x1ee   : > { %7893 = vmatprep.mubr.f32.mxu0 %v9909_v24  ;;  %v6339_v24 = vld [vmem:[%s12503_s1 + $0x410] sm:$0xff] }
 0x1f1   : > { %7894 = vmatmul.mubr.f32.gmra.mrb[20].mxu0 %v9910_v51  ;;  %v6341_v51 = vld [vmem:[%s12503_s1 + $0x420] sm:$0xff] }
 0x1f2   : > { %7896 = vmatprep.mubr.f32.mxu0 %v9911_v4 }
 0x1f5   : > { %7897 = vmatmul.mubr.f32.gmra.mrb[22].mxu0 %v9912_v57  ;;  %v6342_v57 = vld [vmem:[%s12503_s1 + $0x428] sm:$0xff] }
 0x1f6   : > { %7899 = vmatprep.mubr.f32.mxu0 %v9913_v48  ;;  %v6359_v48 = vld [vmem:[%s12505_s3 + $0xa8] sm:$0xff] }
 0x1f9   : > { %7900 = vmatmul.mubr.f32.gmra.mrb[24].mxu0 %v9914_v3  ;;  %v9055_v3 = vpack.c.bf16 %v6342_v57, %v6341_v51  ;;  %v6350_v51 = vld [vmem:[%s12503_s1 + $0x468] sm:$0xff] }
 0x1fa   : > { %7902 = vmatprep.mubr.f32.mxu0 %v9915_v11  ;;  %v6343_v11 = vld [vmem:[%s12503_s1 + $0x430] sm:$0xff]  ;;  %v3325_v57 = vld [vmem:[%s12505_s3 + $0x28] sm:$0xff] }
 0x1fd   : > { %7903 = vmatmul.mubr.f32.gmra.mrb[26].mxu0 %v9916_v15 }
 0x1fe   : > { %7905 = vmatprep.mubr.f32.mxu0 %v10936_v60  ;;  %v6355_v60 = vld [vmem:[%s12505_s3 + $0x88] sm:$0xff] }
 0x1ff   : > { %v9079_v35 = vpack.c.bf16 %v6355_v60, %v6354_v5  ;;  %v6346_v60 = vld [vmem:[%s12503_s1 + $0x448] sm:$0xff] }
 0x201   : > { %7906 = vmatmul.mubr.f32.gmra.mrb[28].mxu0 %v10940_v62  ;;  %v6356_v62 = vld [vmem:[%s12505_s3 + $0x90] sm:$0xff]  ;;  %9080 = vmatprep.subr.bf16.mxu1 %v9079_v35 }
 0x202   : > { %7908 = vmatprep.mubr.f32.mxu0 %v11112_v26  ;;  %v9083_v4 = vpack.c.bf16 %v6357_v41, %v6356_v62  ;;  %9082 = vmatpush3.bf16.msra.mxu1 %v9079_v35  ;;  %v6347_v41 = vld [vmem:[%s12503_s1 + $0x450] sm:$0xff] }
 0x204   : > { %9084 = vmatprep.subr.bf16.mxu1 %v9083_v4 }
 0x205   : > { %7909 = vmatmul.mubr.f32.gmra.mrb[30].mxu0 %v11112_v26  ;;  %v9051_v26 = vpack.c.bf16 %v6340_v1, %v6339_v24  ;;  %v6344_v24 = vld [vmem:[%s12503_s1 + $0x438] sm:$0xff]  ;;  %v6345_v1 = vld [vmem:[%s12503_s1 + $0x440] sm:$0xff] }
 0x206   : > { %7943 = vmatprep.mubr.f32.mxu0 %v10292_v20  ;;  %v6358_v20 = vld [vmem:[%s12505_s3 + $0xa0] sm:$0xff]  ;;  %9086 = vmatpush3.bf16.msra.mxu1 %v9083_v4  ;;  %v9063_v62 = vpack.c.bf16 %v6346_v60, %v6345_v1  ;;  %v6352_v4 = vld [vmem:[%s12503_s1 + $0x478] sm:$0xff]  ;;  %v3333_v60 = vld [vmem:[%s12505_s3 + $0x68] sm:$0xff] }
 0x207   : > { %v9087_v15 = vpack.c.bf16 %v6359_v48, %v6358_v20  ;;  %v3326_v48 = vld [vmem:[%s12505_s3 + $0x30] sm:$0xff] }
 0x209   : > { %7944 = vmatmul.mubr.f32.vlgmr.msra.gmra.mrb[0].mxu0 %v10311_v29  ;;  %v6360_v29 = vld [vmem:[%s12505_s3 + $0xb0] sm:$0xff]  ;;  %9088 = vmatprep.subr.bf16.mxu1 %v9087_v15 }
 0x20a   : > { %9050 = vmatpush3.bf16.msra.mxu0 %v9047_v2  ;;  %7946 = vmatprep.mubr.f32.mxu0 %v12716_v39  ;;  %v6361_v39 = vld [vmem:[%s12505_s3 + $0xb8] sm:$0xff]  ;;  %v9059_v2 = vpack.c.bf16 %v6344_v24, %v6343_v11  ;;  %v3329_v24 = vld [vmem:[%s12505_s3 + $0x48] sm:$0xff] }
 0x20b   : > { %9052 = vmatprep.subr.bf16.mxu0 %v9051_v26  ;;  %v9091_v5 = vpack.c.bf16 %v6361_v39, %v6360_v29  ;;  %9090 = vmatpush3.bf16.msra.mxu1 %v9087_v15  ;;  %v3328_v15 = vld [vmem:[%s12505_s3 + $0x40] sm:$0xff]  ;;  %v3330_v39 = vld [vmem:[%s12505_s3 + $0x50] sm:$0xff] }
 0x20c   : > { %v9127_v29 = vpack.c.bf16 %v3329_v24, %v3328_v15 }
 0x20d   : > { %7947 = vmatmul.mubr.f32.gmra.mrb[2].mxu0 %v12717_v58  ;;  %v6362_v58 = vld [vmem:[%s12505_s3 + $0xc0] sm:$0xff]  ;;  %9092 = vmatprep.subr.bf16.mxu1 %v9091_v5 }
 0x20e   : > { %7949 = vmatprep.mubr.f32.mxu0 %v12718_v61  ;;  %9054 = vmatpush3.bf16.msra.mxu0 %v9051_v26  ;;  %v6363_v61 = vld [vmem:[%s12505_s3 + $0xc8] sm:$0xff]  ;;  %v6348_v26 = vld [vmem:[%s12503_s1 + $0x458] sm:$0xff] }
 0x20f   : > { %9056 = vmatprep.subr.bf16.mxu0 %v9055_v3  ;;  %v9095_v35 = vpack.c.bf16 %v6363_v61, %v6362_v58  ;;  %9094 = vmatpush3.bf16.msra.mxu1 %v9091_v5  ;;  %v3332_v5 = vld [vmem:[%s12505_s3 + $0x60] sm:$0xff]  ;;  %v3334_v61 = vld [vmem:[%s12505_s3 + $0x70] sm:$0xff] }
 0x210   : > { %v9135_v58 = vpack.c.bf16 %v3333_v60, %v3332_v5 }
 0x211   : > { %7950 = vmatmul.mubr.f32.gmra.mrb[4].mxu0 %v12719_v50  ;;  %v9067_v50 = vpack.c.bf16 %v6348_v26, %v6347_v41  ;;  %9096 = vmatprep.subr.bf16.mxu1 %v9095_v35  ;;  %v6370_v41 = vld [vmem:[%s12505_s3 + $0x100] sm:$0xff]  ;;  %v6371_v26 = vld [vmem:[%s12505_s3 + $0x108] sm:$0xff] }
 0x212   : > { %7952 = vmatprep.mubr.f32.mxu0 %v12720_v63  ;;  %9058 = vmatpush3.bf16.msra.mxu0 %v9055_v3  ;;  %v6349_v63 = vld [vmem:[%s12503_s1 + $0x460] sm:$0xff]  ;;  %v3327_v3 = vld [vmem:[%s12505_s3 + $0x38] sm:$0xff] }
 0x213   : > { %9060 = vmatprep.subr.bf16.mxu0 %v9059_v2  ;;  %9098 = vmatpush3.bf16.msra.mxu1 %v9095_v35  ;;  %v9123_v11 = vpack.c.bf16 %v3327_v3, %v3326_v48 }
 0x215   : > { %7953 = vmatmul.mubr.f32.gmra.mrb[6].mxu0 %v12721_v25  ;;  %v9071_v25 = vpack.c.bf16 %v6350_v51, %v6349_v63  ;;  %v11402_v63 = vld [vmem:[%s12504_s2] ss:$0 sm:$0xff] }
 0x216   : > { %7955 = vmatprep.mubr.f32.mxu0 %v12722_v53  ;;  %9062 = vmatpush3.bf16.msra.mxu0 %v9059_v2  ;;  %v6351_v53 = vld [vmem:[%s12503_s1 + $0x470] sm:$0xff]  ;;  %v3331_v2 = vld [vmem:[%s12505_s3 + $0x58] sm:$0xff] }
 0x217   : > { %9064 = vmatprep.subr.bf16.mxu0 %v9063_v62  ;;  %v9131_v1 = vpack.c.bf16 %v3331_v2, %v3330_v39 }
 0x219   : > { %7956 = vmatmul.mubr.f32.gmra.mrb[8].mxu0 %v12723_v16  ;;  %v9075_v16 = vpack.c.bf16 %v6352_v4, %v6351_v53 }
 0x21a   : > { %7958 = vmatprep.mubr.f32.mxu0 %v12724_v30  ;;  %9066 = vmatpush3.bf16.msra.mxu0 %v9063_v62  ;;  %v397_v30 = vld [vmem:[#allocation2 + $0x1a8] sm:$0x3]  ;;  %v3335_v62 = vld [vmem:[%s12505_s3 + $0x78] sm:$0xff] }
 0x21b   : > { %9068 = vmatprep.subr.bf16.mxu0 %v9067_v50  ;;  %v9139_v35 = vpack.c.bf16 %v3335_v62, %v3334_v61 }
 0x21d   : > { %7959 = vmatmul.mubr.f32.gmra.mrb[10].mxu0 %v12725_v27  ;;  %v2549_v27 = vrot.slane %v397_v30, 1 }
 0x21e   : > { %7961 = vmatprep.mubr.f32.mxu0 %v12726_v37  ;;  %9070 = vmatpush3.bf16.msra.mxu0 %v9067_v50  ;;  %v11396_v50 = vpack.c.bf16 %v6371_v26, %v6370_v41 }
 0x21f   : > { %9072 = vmatprep.subr.bf16.mxu0 %v9071_v25  ;;  %v2550_v37 = vsel %vm463_vm0, %v11115_v18, %v2549_v27 }
 0x221   : > { %7962 = vmatmul.mubr.f32.gmra.mrb[12].mxu0 %v12727_v38  ;;  %v12753_v38 = vld [vmem:[#allocation34_spill] sm:$0xff] }
 0x222   : > { %7964 = vmatprep.mubr.f32.mxu0 %v12728_v47  ;;  %9074 = vmatpush3.bf16.msra.mxu0 %v9071_v25  ;;  %v12754_v47 = vld [vmem:[#allocation35_spill] sm:$0xff] }
 0x223   : > { %9076 = vmatprep.subr.bf16.mxu0 %v9075_v16 }
 0x225   : > { %7965 = vmatmul.mubr.f32.gmra.mrb[14].mxu0 %v12729_v42 }
 0x226   : > { %7967 = vmatprep.mubr.f32.mxu0 %v12730_v49  ;;  %9078 = vmatpush3.bf16.msra.mxu0 %v9075_v16  ;;  %v6364_v49 = vld [vmem:[%s12505_s3 + $0xd0] sm:$0xff] }
 0x229   : > { %7968 = vmatmul.mubr.f32.gmra.mrb[16].mxu0 %v12731_v14  ;;  %v6365_v14 = vld [vmem:[%s12505_s3 + $0xd8] sm:$0xff] }
 0x22a   : > { %7970 = vmatprep.mubr.f32.mxu0 %v12732_v17  ;;  %v9099_v17 = vpack.c.bf16 %v6365_v14, %v6364_v49 }
 0x22c   : > { %9100 = vmatprep.subr.bf16.mxu1 %v9099_v17 }
 0x22d   : > { %7971 = vmatmul.mubr.f32.gmra.mrb[18].mxu0 %v12733_v56  ;;  %9102 = vmatpush3.bf16.msra.mxu1 %v9099_v17  ;;  %v6366_v56 = vld [vmem:[%s12505_s3 + $0xe0] sm:$0xff] }
 0x22e   : > { %7973 = vmatprep.mubr.f32.mxu0 %v12734_v54  ;;  %v6367_v54 = vld [vmem:[%s12505_s3 + $0xe8] sm:$0xff] }
 0x231   : > { %7974 = vmatmul.mubr.f32.gmra.mrb[20].mxu0 %v12735_v8  ;;  %v9103_v8 = vpack.c.bf16 %v6367_v54, %v6366_v56 }
 0x232   : > { %7976 = vmatprep.mubr.f32.mxu0 %v12736_v22  ;;  %v6368_v22 = vld [vmem:[%s12505_s3 + $0xf0] sm:$0xff] }
 0x233   : > { %9104 = vmatprep.subr.bf16.mxu1 %v9103_v8 }
 0x234   : > { %9106 = vmatpush3.bf16.msra.mxu1 %v9103_v8 }
 0x235   : > { %7977 = vmatmul.mubr.f32.gmra.mrb[22].mxu0 %v12737_v10  ;;  %v6369_v10 = vld [vmem:[%s12505_s3 + $0xf8] sm:$0xff] }
 0x236   : > { %7979 = vmatprep.mubr.f32.mxu0 %v12738_v36  ;;  %v9107_v36 = vpack.c.bf16 %v6369_v10, %v6368_v22 }
 0x238   : > { %9108 = vmatprep.subr.bf16.mxu1 %v9107_v36 }
 0x239   : > { %7980 = vmatmul.mubr.f32.gmra.mrb[24].mxu0 %v12739_v19  ;;  %v11337_v19 = vld [vmem:[#allocation3 + $0x10] sm:$0x3]  ;;  %9110 = vmatpush3.bf16.msra.mxu1 %v9107_v36 }
 0x23a   : > { %7982 = vmatprep.mubr.f32.mxu0 %v12740_v21  ;;  %v3387_v21 = vrot.slane %v11337_v19, 1 }
 0x23d   : > { %7983 = vmatmul.mubr.f32.gmra.mrb[26].mxu0 %v12741_v28  ;;  %v3320_v28 = vld [vmem:[%s12505_s3] sm:$0xff] }
 0x23e   : > { %7985 = vmatprep.mubr.f32.mxu0 %v11026_v44  ;;  %v3388_v44 = vsel %vm463_vm0, %v11115_v18, %v3387_v21 }
 0x23f   : > { %8104 = vmatmul.mubr.f32.vlgmr.msra.gmra.mrb[0].mxu1 %v3388_v44 }
 0x241   : > { %7986 = vmatmul.mubr.f32.gmra.mrb[28].mxu0 %v11031_v52  ;;  %v3321_v52 = vld [vmem:[%s12505_s3 + $0x8] sm:$0xff] }
 0x242   : > { %7988 = vmatprep.mubr.f32.mxu0 %v11115_v18  ;;  %v3324_v18 = vld [vmem:[%s12505_s3 + $0x20] sm:$0xff] }
 0x243   : > { %v9119_v20 = vpack.c.bf16 %v3325_v57, %v3324_v18 }
 0x245   : > { %7989 = vmatmul.mubr.f32.gmra.mrb[30].mxu0 %v2550_v37 }
 0x246   : > { %8023 = vmatprep.mubr.f32.mxu0 %v10672_v7  ;;  %v12755_v7 = vld [vmem:[#allocation38_spill] sm:$0xff] }
 0x249   : > { %8024 = vmatmul.mubr.f32.vlgmr.msra.gmra.mrb[0].mxu0 %v12743_v45  ;;  %v9111_v45 = vpack.c.bf16 %v3321_v52, %v3320_v28 }
 0x24a   : > { %8026 = vmatprep.mubr.f32.mxu0 %v10689_v31  ;;  %v12756_v31 = vld [vmem:[#allocation39_spill] sm:$0xff] }
 0x24b   : > { %9112 = vmatprep.subr.bf16.mxu1 %v9111_v45 }
 0x24c   : > { %9114 = vmatpush3.bf16.msra.mxu1 %v9111_v45 }
 0x24d   : > { %8027 = vmatmul.mubr.f32.gmra.mrb[2].mxu0 %v12744_v6  ;;  %v3322_v6 = vld [vmem:[%s12505_s3 + $0x10] sm:$0xff] }
 0x24e   : > { %8029 = vmatprep.mubr.f32.mxu0 %v10706_v33  ;;  %v12757_v33 = vld [vmem:[#allocation40_spill] sm:$0xff] }
 0x251   : > { %8030 = vmatmul.mubr.f32.gmra.mrb[4].mxu0 %v12753_v38 }
 0x252   : > { %8032 = vmatprep.mubr.f32.mxu0 %v10723_v0  ;;  %v12758_v0 = vld [vmem:[#allocation41_spill] sm:$0xff] }
 0x255   : > { %8033 = vmatmul.mubr.f32.gmra.mrb[6].mxu0 %v12754_v47 }
 0x256   : > { %8035 = vmatprep.mubr.f32.mxu0 %v10740_v13  ;;  %v12759_v13 = vld [vmem:[#allocation42_spill] sm:$0xff] }
 0x259   : > { %8036 = vmatmul.mubr.f32.gmra.mrb[8].mxu0 %v10753_v59  ;;  %v12760_v59 = vld [vmem:[#allocation43_spill] sm:$0xff] }
 0x25a   : > { %8038 = vmatprep.mubr.f32.mxu0 %v12747_v9  ;;  %v3323_v9 = vld [vmem:[%s12505_s3 + $0x18] sm:$0xff] }
 0x25d   : > { %8039 = vmatmul.mubr.f32.gmra.mrb[10].mxu0 %v10770_v12  ;;  %v12762_v12 = vld [vmem:[#allocation45_spill] sm:$0xff] }
 0x25e   : > { %8041 = vmatprep.mubr.f32.mxu0 %v10774_v34  ;;  %v12763_v34 = vld [vmem:[#allocation46_spill] sm:$0xff] }
 0x261   : > { %8042 = vmatmul.mubr.f32.gmra.mrb[12].mxu0 %v10781_v23  ;;  %v12761_v23 = vld [vmem:[#allocation44_spill] sm:$0xff] }
 0x262   : > { %8044 = vmatprep.mubr.f32.mxu0 %v10785_v32  ;;  %v12764_v32 = vld [vmem:[#allocation4_spill] sm:$0xff] }
 0x265   : > { %8045 = vmatmul.mubr.f32.gmra.mrb[14].mxu0 %v10792_v46  ;;  %v2830_v46 = vrot.slane %v397_v30, 2 }
 0x266   : > { %8047 = vmatprep.mubr.f32.mxu0 %v10796_v55  ;;  %v12765_v55 = vld [vmem:[#allocation5_spill] sm:$0xff] }
 0x269   : > { %8048 = vmatmul.mubr.f32.gmra.mrb[16].mxu0 %v10803_v40  ;;  %v12766_v40 = vld [vmem:[#allocation30_spill] sm:$0xff] }
 0x26a   : > { %8050 = vmatprep.mubr.f32.mxu0 %v12748_v43  ;;  %v2831_v42 = vsel %vm1043_vm1, %v12766_v40, %v2830_v46  ;;  %v9115_v43 = vpack.c.bf16 %v3323_v9, %v3322_v6 }
 0x26c   : > { %9116 = vmatprep.subr.bf16.mxu1 %v9115_v43 }
 0x26d   : > { %8051 = vmatmul.mubr.f32.gmra.mrb[18].mxu0 %v12755_v7  ;;  %9118 = vmatpush3.bf16.msra.mxu1 %v9115_v43 }
 0x26e   : > { %8053 = vmatprep.mubr.f32.mxu0 %v12756_v31  ;;  %9120 = vmatprep.subr.bf16.mxu1 %v9119_v20 }
 0x271   : > { %8054 = vmatmul.mubr.f32.gmra.mrb[20].mxu0 %v12757_v33  ;;  %9122 = vmatpush3.bf16.msra.mxu1 %v9119_v20 }
 0x272   : > { %8056 = vmatprep.mubr.f32.mxu0 %v12758_v0  ;;  %9124 = vmatprep.subr.bf16.mxu1 %v9123_v11 }
 0x275   : > { %8057 = vmatmul.mubr.f32.gmra.mrb[22].mxu0 %v12759_v13  ;;  %9126 = vmatpush3.bf16.msra.mxu1 %v9123_v11 }
 0x276   : > { %8059 = vmatprep.mubr.f32.mxu0 %v12760_v59  ;;  %9128 = vmatprep.subr.bf16.mxu1 %v9127_v29 }
 0x279   : > { %8060 = vmatmul.mubr.f32.gmra.mrb[24].mxu0 %v12761_v23  ;;  %9130 = vmatpush3.bf16.msra.mxu1 %v9127_v29 }
 0x27a   : > { %8062 = vmatprep.mubr.f32.mxu0 %v12762_v12  ;;  %9132 = vmatprep.subr.bf16.mxu1 %v9131_v1 }
 0x27d   : > { %8063 = vmatmul.mubr.f32.gmra.mrb[26].mxu0 %v12763_v34  ;;  %9134 = vmatpush3.bf16.msra.mxu1 %v9131_v1 }
 0x27e   : > { %8065 = vmatprep.mubr.f32.mxu0 %v12764_v32  ;;  %9136 = vmatprep.subr.bf16.mxu1 %v9135_v58 }
 0x281   : > { %8066 = vmatmul.mubr.f32.gmra.mrb[28].mxu0 %v12765_v55  ;;  %9138 = vmatpush3.bf16.msra.mxu1 %v9135_v58 }
 0x282   : > { %8068 = vmatprep.mubr.f32.mxu0 %v12766_v40  ;;  %9140 = vmatprep.subr.bf16.mxu1 %v9139_v35 }
 0x285   : > { %8069 = vmatmul.mubr.f32.gmra.mrb[30].mxu0 %v2831_v42  ;;  %9142 = vmatpush3.bf16.msra.mxu1 %v9139_v35 }
 0x286   : > { %9144 = vmatprep.subr.bf16.mxu1 %v11396_v50 }
 0x31c   : > { %v8025_v51 = vpop.f32.mrb[0].mxu0 }
 0x31d   : > { %v3115_v25 = vadd.f32 %v8025_v51, %v11402_v63  ;;  %v2917_v53 = vpop.f32.mrb[1].mxu0 }
 0x31e   : > { %v3114_v4 = vadd.f32 %v11402_v63, %v2917_v53 }
 0x31f   : > { %v3147_v16 = vmax.f32 %v3115_v25, 0.0 }
 0x320   : > { %v3146_v30 = vmax.f32 %v3114_v4, 0.0  ;;  %v8028_v27 = vpop.f32.mrb[2].mxu0 }
 0x321   : > { %3234 = vst [vmem:[#allocation3 + $0x21] sm:$0xff] %v3147_v16  ;;  %v3117_v37 = vadd.f32 %v8028_v27, %v11402_v63  ;;  %v2927_v38 = vpop.f32.mrb[3].mxu0 }
 0x322   : > { %3233 = vst [vmem:[#allocation3 + $0x19] sm:$0xff] %v3146_v30  ;;  %v3116_v47 = vadd.f32 %v11402_v63, %v2927_v38 }
 0x323   : > { %v3149_v7 = vmax.f32 %v3117_v37, 0.0 }
 0x324   : > { %v3148_v31 = vmax.f32 %v3116_v47, 0.0  ;;  %v8031_v33 = vpop.f32.mrb[4].mxu0 }
 0x325   : > { %3236 = vst [vmem:[#allocation3 + $0x39] sm:$0xff] %v3149_v7  ;;  %v3119_v0 = vadd.f32 %v8031_v33, %v11402_v63  ;;  %v2937_v13 = vpop.f32.mrb[5].mxu0 }
 0x326   : > { %3235 = vst [vmem:[#allocation3 + $0x31] sm:$0xff] %v3148_v31  ;;  %v3118_v59 = vadd.f32 %v11402_v63, %v2937_v13 }
 0x327   : > { %v3151_v23 = vmax.f32 %v3119_v0, 0.0 }
 0x328   : > { %v3150_v12 = vmax.f32 %v3118_v59, 0.0  ;;  %v8034_v34 = vpop.f32.mrb[6].mxu0  ;;  %v11410_v32 = vld [vmem:[#allocation3 + $0x28] sm:$0x3] }
 0x329   : > { %3238 = vst [vmem:[#allocation3 + $0x51] sm:$0xff] %v3151_v23  ;;  %v3121_v46 = vadd.f32 %v8034_v34, %v11402_v63  ;;  %v2947_v55 = vpop.f32.mrb[7].mxu0  ;;  %v11413_v40 = vld [vmem:[#allocation3 + $0x18] sm:$0xff]  ;;  %v11415_v42 = vld [vmem:[#allocation3 + $0x20] sm:$0xff]  ;;  %v3392_v49 = vrot.slane %v11410_v32, 1 }
 0x32a   : > { %3237 = vst [vmem:[#allocation3 + $0x49] sm:$0xff] %v3150_v12  ;;  %v3120_v14 = vadd.f32 %v11402_v63, %v2947_v55  ;;  %v3389_v17 = vrot.slane %v11413_v40, 1  ;;  %v3390_v56 = vrot.slane %v11415_v42, 1 }
 0x32b   : > { %v3153_v54 = vmax.f32 %v3121_v46, 0.0 }
 0x32c   : > { %v3152_v8 = vmax.f32 %v3120_v14, 0.0  ;;  %v8037_v22 = vpop.f32.mrb[8].mxu0  ;;  %v11422_v10 = vsel %vm463_vm0, %v3389_v17, %v3390_v56  ;;  %v11425_v36 = vsel %vm463_vm0, %v3390_v56, %v3392_v49  ;;  %v11427_v21 = vld [vmem:[#allocation3 + $0x40] sm:$0x3] }
 0x32d   : > { %3240 = vst [vmem:[#allocation3 + $0x69] sm:$0xff] %v3153_v54  ;;  %v3123_v44 = vadd.f32 %v8037_v22, %v11402_v63  ;;  %v2957_v28 = vpop.f32.mrb[9].mxu0  ;;  %8106 = vmatprep.mubr.f32.mxu1 %v11422_v10  ;;  %v11431_v52 = vld [vmem:[#allocation3 + $0x30] sm:$0xff]  ;;  %v11433_v45 = vld [vmem:[#allocation3 + $0x38] sm:$0xff]  ;;  %v3397_v6 = vrot.slane %v11427_v21, 1 }
 0x32e   : > { %3239 = vst [vmem:[#allocation3 + $0x61] sm:$0xff] %v3152_v8  ;;  %v3122_v9 = vadd.f32 %v11402_v63, %v2957_v28  ;;  %8107 = vmatmul.mubr.f32.gmra.mrb[2].mxu1 %v11425_v36  ;;  %v3394_v43 = vrot.slane %v11431_v52, 1  ;;  %v3395_v18 = vrot.slane %v11433_v45, 1 }
 0x32f   : > { %v3155_v57 = vmax.f32 %v3123_v44, 0.0 }
 0x330   : > { %v3154_v20 = vmax.f32 %v3122_v9, 0.0  ;;  %v8040_v48 = vpop.f32.mrb[10].mxu0  ;;  %v11441_v3 = vsel %vm463_vm0, %v3394_v43, %v3395_v18  ;;  %v11444_v11 = vsel %vm463_vm0, %v3395_v18, %v3397_v6  ;;  %v11446_v15 = vld [vmem:[#allocation3 + $0x58] sm:$0x3] }
 0x331   : > { %3242 = vst [vmem:[#allocation3 + $0x81] sm:$0xff] %v3155_v57  ;;  %v3125_v24 = vadd.f32 %v8040_v48, %v11402_v63  ;;  %v2967_v29 = vpop.f32.mrb[11].mxu0  ;;  %8109 = vmatprep.mubr.f32.mxu1 %v11441_v3  ;;  %v11450_v39 = vld [vmem:[#allocation3 + $0x48] sm:$0xff]  ;;  %v11452_v2 = vld [vmem:[#allocation3 + $0x50] sm:$0xff]  ;;  %v3402_v1 = vrot.slane %v11446_v15, 1 }
 0x332   : > { %3241 = vst [vmem:[#allocation3 + $0x79] sm:$0xff] %v3154_v20  ;;  %v3124_v5 = vadd.f32 %v11402_v63, %v2967_v29  ;;  %8110 = vmatmul.mubr.f32.gmra.mrb[4].mxu1 %v11444_v11  ;;  %v3399_v60 = vrot.slane %v11450_v39, 1  ;;  %v3400_v58 = vrot.slane %v11452_v2, 1 }
 0x333   : > { %v3157_v61 = vmax.f32 %v3125_v24, 0.0 }
 0x334   : > { %v3156_v62 = vmax.f32 %v3124_v5, 0.0  ;;  %v8043_v35 = vpop.f32.mrb[12].mxu0  ;;  %v11460_v41 = vsel %vm463_vm0, %v3399_v60, %v3400_v58  ;;  %v11463_v26 = vsel %vm463_vm0, %v3400_v58, %v3402_v1  ;;  %v11465_v51 = vld [vmem:[#allocation3 + $0x70] sm:$0x3] }
 0x335   : > { %12767 = vst [vmem:[#allocation6_spill] sm:$0xff] %v11460_v41  ;;  %12768 = vst [vmem:[#allocation7_spill] sm:$0xff] %v11463_v26  ;;  %v3127_v25 = vadd.f32 %v8043_v35, %v11402_v63  ;;  %v2977_v53 = vpop.f32.mrb[13].mxu0  ;;  %8112 = vmatprep.mubr.f32.mxu1 %v11460_v41  ;;  %v11469_v4 = vld [vmem:[#allocation3 + $0x60] sm:$0xff]  ;;  %v11471_v16 = vld [vmem:[#allocation3 + $0x68] sm:$0xff]  ;;  %v3407_v30 = vrot.slane %v11465_v51, 1 }
 0x336   : > { %3244 = vst [vmem:[#allocation3 + $0x99] sm:$0xff] %v3157_v61  ;;  %3243 = vst [vmem:[#allocation3 + $0x91] sm:$0xff] %v3156_v62  ;;  %v3126_v27 = vadd.f32 %v11402_v63, %v2977_v53  ;;  %8113 = vmatmul.mubr.f32.gmra.mrb[6].mxu1 %v11463_v26  ;;  %v3404_v37 = vrot.slane %v11469_v4, 1  ;;  %v3405_v38 = vrot.slane %v11471_v16, 1  ;;  %v3973_v26 = vrot.slane %v11431_v52, 2 }
 0x337   : > { %v3159_v47 = vmax.f32 %v3127_v25, 0.0  ;;  %v3974_v41 = vrot.slane %v11433_v45, 2 }
 0x338   : > { %v3158_v7 = vmax.f32 %v3126_v27, 0.0  ;;  %v8046_v31 = vpop.f32.mrb[14].mxu0  ;;  %v11479_v33 = vsel %vm463_vm0, %v3404_v37, %v3405_v38  ;;  %v11482_v0 = vsel %vm463_vm0, %v3405_v38, %v3407_v30  ;;  %v11484_v13 = vld [vmem:[#allocation3 + $0x88] sm:$0x3] }
 0x339   : > { %12769 = vst [vmem:[#allocation8_spill] sm:$0xff] %v11479_v33  ;;  %12770 = vst [vmem:[#allocation9_spill] sm:$0xff] %v11482_v0  ;;  %v3129_v59 = vadd.f32 %v8046_v31, %v11402_v63  ;;  %v2987_v23 = vpop.f32.mrb[15].mxu0  ;;  %8115 = vmatprep.mubr.f32.mxu1 %v11479_v33  ;;  %v11488_v12 = vld [vmem:[#allocation3 + $0x78] sm:$0xff]  ;;  %v11490_v34 = vld [vmem:[#allocation3 + $0x80] sm:$0xff]  ;;  %v3412_v46 = vrot.slane %v11484_v13, 1 }
 0x33a   : > { %3246 = vst [vmem:[#allocation3 + $0xb1] sm:$0xff] %v3159_v47  ;;  %3245 = vst [vmem:[#allocation3 + $0xa9] sm:$0xff] %v3158_v7  ;;  %v3128_v55 = vadd.f32 %v11402_v63, %v2987_v23  ;;  %8116 = vmatmul.mubr.f32.gmra.mrb[8].mxu1 %v11482_v0  ;;  %v3409_v49 = vrot.slane %v11488_v12, 1  ;;  %v3410_v14 = vrot.slane %v11490_v34, 1  ;;  %v6391_v0 = vld [vmem:[%s12505_s3 + $0x1a8] sm:$0xff] }
 0x33b   : > { %v3161_v17 = vmax.f32 %v3129_v59, 0.0 }
 0x33c   : > { %v3160_v56 = vmax.f32 %v3128_v55, 0.0  ;;  %v8049_v54 = vpop.f32.mrb[16].mxu0  ;;  %v11498_v8 = vsel %vm463_vm0, %v3409_v49, %v3410_v14  ;;  %v11501_v22 = vsel %vm463_vm0, %v3410_v14, %v3412_v46 }
 0x33d   : > { %12771 = vst [vmem:[#allocation10_spill] sm:$0xff] %v11498_v8  ;;  %12772 = vst [vmem:[#allocation11_spill] sm:$0xff] %v11501_v22  ;;  %v11503_v44 = vld [vmem:[#allocation3 + $0xa0] sm:$0x3]  ;;  %v3131_v28 = vadd.f32 %v8049_v54, %v11402_v63  ;;  %v2997_v6 = vpop.f32.mrb[17].mxu0  ;;  %8118 = vmatprep.mubr.f32.mxu1 %v11498_v8  ;;  %v11507_v9 = vld [vmem:[#allocation3 + $0x90] sm:$0xff] }
 0x33e   : > { %3248 = vst [vmem:[#allocation3 + $0xc9] sm:$0xff] %v3161_v17  ;;  %v11509_v43 = vld [vmem:[#allocation3 + $0x98] sm:$0xff]  ;;  %v3417_v18 = vrot.slane %v11503_v44, 1  ;;  %3247 = vst [vmem:[#allocation3 + $0xc1] sm:$0xff] %v3160_v56  ;;  %v3130_v57 = vadd.f32 %v11402_v63, %v2997_v6  ;;  %8119 = vmatmul.mubr.f32.gmra.mrb[10].mxu1 %v11501_v22  ;;  %v3414_v20 = vrot.slane %v11507_v9, 1  ;;  %v6390_v8 = vld [vmem:[%s12505_s3 + $0x1a0] sm:$0xff] }
 0x33f   : > { %v3415_v48 = vrot.slane %v11509_v43, 1  ;;  %v3163_v24 = vmax.f32 %v3131_v28, 0.0 }
 0x340   : > { %v3162_v29 = vmax.f32 %v3130_v57, 0.0  ;;  %v8052_v1 = vpop.f32.mrb[18].mxu0 }
 0x341   : > { %v11517_v5 = vsel %vm463_vm0, %v3414_v20, %v3415_v48  ;;  %v11520_v60 = vsel %vm463_vm0, %v3415_v48, %v3417_v18  ;;  %v11522_v58 = vld [vmem:[#allocation3 + $0xb8] sm:$0x3]  ;;  %3250 = vst [vmem:[#allocation3 + $0xe1] sm:$0xff] %v3163_v24  ;;  %v3133_v61 = vadd.f32 %v8052_v1, %v11402_v63  ;;  %v3007_v62 = vpop.f32.mrb[19].mxu0  ;;  %v11526_v35 = vld [vmem:[#allocation3 + $0xa8] sm:$0xff]  ;;  %v11528_v25 = vld [vmem:[#allocation3 + $0xb0] sm:$0xff] }
 0x342   : > { %12773 = vst [vmem:[#allocation12_spill] sm:$0xff] %v11517_v5  ;;  %12774 = vst [vmem:[#allocation13_spill] sm:$0xff] %v11520_v60  ;;  %8121 = vmatprep.mubr.f32.mxu1 %v11517_v5  ;;  %v3422_v53 = vrot.slane %v11522_v58, 1  ;;  %v3132_v30 = vadd.f32 %v11402_v63, %v3007_v62  ;;  %v3419_v27 = vrot.slane %v11526_v35, 1  ;;  %v3420_v37 = vrot.slane %v11528_v25, 1 }
 0x343   : > { %3249 = vst [vmem:[#allocation3 + $0xd9] sm:$0xff] %v3162_v29  ;;  %8122 = vmatmul.mubr.f32.gmra.mrb[12].mxu1 %v11520_v60  ;;  %v3165_v38 = vmax.f32 %v3133_v61, 0.0 }
 0x344   : > { %v3164_v47 = vmax.f32 %v3132_v30, 0.0  ;;  %v8055_v7 = vpop.f32.mrb[20].mxu0  ;;  %v11536_v31 = vsel %vm463_vm0, %v3419_v27, %v3420_v37  ;;  %v11539_v59 = vsel %vm463_vm0, %v3420_v37, %v3422_v53 }
 0x345   : > { %12775 = vst [vmem:[#allocation14_spill] sm:$0xff] %v11536_v31  ;;  %12776 = vst [vmem:[#allocation15_spill] sm:$0xff] %v11539_v59  ;;  %v11541_v23 = vld [vmem:[#allocation3 + $0xd0] sm:$0x3]  ;;  %v3135_v46 = vadd.f32 %v8055_v7, %v11402_v63  ;;  %v3017_v55 = vpop.f32.mrb[21].mxu0  ;;  %8124 = vmatprep.mubr.f32.mxu1 %v11536_v31  ;;  %v11545_v49 = vld [vmem:[#allocation3 + $0xc0] sm:$0xff] }
 0x346   : > { %3252 = vst [vmem:[#allocation3 + $0xf9] sm:$0xff] %v3165_v38  ;;  %v11547_v14 = vld [vmem:[#allocation3 + $0xc8] sm:$0xff]  ;;  %v3427_v17 = vrot.slane %v11541_v23, 1  ;;  %3251 = vst [vmem:[#allocation3 + $0xf1] sm:$0xff] %v3164_v47  ;;  %v3134_v56 = vadd.f32 %v11402_v63, %v3017_v55  ;;  %v3424_v54 = vrot.slane %v11545_v49, 1 }
 0x347   : > { %8125 = vmatmul.mubr.f32.gmra.mrb[14].mxu1 %v11539_v59  ;;  %v3425_v28 = vrot.slane %v11547_v14, 1  ;;  %v3167_v6 = vmax.f32 %v3135_v46, 0.0 }
 0x348   : > { %v3166_v18 = vmax.f32 %v3134_v56, 0.0  ;;  %v8058_v57 = vpop.f32.mrb[22].mxu0  ;;  %v11560_v24 = vld [vmem:[#allocation3 + $0xe8] sm:$0x3] }
 0x349   : > { %v11555_v20 = vsel %vm463_vm0, %v3424_v54, %v3425_v28  ;;  %v11558_v48 = vsel %vm463_vm0, %v3425_v28, %v3427_v17  ;;  %3254 = vst [vmem:[#allocation3 + $0x111] sm:$0xff] %v3167_v6  ;;  %v3137_v29 = vadd.f32 %v8058_v57, %v11402_v63  ;;  %v3027_v1 = vpop.f32.mrb[23].mxu0  ;;  %v3432_v53 = vrot.slane %v11560_v24, 1 }
 0x34a   : > { %12777 = vst [vmem:[#allocation16_spill] sm:$0xff] %v11555_v20  ;;  %12778 = vst [vmem:[#allocation17_spill] sm:$0xff] %v11558_v48  ;;  %8127 = vmatprep.mubr.f32.mxu1 %v11555_v20  ;;  %v11564_v61 = vld [vmem:[#allocation3 + $0xd8] sm:$0xff]  ;;  %v11566_v62 = vld [vmem:[#allocation3 + $0xe0] sm:$0xff]  ;;  %v3136_v30 = vadd.f32 %v11402_v63, %v3027_v1 }
 0x34b   : > { %3253 = vst [vmem:[#allocation3 + $0x109] sm:$0xff] %v3166_v18  ;;  %8128 = vmatmul.mubr.f32.gmra.mrb[16].mxu1 %v11558_v48  ;;  %v3429_v27 = vrot.slane %v11564_v61, 1  ;;  %v3430_v37 = vrot.slane %v11566_v62, 1  ;;  %v3169_v38 = vmax.f32 %v3137_v29, 0.0 }
 0x34c   : > { %v3168_v47 = vmax.f32 %v3136_v30, 0.0  ;;  %v8061_v7 = vpop.f32.mrb[24].mxu0 }
 0x34d   : > { %v11574_v46 = vsel %vm463_vm0, %v3429_v27, %v3430_v37  ;;  %v11577_v55 = vsel %vm463_vm0, %v3430_v37, %v3432_v53  ;;  %v11579_v17 = vld [vmem:[#allocation3 + $0x100] sm:$0x3]  ;;  %3256 = vst [vmem:[#allocation3 + $0x129] sm:$0xff] %v3169_v38  ;;  %v3139_v56 = vadd.f32 %v8061_v7, %v11402_v63  ;;  %v3037_v54 = vpop.f32.mrb[25].mxu0  ;;  %v11583_v28 = vld [vmem:[#allocation3 + $0xf0] sm:$0xff]  ;;  %v11585_v6 = vld [vmem:[#allocation3 + $0xf8] sm:$0xff] }
 0x34e   : > { %12779 = vst [vmem:[#allocation18_spill] sm:$0xff] %v11574_v46  ;;  %12780 = vst [vmem:[#allocation19_spill] sm:$0xff] %v11577_v55  ;;  %8130 = vmatprep.mubr.f32.mxu1 %v11574_v46  ;;  %v3437_v18 = vrot.slane %v11579_v17, 1  ;;  %v3138_v57 = vadd.f32 %v11402_v63, %v3037_v54  ;;  %v3434_v29 = vrot.slane %v11583_v28, 1  ;;  %v3435_v1 = vrot.slane %v11585_v6, 1 }
 0x34f   : > { %3255 = vst [vmem:[#allocation3 + $0x121] sm:$0xff] %v3168_v47  ;;  %8131 = vmatmul.mubr.f32.gmra.mrb[18].mxu1 %v11577_v55  ;;  %v3171_v53 = vmax.f32 %v3139_v56, 0.0 }
 0x350   : > { %v3170_v30 = vmax.f32 %v3138_v57, 0.0  ;;  %v8064_v27 = vpop.f32.mrb[26].mxu0  ;;  %v11593_v37 = vsel %vm463_vm0, %v3434_v29, %v3435_v1  ;;  %v11596_v38 = vsel %vm463_vm0, %v3435_v1, %v3437_v18  ;;  %v11598_v7 = vld [vmem:[#allocation3 + $0x118] sm:$0x3] }
 0x351   : > { %12781 = vst [vmem:[#allocation20_spill] sm:$0xff] %v11593_v37  ;;  %12782 = vst [vmem:[#allocation21_spill] sm:$0xff] %v11596_v38  ;;  %v3141_v47 = vadd.f32 %v8064_v27, %v11402_v63  ;;  %v3047_v54 = vpop.f32.mrb[27].mxu0  ;;  %8133 = vmatprep.mubr.f32.mxu1 %v11593_v37  ;;  %v3442_v56 = vrot.slane %v11598_v7, 1 }
 0x352   : > { %3258 = vst [vmem:[#allocation3 + $0x141] sm:$0xff] %v3171_v53  ;;  %v11602_v55 = vld [vmem:[#allocation3 + $0x108] sm:$0xff]  ;;  %v11604_v46 = vld [vmem:[#allocation3 + $0x110] sm:$0xff]  ;;  %3257 = vst [vmem:[#allocation3 + $0x139] sm:$0xff] %v3170_v30  ;;  %v3140_v57 = vadd.f32 %v11402_v63, %v3047_v54 }
 0x353   : > { %8134 = vmatmul.mubr.f32.gmra.mrb[20].mxu1 %v11596_v38  ;;  %v3439_v18 = vrot.slane %v11602_v55, 1  ;;  %v3440_v29 = vrot.slane %v11604_v46, 1  ;;  %v3173_v1 = vmax.f32 %v3141_v47, 0.0 }
 0x354   : > { %v3172_v53 = vmax.f32 %v3140_v57, 0.0  ;;  %v8067_v27 = vpop.f32.mrb[28].mxu0  ;;  %v11617_v20 = vld [vmem:[#allocation3 + $0x130] sm:$0x3] }
 0x355   : > { %v11612_v37 = vsel %vm463_vm0, %v3439_v18, %v3440_v29  ;;  %v11615_v48 = vsel %vm463_vm0, %v3440_v29, %v3442_v56  ;;  %3260 = vst [vmem:[#allocation3 + $0x159] sm:$0xff] %v3173_v1  ;;  %v3143_v30 = vadd.f32 %v8067_v27, %v11402_v63  ;;  %v3057_v54 = vpop.f32.mrb[29].mxu0  ;;  %v3447_v47 = vrot.slane %v11617_v20, 1 }
 0x356   : > { %12783 = vst [vmem:[#allocation22_spill] sm:$0xff] %v11612_v37  ;;  %12784 = vst [vmem:[#allocation23_spill] sm:$0xff] %v11615_v48  ;;  %8136 = vmatprep.mubr.f32.mxu1 %v11612_v37  ;;  %v11621_v38 = vld [vmem:[#allocation3 + $0x120] sm:$0xff]  ;;  %v11623_v59 = vld [vmem:[#allocation3 + $0x128] sm:$0xff]  ;;  %v3142_v57 = vadd.f32 %v11402_v63, %v3057_v54 }
 0x357   : > { %3259 = vst [vmem:[#allocation3 + $0x151] sm:$0xff] %v3172_v53  ;;  %8137 = vmatmul.mubr.f32.gmra.mrb[22].mxu1 %v11615_v48  ;;  %v3444_v56 = vrot.slane %v11621_v38, 1  ;;  %v3445_v18 = vrot.slane %v11623_v59, 1  ;;  %v3175_v29 = vmax.f32 %v3143_v30, 0.0 }
 0x358   : > { %v3174_v1 = vmax.f32 %v3142_v57, 0.0  ;;  %v8070_v27 = vpop.f32.mrb[30].mxu0 }
 0x359   : > { %v11631_v37 = vsel %vm463_vm0, %v3444_v56, %v3445_v18  ;;  %v11634_v31 = vsel %vm463_vm0, %v3445_v18, %v3447_v47  ;;  %v11636_v60 = vld [vmem:[#allocation3 + $0x148] sm:$0x3]  ;;  %3262 = vst [vmem:[#allocation3 + $0x171] sm:$0xff] %v3175_v29  ;;  %v3145_v53 = vadd.f32 %v8070_v27, %v11402_v63  ;;  %v3067_v54 = vpop.f32.mrb[31].mxu0  ;;  %v11640_v48 = vld [vmem:[#allocation3 + $0x138] sm:$0xff]  ;;  %v11642_v5 = vld [vmem:[#allocation3 + $0x140] sm:$0xff] }
 0x35a   : > { %12785 = vst [vmem:[#allocation24_spill] sm:$0xff] %v11631_v37  ;;  %12786 = vst [vmem:[#allocation25_spill] sm:$0xff] %v11634_v31  ;;  %8139 = vmatprep.mubr.f32.mxu1 %v11631_v37  ;;  %v3452_v30 = vrot.slane %v11636_v60, 1  ;;  %v3144_v57 = vadd.f32 %v11402_v63, %v3067_v54  ;;  %v3449_v47 = vrot.slane %v11640_v48, 1  ;;  %v3450_v56 = vrot.slane %v11642_v5, 1 }
 0x35b   : > { %3261 = vst [vmem:[#allocation3 + $0x169] sm:$0xff] %v3174_v1  ;;  %8140 = vmatmul.mubr.f32.gmra.mrb[24].mxu1 %v11634_v31  ;;  %v3177_v18 = vmax.f32 %v3145_v53, 0.0 }
 0x35c   : > { %v3176_v29 = vmax.f32 %v3144_v57, 0.0  ;;  %v11650_v27 = vsel %vm463_vm0, %v3449_v47, %v3450_v56  ;;  %v11653_v37 = vsel %vm463_vm0, %v3450_v56, %v3452_v30  ;;  %v11655_v22 = vld [vmem:[#allocation3 + $0x160] sm:$0x3] }
 0x35d   : > { %12787 = vst [vmem:[#allocation26_spill] sm:$0xff] %v11650_v27  ;;  %12788 = vst [vmem:[#allocation27_spill] sm:$0xff] %v11653_v37  ;;  %8142 = vmatprep.mubr.f32.mxu1 %v11650_v27  ;;  %v3457_v54 = vrot.slane %v11655_v22, 1 }
 0x35e   : > { %3264 = vst [vmem:[#allocation3 + $0x189] sm:$0xff] %v3177_v18  ;;  %v11658_v63 = vld [vmem:[#allocation3 + $0x150] sm:$0xff]  ;;  %v11660_v1 = vld [vmem:[#allocation3 + $0x158] sm:$0xff]  ;;  %3263 = vst [vmem:[#allocation3 + $0x181] sm:$0xff] %v3176_v29 }
 0x35f   : > { %8143 = vmatmul.mubr.f32.gmra.mrb[26].mxu1 %v11653_v37  ;;  %v3454_v53 = vrot.slane %v11658_v63, 1  ;;  %v3455_v57 = vrot.slane %v11660_v1, 1 }
 0x360   : > { %v11672_v56 = vld [vmem:[#allocation3 + $0x178] sm:$0x3] }
 0x361   : > { %v11667_v30 = vsel %vm463_vm0, %v3454_v53, %v3455_v57  ;;  %v11670_v47 = vsel %vm463_vm0, %v3455_v57, %v3457_v54  ;;  %v3462_v29 = vrot.slane %v11672_v56, 1  ;;  %v6372_v57 = vld [vmem:[%s12505_s3 + $0x110] sm:$0xff] }
 0x362   : > { %12789 = vst [vmem:[#allocation28_spill] sm:$0xff] %v11667_v30  ;;  %12790 = vst [vmem:[#allocation29_spill] sm:$0xff] %v11670_v47  ;;  %8145 = vmatprep.mubr.f32.mxu1 %v11667_v30  ;;  %v11675_v18 = vld [vmem:[#allocation3 + $0x168] sm:$0xff]  ;;  %v11677_v27 = vld [vmem:[#allocation3 + $0x170] sm:$0xff] }
 0x363   : > { %8146 = vmatmul.mubr.f32.gmra.mrb[28].mxu1 %v11670_v47  ;;  %v3459_v37 = vrot.slane %v11675_v18, 1  ;;  %v3460_v53 = vrot.slane %v11677_v27, 1  ;;  %v6373_v47 = vld [vmem:[%s12505_s3 + $0x118] sm:$0xff]  ;;  %v11697_v30 = vld [vmem:[#allocation2] sm:$0xff] }
 0x365   : > { %v11684_v31 = vsel %vm463_vm0, %v3459_v37, %v3460_v53  ;;  %v11687_v54 = vsel %vm463_vm0, %v3460_v53, %v3462_v29  ;;  %v9147_v37 = vpack.c.bf16 %v6373_v47, %v6372_v57  ;;  %v6374_v29 = vld [vmem:[%s12505_s3 + $0x120] sm:$0xff]  ;;  %v6375_v53 = vld [vmem:[%s12505_s3 + $0x128] sm:$0xff]  ;;  %v6376_v47 = vld [vmem:[%s12505_s3 + $0x130] sm:$0xff] }
 0x366   : > { %12791 = vst [vmem:[#allocation31_spill] sm:$0xff] %v11684_v31  ;;  %12792 = vst [vmem:[#allocation32_spill] sm:$0xff] %v11687_v54  ;;  %8148 = vmatprep.mubr.f32.mxu1 %v11684_v31  ;;  %v6377_v57 = vld [vmem:[%s12505_s3 + $0x138] sm:$0xff] }
 0x367   : > { %8149 = vmatmul.mubr.f32.gmra.mrb[30].mxu1 %v11687_v54  ;;  %v9151_v54 = vpack.c.bf16 %v6375_v53, %v6374_v29  ;;  %v9155_v31 = vpack.c.bf16 %v6377_v57, %v6376_v47  ;;  %v6379_v29 = vld [vmem:[%s12505_s3 + $0x148] sm:$0xff]  ;;  %v6381_v47 = vld [vmem:[%s12505_s3 + $0x158] sm:$0xff] }
 0x368   : > { %8183 = vmatprep.mubr.f32.mxu1 %v11697_v30 }
 0x36b   : > { %8184 = vmatmul.mubr.f32.vlgmr.msra.gmra.mrb[0].mxu1 %v11697_v30 }
 0x36c   : > { %8186 = vmatprep.mubr.f32.mxu1 %v11413_v40  ;;  %9146 = vmatpush3.bf16.msra.mxu1 %v11396_v50  ;;  %v6378_v50 = vld [vmem:[%s12505_s3 + $0x140] sm:$0xff] }
 0x36d   : > { %9148 = vmatprep.subr.bf16.mxu1 %v9147_v37  ;;  %v9159_v53 = vpack.c.bf16 %v6379_v29, %v6378_v50  ;;  %v6383_v50 = vld [vmem:[%s12505_s3 + $0x168] sm:$0xff] }
 0x36f   : > { %8187 = vmatmul.mubr.f32.gmra.mrb[2].mxu1 %v11415_v42 }
 0x370   : > { %8189 = vmatprep.mubr.f32.mxu1 %v11431_v52  ;;  %9150 = vmatpush3.bf16.msra.mxu1 %v9147_v37  ;;  %v6380_v37 = vld [vmem:[%s12505_s3 + $0x150] sm:$0xff] }
 0x371   : > { %9152 = vmatprep.subr.bf16.mxu1 %v9151_v54  ;;  %v9163_v57 = vpack.c.bf16 %v6381_v47, %v6380_v37  ;;  %v6385_v37 = vld [vmem:[%s12505_s3 + $0x178] sm:$0xff] }
 0x373   : > { %8190 = vmatmul.mubr.f32.gmra.mrb[4].mxu1 %v11433_v45 }
 0x374   : > { %8192 = vmatprep.mubr.f32.mxu1 %v11450_v39  ;;  %9154 = vmatpush3.bf16.msra.mxu1 %v9151_v54  ;;  %v6382_v54 = vld [vmem:[%s12505_s3 + $0x160] sm:$0xff] }
 0x375   : > { %9156 = vmatprep.subr.bf16.mxu1 %v9155_v31  ;;  %v9167_v29 = vpack.c.bf16 %v6383_v50, %v6382_v54  ;;  %v6387_v54 = vld [vmem:[%s12505_s3 + $0x188] sm:$0xff] }
 0x377   : > { %8193 = vmatmul.mubr.f32.gmra.mrb[6].mxu1 %v11452_v2 }
 0x378   : > { %8195 = vmatprep.mubr.f32.mxu1 %v11469_v4  ;;  %9158 = vmatpush3.bf16.msra.mxu1 %v9155_v31  ;;  %v6384_v31 = vld [vmem:[%s12505_s3 + $0x170] sm:$0xff] }
 0x379   : > { %9160 = vmatprep.subr.bf16.mxu1 %v9159_v53  ;;  %v9171_v47 = vpack.c.bf16 %v6385_v37, %v6384_v31  ;;  %v6388_v31 = vld [vmem:[%s12505_s3 + $0x190] sm:$0xff]  ;;  %v6389_v37 = vld [vmem:[%s12505_s3 + $0x198] sm:$0xff] }
 0x37b   : > { %8196 = vmatmul.mubr.f32.gmra.mrb[8].mxu1 %v11471_v16 }
 0x37c   : > { %8198 = vmatprep.mubr.f32.mxu1 %v11488_v12  ;;  %9162 = vmatpush3.bf16.msra.mxu1 %v9159_v53  ;;  %v6386_v53 = vld [vmem:[%s12505_s3 + $0x180] sm:$0xff] }
 0x37d   : > { %9164 = vmatprep.subr.bf16.mxu1 %v9163_v57  ;;  %v9175_v50 = vpack.c.bf16 %v6387_v54, %v6386_v53  ;;  %v9179_v53 = vpack.c.bf16 %v6389_v37, %v6388_v31  ;;  %v3971_v54 = vrot.slane %v11410_v32, 2  ;;  %v9183_v32 = vpack.c.bf16 %v6391_v0, %v6390_v8  ;;  %v6392_v37 = vld [vmem:[%s12505_s3 + $0x1b0] sm:$0xff] }
 0x37e   : > { %v3976_v31 = vrot.slane %v11427_v21, 2  ;;  %v3978_v0 = vrot.slane %v11450_v39, 2  ;;  %v3979_v8 = vrot.slane %v11452_v2, 2 }
 0x37f   : > { %8199 = vmatmul.mubr.f32.gmra.mrb[10].mxu1 %v11490_v34 }
 0x380   : > { %8201 = vmatprep.mubr.f32.mxu1 %v11507_v9  ;;  %9166 = vmatpush3.bf16.msra.mxu1 %v9163_v57  ;;  %v11772_v57 = vrot.slane %v11697_v30, 2  ;;  %v3969_v30 = vrot.slane %v11415_v42, 2 }
 0x381   : > { %9168 = vmatprep.subr.bf16.mxu1 %v9167_v29 }
 0x382   : > { %12793 = vst [vmem:[#allocation33_spill] sm:$0xff] %v11772_v57 }
 0x383   : > { %8202 = vmatmul.mubr.f32.gmra.mrb[12].mxu1 %v11509_v43 }
 0x384   : > { %8204 = vmatprep.mubr.f32.mxu1 %v11526_v35  ;;  %9170 = vmatpush3.bf16.msra.mxu1 %v9167_v29  ;;  %v3966_v29 = vrot.slane %v11337_v19, 2 }
 0x385   : > { %9172 = vmatprep.subr.bf16.mxu1 %v9171_v47 }
 0x386   : > { %v3967_v19 = vsel %vm1043_vm1, %v11772_v57, %v3966_v29  ;;  %v11803_v29 = vsel %vm1043_vm1, %v3969_v30, %v3971_v54  ;;  %v6394_v54 = vld [vmem:[%s12505_s3 + $0x1c0] sm:$0xff] }
 0x387   : > { %8205 = vmatmul.mubr.f32.gmra.mrb[14].mxu1 %v11528_v25 }
 0x388   : > { %8207 = vmatprep.mubr.f32.mxu1 %v11545_v49  ;;  %9174 = vmatpush3.bf16.msra.mxu1 %v9171_v47  ;;  %v3968_v47 = vrot.slane %v11413_v40, 2 }
 0x389   : > { %9176 = vmatprep.subr.bf16.mxu1 %v9175_v50 }
 0x38a   : > { %v11797_v33 = vsel %vm1043_vm1, %v3968_v47, %v3969_v30  ;;  %v6393_v47 = vld [vmem:[%s12505_s3 + $0x1b8] sm:$0xff]  ;;  %v3981_v30 = vrot.slane %v11446_v15, 2 }
 0x38b   : > { %8208 = vmatmul.mubr.f32.gmra.mrb[16].mxu1 %v11547_v14  ;;  %v9187_v21 = vpack.c.bf16 %v6393_v47, %v6392_v37  ;;  %v3986_v37 = vrot.slane %v11465_v51, 2  ;;  %v6396_v47 = vld [vmem:[%s12505_s3 + $0x1d0] sm:$0xff] }
 0x38c   : > { %8210 = vmatprep.mubr.f32.mxu1 %v11564_v61 }
 0x38f   : > { %8211 = vmatmul.mubr.f32.gmra.mrb[18].mxu1 %v11566_v62 }
 0x390   : > { %8213 = vmatprep.mubr.f32.mxu1 %v11583_v28 }
 0x393   : > { %8214 = vmatmul.mubr.f32.gmra.mrb[20].mxu1 %v11585_v6 }
 0x394   : > { %8216 = vmatprep.mubr.f32.mxu1 %v11602_v55 }
 0x397   : > { %8217 = vmatmul.mubr.f32.gmra.mrb[22].mxu1 %v11604_v46 }
 0x398   : > { %8219 = vmatprep.mubr.f32.mxu1 %v11621_v38 }
 0x39b   : > { %8220 = vmatmul.mubr.f32.gmra.mrb[24].mxu1 %v11623_v59 }
 0x39c   : > { %8222 = vmatprep.mubr.f32.mxu1 %v11640_v48 }
 0x39f   : > { %8223 = vmatmul.mubr.f32.gmra.mrb[26].mxu1 %v11642_v5 }
 0x3a0   : > { %8225 = vmatprep.mubr.f32.mxu1 %v11658_v63 }
 0x3a3   : > { %8226 = vmatmul.mubr.f32.gmra.mrb[28].mxu1 %v11660_v1 }
 0x3a4   : > { %8228 = vmatprep.mubr.f32.mxu1 %v11675_v18 }
 0x3a7   : > { %8229 = vmatmul.mubr.f32.gmra.mrb[30].mxu1 %v11677_v27 }
 0x3a8   : > { %8263 = vmatprep.mubr.f32.mxu1 %v11772_v57  ;;  %v11831_v57 = vsel %vm1043_vm1, %v3978_v0, %v3979_v8  ;;  %v6397_v0 = vld [vmem:[%s12505_s3 + $0x1d8] sm:$0xff] }
 0x3a9   : > { %12794 = vst [vmem:[#allocation36_spill] sm:$0xff] %v11831_v57  ;;  %v9195_v51 = vpack.c.bf16 %v6397_v0, %v6396_v47  ;;  %v3996_v47 = vrot.slane %v11503_v44, 2  ;;  %v6400_v0 = vld [vmem:[%s12505_s3 + $0x1f0] sm:$0xff] }
 0x3ab   : > { %8264 = vmatmul.mubr.f32.vlgmr.msra.gmra.mrb[0].mxu1 %v3967_v19  ;;  %v11814_v19 = vsel %vm1043_vm1, %v3973_v26, %v3974_v41  ;;  %v6395_v26 = vld [vmem:[%s12505_s3 + $0x1c8] sm:$0xff] }
 0x3ac   : > { %8266 = vmatprep.mubr.f32.mxu1 %v11797_v33  ;;  %9178 = vmatpush3.bf16.msra.mxu1 %v9175_v50  ;;  %v11820_v50 = vsel %vm1043_vm1, %v3974_v41, %v3976_v31  ;;  %v3984_v41 = vrot.slane %v11471_v16, 2  ;;  %v9191_v15 = vpack.c.bf16 %v6395_v26, %v6394_v54  ;;  %v11837_v31 = vsel %vm1043_vm1, %v3979_v8, %v3981_v30  ;;  %v6398_v26 = vld [vmem:[%s12505_s3 + $0x1e0] sm:$0xff] }
 0x3ad   : > { %9180 = vmatprep.subr.bf16.mxu1 %v9179_v53  ;;  %v3989_v8 = vrot.slane %v11490_v34, 2  ;;  %v3991_v54 = vrot.slane %v11484_v13, 2 }
 0x3ae   : > { %v11854_v30 = vsel %vm1043_vm1, %v3984_v41, %v3986_v37 }
 0x3af   : > { %8267 = vmatmul.mubr.f32.gmra.mrb[2].mxu1 %v11803_v29  ;;  %v11871_v37 = vsel %vm1043_vm1, %v3989_v8, %v3991_v54 }
 0x3b0   : > { %8269 = vmatprep.mubr.f32.mxu1 %v11814_v19  ;;  %9182 = vmatpush3.bf16.msra.mxu1 %v9179_v53  ;;  %v3983_v53 = vrot.slane %v11469_v4, 2  ;;  %12797 = vst [vmem:[#allocation35_spill] sm:$0xff] %v11871_v37 }
 0x3b1   : > { %9184 = vmatprep.subr.bf16.mxu1 %v9183_v32 }
 0x3b3   : > { %8270 = vmatmul.mubr.f32.gmra.mrb[4].mxu1 %v11820_v50 }
 0x3b4   : > { %8272 = vmatprep.mubr.f32.mxu1 %v11831_v57  ;;  %9186 = vmatpush3.bf16.msra.mxu1 %v9183_v32  ;;  %v11848_v57 = vsel %vm1043_vm1, %v3983_v53, %v3984_v41  ;;  %v3988_v32 = vrot.slane %v11488_v12, 2  ;;  %v6399_v53 = vld [vmem:[%s12505_s3 + $0x1e8] sm:$0xff]  ;;  %v3994_v41 = vrot.slane %v11509_v43, 2 }
 0x3b5   : > { %9188 = vmatprep.subr.bf16.mxu1 %v9187_v21  ;;  %12795 = vst [vmem:[#allocation37_spill] sm:$0xff] %v11848_v57  ;;  %v9199_v13 = vpack.c.bf16 %v6399_v53, %v6398_v26  ;;  %v4001_v26 = vrot.slane %v11522_v58, 2  ;;  %v6402_v53 = vld [vmem:[%s12505_s3 + $0x200] sm:$0xff] }
 0x3b6   : > { %v11888_v54 = vsel %vm1043_vm1, %v3994_v41, %v3996_v47 }
 0x3b7   : > { %8273 = vmatmul.mubr.f32.gmra.mrb[6].mxu1 %v11837_v31  ;;  %12799 = vst [vmem:[#allocation39_spill] sm:$0xff] %v11888_v54 }
 0x3b8   : > { %8275 = vmatprep.mubr.f32.mxu1 %v11848_v57  ;;  %9190 = vmatpush3.bf16.msra.mxu1 %v9187_v21  ;;  %v11865_v57 = vsel %vm1043_vm1, %v3988_v32, %v3989_v8  ;;  %v3993_v21 = vrot.slane %v11507_v9, 2  ;;  %v6401_v32 = vld [vmem:[%s12505_s3 + $0x1f8] sm:$0xff]  ;;  %v3999_v8 = vrot.slane %v11528_v25, 2 }
 0x3b9   : > { %9192 = vmatprep.subr.bf16.mxu1 %v9191_v15  ;;  %12796 = vst [vmem:[#allocation34_spill] sm:$0xff] %v11865_v57  ;;  %v9203_v44 = vpack.c.bf16 %v6401_v32, %v6400_v0  ;;  %v4006_v0 = vrot.slane %v11541_v23, 2 }
 0x3ba   : > { %v11907_v47 = vsel %vm1043_vm1, %v3999_v8, %v4001_v26  ;;  %v4013_v26 = vrot.slane %v11583_v28, 2 }
 0x3bb   : > { %8276 = vmatmul.mubr.f32.gmra.mrb[8].mxu1 %v11854_v30 }
 0x3bc   : > { %8278 = vmatprep.mubr.f32.mxu1 %v11865_v57  ;;  %9194 = vmatpush3.bf16.msra.mxu1 %v9191_v15  ;;  %v11882_v57 = vsel %vm1043_vm1, %v3993_v21, %v3994_v41  ;;  %v3998_v15 = vrot.slane %v11526_v35, 2  ;;  %v6403_v21 = vld [vmem:[%s12505_s3 + $0x208] sm:$0xff]  ;;  %v4004_v41 = vrot.slane %v11547_v14, 2 }
 0x3bd   : > { %9196 = vmatprep.subr.bf16.mxu1 %v9195_v51  ;;  %12798 = vst [vmem:[#allocation38_spill] sm:$0xff] %v11882_v57  ;;  %v11904_v58 = vpack.c.bf16 %v6403_v21, %v6402_v53  ;;  %v4014_v53 = vrot.slane %v11585_v6, 2  ;;  %v4016_v21 = vrot.slane %v11579_v17, 2 }
 0x3bf   : > { %8279 = vmatmul.mubr.f32.gmra.mrb[10].mxu1 %v11871_v37 }
 0x3c0   : > { %8281 = vmatprep.mubr.f32.mxu1 %v11882_v57  ;;  %9198 = vmatpush3.bf16.msra.mxu1 %v9195_v51  ;;  %v11899_v57 = vsel %vm1043_vm1, %v3998_v15, %v3999_v8  ;;  %v4003_v51 = vrot.slane %v11545_v49, 2  ;;  %v4008_v15 = vrot.slane %v11564_v61, 2  ;;  %v4011_v8 = vrot.slane %v11560_v24, 2 }
 0x3c1   : > { %9200 = vmatprep.subr.bf16.mxu1 %v9199_v13  ;;  %v11935_v24 = vsel %vm1043_vm1, %v4013_v26, %v4014_v53 }
 0x3c2   : > { %v11912_v32 = vsel %vm1043_vm1, %v4003_v51, %v4004_v41  ;;  %12800 = vst [vmem:[#allocation40_spill] sm:$0xff] %v11935_v24  ;;  %v4018_v51 = vrot.slane %v11602_v55, 2 }
 0x3c3   : > { %8282 = vmatmul.mubr.f32.gmra.mrb[12].mxu1 %v11888_v54  ;;  %v4009_v54 = vrot.slane %v11566_v62, 2 }
 0x3c4   : > { %8284 = vmatprep.mubr.f32.mxu1 %v11899_v57  ;;  %9202 = vmatpush3.bf16.msra.mxu1 %v9199_v13  ;;  %v11919_v13 = vsel %vm1043_vm1, %v4004_v41, %v4006_v0  ;;  %v4019_v41 = vrot.slane %v11604_v46, 2  ;;  %v11941_v0 = vsel %vm1043_vm1, %v4014_v53, %v4016_v21  ;;  %v4028_v53 = vrot.slane %v11640_v48, 2 }
 0x3c5   : > { %9204 = vmatprep.subr.bf16.mxu1 %v9203_v44  ;;  %v11924_v23 = vsel %vm1043_vm1, %v4008_v15, %v4009_v54  ;;  %v4021_v15 = vrot.slane %v11598_v7, 2  ;;  %v4029_v21 = vrot.slane %v11642_v5, 2 }
 0x3c6   : > { %v11946_v17 = vsel %vm1043_vm1, %v4018_v51, %v4019_v41 }
 0x3c7   : > { %8285 = vmatmul.mubr.f32.gmra.mrb[14].mxu1 %v11907_v47  ;;  %12801 = vst [vmem:[#allocation41_spill] sm:$0xff] %v11946_v17  ;;  %v11952_v26 = vsel %vm1043_vm1, %v4019_v41, %v4021_v15  ;;  %v4033_v41 = vrot.slane %v11658_v63, 2  ;;  %v4034_v15 = vrot.slane %v11660_v1, 2 }
 0x3c8   : > { %8287 = vmatprep.mubr.f32.mxu1 %v11912_v32  ;;  %9206 = vmatpush3.bf16.msra.mxu1 %v9203_v44  ;;  %v11930_v44 = vsel %vm1043_vm1, %v4009_v54, %v4011_v8  ;;  %v4023_v54 = vrot.slane %v11621_v38, 2  ;;  %v4024_v8 = vrot.slane %v11623_v59, 2 }
 0x3c9   : > { %9208 = vmatprep.subr.bf16.mxu1 %v11904_v58 }
 0x3ca   : > { %v11957_v7 = vsel %vm1043_vm1, %v4023_v54, %v4024_v8 }
 0x3cb   : > { %8288 = vmatmul.mubr.f32.gmra.mrb[16].mxu1 %v11919_v13  ;;  %12802 = vst [vmem:[#allocation42_spill] sm:$0xff] %v11957_v7 }
 0x3cc   : > { %8290 = vmatprep.mubr.f32.mxu1 %v11924_v23 }
 0x3cf   : > { %8291 = vmatmul.mubr.f32.gmra.mrb[18].mxu1 %v11930_v44 }
 0x3d0   : > { %8293 = vmatprep.mubr.f32.mxu1 %v11935_v24  ;;  %v4026_v24 = vrot.slane %v11617_v20, 2  ;;  %v11968_v20 = vsel %vm1043_vm1, %v4028_v53, %v4029_v21 }
 0x3d1   : > { %12804 = vst [vmem:[#allocation44_spill] sm:$0xff] %v11968_v20 }
 0x3d2   : > { %v11963_v51 = vsel %vm1043_vm1, %v4024_v8, %v4026_v24  ;;  %v4038_v24 = vrot.slane %v11675_v18, 2  ;;  %v4039_v8 = vrot.slane %v11677_v27, 2 }
 0x3d3   : > { %8294 = vmatmul.mubr.f32.gmra.mrb[20].mxu1 %v11941_v0  ;;  %12803 = vst [vmem:[#allocation43_spill] sm:$0xff] %v11963_v51 }
 0x3d4   : > { %8296 = vmatprep.mubr.f32.mxu1 %v11946_v17  ;;  %v4031_v17 = vrot.slane %v11636_v60, 2  ;;  %v11979_v60 = vsel %vm1043_vm1, %v4033_v41, %v4034_v15  ;;  %v6406_v41 = vld [vmem:[%s12505_s3 + $0x220] sm:$0xff] }
 0x3d5   : > { %12806 = vst [vmem:[#allocation46_spill] sm:$0xff] %v11979_v60 }
 0x3d6   : > { %v11974_v54 = vsel %vm1043_vm1, %v4029_v21, %v4031_v17  ;;  %v6404_v21 = vld [vmem:[%s12505_s3 + $0x210] sm:$0xff] }
 0x3d7   : > { %8297 = vmatmul.mubr.f32.gmra.mrb[22].mxu1 %v11952_v26  ;;  %12805 = vst [vmem:[#allocation45_spill] sm:$0xff] %v11974_v54 }
 0x3d8   : > { %8299 = vmatprep.mubr.f32.mxu1 %v11957_v7  ;;  %v4036_v7 = vrot.slane %v11655_v22, 2  ;;  %v11990_v22 = vsel %vm1043_vm1, %v4038_v24, %v4039_v8  ;;  %v6409_v24 = vld [vmem:[%s12505_s3 + $0x238] sm:$0xff] }
 0x3d9   : > { %12808 = vst [vmem:[#allocation5_spill] sm:$0xff] %v11990_v22 }
 0x3da   : > { %v11985_v53 = vsel %vm1043_vm1, %v4034_v15, %v4036_v7  ;;  %v6405_v7 = vld [vmem:[%s12505_s3 + $0x218] sm:$0xff] }
 0x3db   : > { %8300 = vmatmul.mubr.f32.gmra.mrb[24].mxu1 %v11963_v51  ;;  %12807 = vst [vmem:[#allocation4_spill] sm:$0xff] %v11985_v53 }
 0x3dc   : > { %8302 = vmatprep.mubr.f32.mxu1 %v11968_v20  ;;  %v4041_v20 = vrot.slane %v11672_v56, 2  ;;  %v9211_v56 = vpack.c.bf16 %v6405_v7, %v6404_v21  ;;  %v6415_v21 = vld [vmem:[%s12505_s3 + $0x268] sm:$0xff]  ;;  %v6417_v7 = vld [vmem:[%s12505_s3 + $0x278] sm:$0xff] }
 0x3de   : > { %v11994_v17 = vsel %vm1043_vm1, %v4039_v8, %v4041_v20  ;;  %v6407_v20 = vld [vmem:[%s12505_s3 + $0x228] sm:$0xff]  ;;  %v6413_v8 = vld [vmem:[%s12505_s3 + $0x258] sm:$0xff] }
 0x3df   : > { %8303 = vmatmul.mubr.f32.gmra.mrb[26].mxu1 %v11974_v54  ;;  %12809 = vst [vmem:[#allocation30_spill] sm:$0xff] %v11994_v17  ;;  %v9215_v15 = vpack.c.bf16 %v6407_v20, %v6406_v41  ;;  %v12814_v41 = vld [vmem:[#allocation10_spill] sm:$0xff] }
 0x3e0   : > { %8305 = vmatprep.mubr.f32.mxu1 %v11979_v60 }
 0x3e3   : > { %8306 = vmatmul.mubr.f32.gmra.mrb[28].mxu1 %v11985_v53 }
 0x3e4   : > { %8308 = vmatprep.mubr.f32.mxu1 %v11990_v22 }
 0x3e7   : > { %8309 = vmatmul.mubr.f32.gmra.mrb[30].mxu1 %v11994_v17 }
 0x3e8   : > { %8343 = vmatprep.mubr.f32.mxu1 %v11413_v40  ;;  %v6408_v40 = vld [vmem:[%s12505_s3 + $0x230] sm:$0xff] }
 0x3eb   : > { %8344 = vmatmul.mubr.f32.vlgmr.msra.gmra.mrb[0].mxu1 %v11415_v42  ;;  %v9219_v42 = vpack.c.bf16 %v6409_v24, %v6408_v40  ;;  %v6431_v40 = vld [vmem:[%s12505_s3 + $0x2e8] sm:$0xff]  ;;  %v12815_v24 = vld [vmem:[#allocation11_spill] sm:$0xff] }
 0x3ec   : > { %8346 = vmatprep.mubr.f32.mxu1 %v11431_v52  ;;  %9210 = vmatpush3.bf16.msra.mxu1 %v11904_v58  ;;  %v6410_v52 = vld [vmem:[%s12505_s3 + $0x240] sm:$0xff]  ;;  %v6411_v58 = vld [vmem:[%s12505_s3 + $0x248] sm:$0xff] }
 0x3ed   : > { %9212 = vmatprep.subr.bf16.mxu1 %v9211_v56 }
 0x3ef   : > { %8347 = vmatmul.mubr.f32.gmra.mrb[2].mxu1 %v11433_v45  ;;  %v9223_v45 = vpack.c.bf16 %v6411_v58, %v6410_v52  ;;  %v6432_v58 = vld [vmem:[%s12505_s3 + $0x2f0] sm:$0xff] }
 0x3f0   : > { %8349 = vmatprep.mubr.f32.mxu1 %v11450_v39  ;;  %9214 = vmatpush3.bf16.msra.mxu1 %v9211_v56  ;;  %v6412_v39 = vld [vmem:[%s12505_s3 + $0x250] sm:$0xff]  ;;  %v6419_v56 = vld [vmem:[%s12505_s3 + $0x288] sm:$0xff] }
 0x3f1   : > { %9216 = vmatprep.subr.bf16.mxu1 %v9215_v15 }
 0x3f3   : > { %8350 = vmatmul.mubr.f32.gmra.mrb[4].mxu1 %v11452_v2  ;;  %v9227_v2 = vpack.c.bf16 %v6413_v8, %v6412_v39  ;;  %v12817_v39 = vld [vmem:[#allocation13_spill] sm:$0xff]  ;;  %v12818_v8 = vld [vmem:[#allocation14_spill] sm:$0xff] }
 0x3f4   : > { %8352 = vmatprep.mubr.f32.mxu1 %v11469_v4  ;;  %9218 = vmatpush3.bf16.msra.mxu1 %v9215_v15  ;;  %v6414_v4 = vld [vmem:[%s12505_s3 + $0x260] sm:$0xff] }
 0x3f5   : > { %9220 = vmatprep.subr.bf16.mxu1 %v9219_v42  ;;  %v6430_v15 = vld [vmem:[%s12505_s3 + $0x2e0] sm:$0xff] }
 0x3f6   : > { %v9263_v52 = vpack.c.bf16 %v6431_v40, %v6430_v15 }
 0x3f7   : > { %8353 = vmatmul.mubr.f32.gmra.mrb[6].mxu1 %v11471_v16  ;;  %v9231_v16 = vpack.c.bf16 %v6415_v21, %v6414_v4  ;;  %v6434_v4 = vld [vmem:[%s12505_s3 + $0x300] sm:$0xff]  ;;  %v6435_v21 = vld [vmem:[%s12505_s3 + $0x308] sm:$0xff] }
 0x3f8   : > { %8355 = vmatprep.mubr.f32.mxu1 %v11488_v12  ;;  %9222 = vmatpush3.bf16.msra.mxu1 %v9219_v42  ;;  %v6416_v12 = vld [vmem:[%s12505_s3 + $0x270] sm:$0xff]  ;;  %v12816_v42 = vld [vmem:[#allocation12_spill] sm:$0xff] }
 0x3f9   : > { %9224 = vmatprep.subr.bf16.mxu1 %v9223_v45 }
 0x3fb   : > { %8356 = vmatmul.mubr.f32.gmra.mrb[8].mxu1 %v11490_v34  ;;  %v9235_v34 = vpack.c.bf16 %v6417_v7, %v6416_v12  ;;  %v12820_v12 = vld [vmem:[#allocation16_spill] sm:$0xff]  ;;  %v9271_v7 = vpack.c.bf16 %v6435_v21, %v6434_v4  ;;  %v6439_v4 = vld [vmem:[%s12505_s3 + $0x328] sm:$0xff] }
 0x3fc   : > { %8358 = vmatprep.mubr.f32.mxu1 %v11507_v9  ;;  %9226 = vmatpush3.bf16.msra.mxu1 %v9223_v45  ;;  %v6418_v9 = vld [vmem:[%s12505_s3 + $0x280] sm:$0xff]  ;;  %v6433_v45 = vld [vmem:[%s12505_s3 + $0x2f8] sm:$0xff] }
 0x3fd   : > { %9228 = vmatprep.subr.bf16.mxu1 %v9227_v2 }
 0x3ff   : > { %8359 = vmatmul.mubr.f32.gmra.mrb[10].mxu1 %v11509_v43  ;;  %v9239_v43 = vpack.c.bf16 %v6419_v56, %v6418_v9  ;;  %v12822_v9 = vld [vmem:[#allocation18_spill] sm:$0xff]  ;;  %v12823_v56 = vld [vmem:[#allocation19_spill] sm:$0xff] }
 0x400   : > { %8361 = vmatprep.mubr.f32.mxu1 %v11526_v35  ;;  %9230 = vmatpush3.bf16.msra.mxu1 %v9227_v2  ;;  %v12076_v35 = vld [vmem:[#allocation3 + $0x180] sm:$0xff]  ;;  %v9267_v2 = vpack.c.bf16 %v6433_v45, %v6432_v58  ;;  %v6437_v58 = vld [vmem:[%s12505_s3 + $0x318] sm:$0xff] }
 0x401   : > { %9232 = vmatprep.subr.bf16.mxu1 %v9231_v16 }
 0x403   : > { %8362 = vmatmul.mubr.f32.gmra.mrb[12].mxu1 %v11528_v25  ;;  %v12079_v25 = vld [vmem:[#allocation3 + $0x188] sm:$0xff] }
 0x404   : > { %8364 = vmatprep.mubr.f32.mxu1 %v11545_v49  ;;  %9234 = vmatpush3.bf16.msra.mxu1 %v9231_v16  ;;  %v12819_v16 = vld [vmem:[#allocation15_spill] sm:$0xff] }
 0x405   : > { %9236 = vmatprep.subr.bf16.mxu1 %v9235_v34 }
 0x407   : > { %8365 = vmatmul.mubr.f32.gmra.mrb[14].mxu1 %v11547_v14  ;;  %v6422_v14 = vld [vmem:[%s12505_s3 + $0x2a0] sm:$0xff] }
 0x408   : > { %8367 = vmatprep.mubr.f32.mxu1 %v11564_v61  ;;  %9238 = vmatpush3.bf16.msra.mxu1 %v9235_v34  ;;  %v12821_v34 = vld [vmem:[#allocation17_spill] sm:$0xff] }
 0x409   : > { %9240 = vmatprep.subr.bf16.mxu1 %v9239_v43 }
 0x40b   : > { %8368 = vmatmul.mubr.f32.gmra.mrb[16].mxu1 %v11566_v62  ;;  %v6425_v62 = vld [vmem:[%s12505_s3 + $0x2b8] sm:$0xff] }
 0x40c   : > { %8370 = vmatprep.mubr.f32.mxu1 %v11583_v28  ;;  %v6427_v28 = vld [vmem:[%s12505_s3 + $0x2c8] sm:$0xff] }
 0x40f   : > { %8371 = vmatmul.mubr.f32.gmra.mrb[18].mxu1 %v11585_v6  ;;  %v12811_v6 = vld [vmem:[#allocation7_spill] sm:$0xff] }
 0x410   : > { %8373 = vmatprep.mubr.f32.mxu1 %v11602_v55  ;;  %v6426_v55 = vld [vmem:[%s12505_s3 + $0x2c0] sm:$0xff] }
 0x413   : > { %8374 = vmatmul.mubr.f32.gmra.mrb[20].mxu1 %v11604_v46  ;;  %v12810_v46 = vld [vmem:[#allocation6_spill] sm:$0xff] }
 0x414   : > { %8376 = vmatprep.mubr.f32.mxu1 %v11621_v38  ;;  %v12812_v38 = vld [vmem:[#allocation8_spill] sm:$0xff] }
 0x417   : > { %8377 = vmatmul.mubr.f32.gmra.mrb[22].mxu1 %v11623_v59  ;;  %v6420_v59 = vld [vmem:[%s12505_s3 + $0x290] sm:$0xff] }
 0x418   : > { %8379 = vmatprep.mubr.f32.mxu1 %v11640_v48  ;;  %v6423_v48 = vld [vmem:[%s12505_s3 + $0x2a8] sm:$0xff] }
 0x419   : > { %v9247_v61 = vpack.c.bf16 %v6423_v48, %v6422_v14  ;;  %v12828_v14 = vld [vmem:[#allocation24_spill] sm:$0xff]  ;;  %v12829_v48 = vld [vmem:[#allocation25_spill] sm:$0xff] }
 0x41b   : > { %8380 = vmatmul.mubr.f32.gmra.mrb[24].mxu1 %v11642_v5  ;;  %v6421_v5 = vld [vmem:[%s12505_s3 + $0x298] sm:$0xff] }
 0x41c   : > { %8382 = vmatprep.mubr.f32.mxu1 %v11658_v63  ;;  %v9243_v49 = vpack.c.bf16 %v6421_v5, %v6420_v59  ;;  %v6428_v63 = vld [vmem:[%s12505_s3 + $0x2d0] sm:$0xff]  ;;  %v12825_v59 = vld [vmem:[#allocation21_spill] sm:$0xff] }
 0x41d   : > { %v12826_v5 = vld [vmem:[#allocation22_spill] sm:$0xff] }
 0x41f   : > { %8383 = vmatmul.mubr.f32.gmra.mrb[26].mxu1 %v11660_v1  ;;  %v6429_v1 = vld [vmem:[%s12505_s3 + $0x2d8] sm:$0xff] }
 0x420   : > { %8385 = vmatprep.mubr.f32.mxu1 %v11675_v18  ;;  %v12813_v18 = vld [vmem:[#allocation9_spill] sm:$0xff]  ;;  %v9259_v20 = vpack.c.bf16 %v6429_v1, %v6428_v63  ;;  %v12834_v63 = vld [vmem:[#allocation31_spill] sm:$0xff] }
 0x423   : > { %8386 = vmatmul.mubr.f32.gmra.mrb[28].mxu1 %v11677_v27  ;;  %v9255_v27 = vpack.c.bf16 %v6427_v28, %v6426_v55  ;;  %v4626_v55 = vrot.slane %v12076_v35, 1  ;;  %v4627_v28 = vrot.slane %v12079_v25, 1 }
 0x424   : > { %8388 = vmatprep.mubr.f32.mxu1 %v12076_v35 }
 0x425   : > { %v12166_v15 = vsel %vm463_vm0, %v4626_v55, %v4627_v28  ;;  %v6441_v55 = vld [vmem:[%s12505_s3 + $0x338] sm:$0xff] }
 0x427   : > { %8389 = vmatmul.mubr.f32.gmra.mrb[30].mxu1 %v12079_v25 }
 0x428   : > { %8423 = vmatprep.mubr.f32.mxu1 %v11422_v10  ;;  %v6424_v10 = vld [vmem:[%s12505_s3 + $0x2b0] sm:$0xff] }
 0x42b   : > { %8424 = vmatmul.mubr.f32.vlgmr.msra.gmra.mrb[0].mxu1 %v11425_v36  ;;  %v9251_v36 = vpack.c.bf16 %v6425_v62, %v6424_v10  ;;  %v12831_v10 = vld [vmem:[#allocation27_spill] sm:$0xff]  ;;  %v12832_v62 = vld [vmem:[#allocation28_spill] sm:$0xff] }
 0x42c   : > { %8426 = vmatprep.mubr.f32.mxu1 %v11441_v3  ;;  %9242 = vmatpush3.bf16.msra.mxu1 %v9239_v43  ;;  %v12824_v43 = vld [vmem:[#allocation20_spill] sm:$0xff] }
 0x42d   : > { %9244 = vmatprep.subr.bf16.mxu1 %v9243_v49 }
 0x42f   : > { %8427 = vmatmul.mubr.f32.gmra.mrb[2].mxu1 %v11444_v11 }
 0x430   : > { %8429 = vmatprep.mubr.f32.mxu1 %v12810_v46  ;;  %9246 = vmatpush3.bf16.msra.mxu1 %v9243_v49  ;;  %v12827_v49 = vld [vmem:[#allocation23_spill] sm:$0xff] }
 0x431   : > { %9248 = vmatprep.subr.bf16.mxu1 %v9247_v61 }
 0x433   : > { %8430 = vmatmul.mubr.f32.gmra.mrb[4].mxu1 %v12811_v6 }
 0x434   : > { %8432 = vmatprep.mubr.f32.mxu1 %v12812_v38  ;;  %9250 = vmatpush3.bf16.msra.mxu1 %v9247_v61  ;;  %v12830_v61 = vld [vmem:[#allocation26_spill] sm:$0xff] }
 0x435   : > { %9252 = vmatprep.subr.bf16.mxu1 %v9251_v36 }
 0x437   : > { %8433 = vmatmul.mubr.f32.gmra.mrb[6].mxu1 %v12813_v18 }
 0x438   : > { %8435 = vmatprep.mubr.f32.mxu1 %v12814_v41  ;;  %9254 = vmatpush3.bf16.msra.mxu1 %v9251_v36  ;;  %v12833_v36 = vld [vmem:[#allocation29_spill] sm:$0xff] }
 0x439   : > { %9256 = vmatprep.subr.bf16.mxu1 %v9255_v27 }
 0x43b   : > { %8436 = vmatmul.mubr.f32.gmra.mrb[8].mxu1 %v12815_v24 }
 0x43c   : > { %8438 = vmatprep.mubr.f32.mxu1 %v12816_v42  ;;  %9258 = vmatpush3.bf16.msra.mxu1 %v9255_v27  ;;  %v12160_v27 = vld [vmem:[#allocation3 + $0x190] sm:$0x3] }
 0x43d   : > { %9260 = vmatprep.subr.bf16.mxu1 %v9259_v20  ;;  %v4629_v1 = vrot.slane %v12160_v27, 1 }
 0x43f   : > { %8439 = vmatmul.mubr.f32.gmra.mrb[10].mxu1 %v12817_v39  ;;  %v12170_v40 = vsel %vm463_vm0, %v4627_v28, %v4629_v1  ;;  %v12836_v28 = vld [vmem:[#allocation36_spill] sm:$0xff]  ;;  %v6443_v1 = vld [vmem:[%s12505_s3 + $0x348] sm:$0xff] }
 0x440   : > { %8441 = vmatprep.mubr.f32.mxu1 %v12818_v8  ;;  %9262 = vmatpush3.bf16.msra.mxu1 %v9259_v20  ;;  %v12835_v20 = vld [vmem:[#allocation32_spill] sm:$0xff] }
 0x441   : > { %9264 = vmatprep.subr.bf16.mxu1 %v9263_v52 }
 0x443   : > { %8442 = vmatmul.mubr.f32.gmra.mrb[12].mxu1 %v12819_v16 }
 0x444   : > { %8444 = vmatprep.mubr.f32.mxu1 %v12820_v12  ;;  %9266 = vmatpush3.bf16.msra.mxu1 %v9263_v52  ;;  %v6436_v52 = vld [vmem:[%s12505_s3 + $0x310] sm:$0xff] }
 0x445   : > { %9268 = vmatprep.subr.bf16.mxu1 %v9267_v2  ;;  %v9275_v45 = vpack.c.bf16 %v6437_v58, %v6436_v52  ;;  %v12837_v52 = vld [vmem:[#allocation37_spill] sm:$0xff] }
 0x447   : > { %8445 = vmatmul.mubr.f32.gmra.mrb[14].mxu1 %v12821_v34 }
 0x448   : > { %8447 = vmatprep.mubr.f32.mxu1 %v12822_v9  ;;  %9270 = vmatpush3.bf16.msra.mxu1 %v9267_v2  ;;  %v6438_v2 = vld [vmem:[%s12505_s3 + $0x320] sm:$0xff] }
 0x449   : > { %9272 = vmatprep.subr.bf16.mxu1 %v9271_v7  ;;  %v9279_v21 = vpack.c.bf16 %v6439_v4, %v6438_v2  ;;  %v6445_v2 = vld [vmem:[%s12505_s3 + $0x358] sm:$0xff]  ;;  %v12838_v4 = vld [vmem:[#allocation34_spill] sm:$0xff] }
 0x44b   : > { %8448 = vmatmul.mubr.f32.gmra.mrb[16].mxu1 %v12823_v56 }
 0x44c   : > { %8450 = vmatprep.mubr.f32.mxu1 %v12824_v43 }
 0x44f   : > { %8451 = vmatmul.mubr.f32.gmra.mrb[18].mxu1 %v12825_v59 }
 0x450   : > { %8453 = vmatprep.mubr.f32.mxu1 %v12826_v5 }
 0x453   : > { %8454 = vmatmul.mubr.f32.gmra.mrb[20].mxu1 %v12827_v49 }
 0x454   : > { %8456 = vmatprep.mubr.f32.mxu1 %v12828_v14 }
 0x457   : > { %8457 = vmatmul.mubr.f32.gmra.mrb[22].mxu1 %v12829_v48 }
 0x458   : > { %8459 = vmatprep.mubr.f32.mxu1 %v12830_v61 }
 0x45b   : > { %8460 = vmatmul.mubr.f32.gmra.mrb[24].mxu1 %v12831_v10 }
 0x45c   : > { %8462 = vmatprep.mubr.f32.mxu1 %v12832_v62 }
 0x45f   : > { %8463 = vmatmul.mubr.f32.gmra.mrb[26].mxu1 %v12833_v36 }
 0x460   : > { %8465 = vmatprep.mubr.f32.mxu1 %v12834_v63 }
 0x463   : > { %8466 = vmatmul.mubr.f32.gmra.mrb[28].mxu1 %v12835_v20 }
 0x464   : > { %8468 = vmatprep.mubr.f32.mxu1 %v12166_v15 }
 0x467   : > { %8469 = vmatmul.mubr.f32.gmra.mrb[30].mxu1 %v12170_v40 }
 0x468   : > { %8503 = vmatprep.mubr.f32.mxu1 %v11797_v33  ;;  %v6440_v33 = vld [vmem:[%s12505_s3 + $0x330] sm:$0xff] }
 0x46b   : > { %8504 = vmatmul.mubr.f32.vlgmr.msra.gmra.mrb[0].mxu1 %v11803_v29  ;;  %v9283_v29 = vpack.c.bf16 %v6441_v55, %v6440_v33  ;;  %v6447_v55 = vld [vmem:[%s12505_s3 + $0x368] sm:$0xff] }
 0x46c   : > { %8506 = vmatprep.mubr.f32.mxu1 %v11814_v19  ;;  %9274 = vmatpush3.bf16.msra.mxu1 %v9271_v7  ;;  %v6442_v7 = vld [vmem:[%s12505_s3 + $0x340] sm:$0xff] }
 0x46d   : > { %9276 = vmatprep.subr.bf16.mxu1 %v9275_v45  ;;  %v9287_v58 = vpack.c.bf16 %v6443_v1, %v6442_v7  ;;  %v12839_v7 = vld [vmem:[#allocation38_spill] sm:$0xff] }
 0x46f   : > { %8507 = vmatmul.mubr.f32.gmra.mrb[2].mxu1 %v11820_v50 }
 0x470   : > { %8509 = vmatprep.mubr.f32.mxu1 %v12836_v28  ;;  %9278 = vmatpush3.bf16.msra.mxu1 %v9275_v45  ;;  %v6444_v45 = vld [vmem:[%s12505_s3 + $0x350] sm:$0xff] }
 0x471   : > { %9280 = vmatprep.subr.bf16.mxu1 %v9279_v21  ;;  %v9291_v33 = vpack.c.bf16 %v6445_v2, %v6444_v45  ;;  %v6449_v45 = vld [vmem:[%s12505_s3 + $0x378] sm:$0xff] }
 0x472   : > { %v12840_v2 = vld [vmem:[#allocation39_spill] sm:$0xff] }
 0x473   : > { %8510 = vmatmul.mubr.f32.gmra.mrb[4].mxu1 %v11837_v31 }
 0x474   : > { %8512 = vmatprep.mubr.f32.mxu1 %v12837_v52  ;;  %9282 = vmatpush3.bf16.msra.mxu1 %v9279_v21  ;;  %v6446_v21 = vld [vmem:[%s12505_s3 + $0x360] sm:$0xff] }
 0x475   : > { %9284 = vmatprep.subr.bf16.mxu1 %v9283_v29  ;;  %v9295_v1 = vpack.c.bf16 %v6447_v55, %v6446_v21  ;;  %v6451_v21 = vld [vmem:[%s12505_s3 + $0x388] sm:$0xff] }
 0x477   : > { %8513 = vmatmul.mubr.f32.gmra.mrb[6].mxu1 %v11854_v30 }
 0x478   : > { %8515 = vmatprep.mubr.f32.mxu1 %v12838_v4  ;;  %9286 = vmatpush3.bf16.msra.mxu1 %v9283_v29  ;;  %v6448_v29 = vld [vmem:[%s12505_s3 + $0x370] sm:$0xff] }
 0x479   : > { %9288 = vmatprep.subr.bf16.mxu1 %v9287_v58 }
 0x47b   : > { %8516 = vmatmul.mubr.f32.gmra.mrb[8].mxu1 %v11871_v37  ;;  %v9299_v37 = vpack.c.bf16 %v6449_v45, %v6448_v29  ;;  %v12842_v29 = vld [vmem:[#allocation41_spill] sm:$0xff]  ;;  %v12843_v45 = vld [vmem:[#allocation42_spill] sm:$0xff] }
 0x47c   : > { %8518 = vmatprep.mubr.f32.mxu1 %v12839_v7  ;;  %9290 = vmatpush3.bf16.msra.mxu1 %v9287_v58  ;;  %v6450_v58 = vld [vmem:[%s12505_s3 + $0x380] sm:$0xff] }
 0x47d   : > { %9292 = vmatprep.subr.bf16.mxu1 %v9291_v33  ;;  %v9303_v55 = vpack.c.bf16 %v6451_v21, %v6450_v58  ;;  %v4908_v58 = vrot.slane %v12079_v25, 2  ;;  %v4910_v21 = vrot.slane %v12160_v27, 2  ;;  %v9918_v27 = vld [vmem:[#allocation3 + $0x30] sm:$0xff] }
 0x47f   : > { %8519 = vmatmul.mubr.f32.gmra.mrb[10].mxu1 %v12840_v2 }
 0x480   : > { %8521 = vmatprep.mubr.f32.mxu1 %v11899_v57  ;;  %9294 = vmatpush3.bf16.msra.mxu1 %v9291_v33  ;;  %v12841_v33 = vld [vmem:[#allocation40_spill] sm:$0xff] }
 0x481   : > { %9296 = vmatprep.subr.bf16.mxu1 %v9295_v1 }
 0x483   : > { %8522 = vmatmul.mubr.f32.gmra.mrb[12].mxu1 %v11907_v47 }
 0x484   : > { %8524 = vmatprep.mubr.f32.mxu1 %v11912_v32  ;;  %9298 = vmatpush3.bf16.msra.mxu1 %v9295_v1  ;;  %v12844_v1 = vld [vmem:[#allocation44_spill] sm:$0xff] }
 0x485   : > { %9300 = vmatprep.subr.bf16.mxu1 %v9299_v37 }
 0x487   : > { %8525 = vmatmul.mubr.f32.gmra.mrb[14].mxu1 %v11919_v13 }
 0x488   : > { %8527 = vmatprep.mubr.f32.mxu1 %v11924_v23  ;;  %9302 = vmatpush3.bf16.msra.mxu1 %v9299_v37  ;;  %v4907_v37 = vrot.slane %v12076_v35, 2 }
 0x489   : > { %9304 = vmatprep.subr.bf16.mxu1 %v9303_v55 }
 0x48b   : > { %8528 = vmatmul.mubr.f32.gmra.mrb[16].mxu1 %v11930_v44 }
 0x48c   : > { %8530 = vmatprep.mubr.f32.mxu1 %v12841_v33 }
 0x48f   : > { %8531 = vmatmul.mubr.f32.gmra.mrb[18].mxu1 %v11941_v0 }
 0x490   : > { %8533 = vmatprep.mubr.f32.mxu1 %v12842_v29 }
 0x493   : > { %8534 = vmatmul.mubr.f32.gmra.mrb[20].mxu1 %v11952_v26 }
 0x494   : > { %8536 = vmatprep.mubr.f32.mxu1 %v12843_v45  ;;  %v9938_v45 = vld [vmem:[#allocation3 + $0x120] sm:$0xff] }
 0x497   : > { %8537 = vmatmul.mubr.f32.gmra.mrb[22].mxu1 %v11963_v51  ;;  %v12255_v51 = vsel %vm1043_vm1, %v4907_v37, %v4908_v58  ;;  %v6454_v37 = vld [vmem:[%s12505_s3 + $0x3a0] sm:$0xff] }
 0x498   : > { %8539 = vmatprep.mubr.f32.mxu1 %v12844_v1  ;;  %12845 = vst [vmem:[#allocation6_spill] sm:$0xff] %v12255_v51  ;;  %v9933_v1 = vld [vmem:[#allocation3 + $0xe0] sm:$0xff] }
 0x49b   : > { %8540 = vmatmul.mubr.f32.gmra.mrb[24].mxu1 %v11974_v54  ;;  %v12259_v54 = vsel %vm1043_vm1, %v4908_v58, %v4910_v21  ;;  %v6455_v58 = vld [vmem:[%s12505_s3 + $0x3a8] sm:$0xff] }
 0x49c   : > { %8542 = vmatprep.mubr.f32.mxu1 %v11979_v60  ;;  %12846 = vst [vmem:[#allocation7_spill] sm:$0xff] %v12259_v54  ;;  %v9919_v21 = vld [vmem:[#allocation3 + $0x38] sm:$0xff]  ;;  %v9311_v60 = vpack.c.bf16 %v6455_v58, %v6454_v37  ;;  %v9923_v37 = vld [vmem:[#allocation3 + $0x68] sm:$0xff] }
 0x49d   : > { %v9924_v58 = vld [vmem:[#allocation3 + $0x78] sm:$0xff] }
 0x49f   : > { %8543 = vmatmul.mubr.f32.gmra.mrb[26].mxu1 %v11985_v53  ;;  %v6452_v53 = vld [vmem:[%s12505_s3 + $0x390] sm:$0xff] }
 0x4a0   : > { %8545 = vmatprep.mubr.f32.mxu1 %v11990_v22  ;;  %v6453_v22 = vld [vmem:[%s12505_s3 + $0x398] sm:$0xff] }
 0x4a3   : > { %8546 = vmatmul.mubr.f32.gmra.mrb[28].mxu1 %v11994_v17  ;;  %v9307_v17 = vpack.c.bf16 %v6453_v22, %v6452_v53  ;;  %v6457_v53 = vld [vmem:[%s12505_s3 + $0x3b8] sm:$0xff]  ;;  %v9921_v22 = vld [vmem:[#allocation3 + $0x50] sm:$0xff] }
 0x4a4   : > { %8548 = vmatprep.mubr.f32.mxu1 %v12255_v51  ;;  %v9920_v51 = vld [vmem:[#allocation3 + $0x48] sm:$0xff] }
 0x4a7   : > { %8549 = vmatmul.mubr.f32.gmra.mrb[30].mxu1 %v12259_v54  ;;  %v9922_v54 = vld [vmem:[#allocation3 + $0x60] sm:$0xff] }
 0x4a8   : > { %8583 = vmatprep.mubr.f32.mxu1 %v9918_v27  ;;  %v6456_v27 = vld [vmem:[%s12505_s3 + $0x3b0] sm:$0xff] }
 0x4ab   : > { %8584 = vmatmul.mubr.f32.vlgmr.msra.gmra.mrb[0].mxu1 %v9919_v21  ;;  %v9315_v21 = vpack.c.bf16 %v6457_v53, %v6456_v27  ;;  %v9925_v27 = vld [vmem:[#allocation3 + $0x80] sm:$0xff]  ;;  %v9926_v53 = vld [vmem:[#allocation3 + $0x90] sm:$0xff] }
 0x4ac   : > { %8586 = vmatprep.mubr.f32.mxu1 %v9920_v51  ;;  %9306 = vmatpush3.bf16.msra.mxu1 %v9303_v55  ;;  %v6458_v51 = vld [vmem:[%s12505_s3 + $0x3c0] sm:$0xff]  ;;  %v6459_v55 = vld [vmem:[%s12505_s3 + $0x3c8] sm:$0xff] }
 0x4ad   : > { %9308 = vmatprep.subr.bf16.mxu1 %v9307_v17 }
 0x4af   : > { %8587 = vmatmul.mubr.f32.gmra.mrb[2].mxu1 %v9921_v22  ;;  %v9319_v22 = vpack.c.bf16 %v6459_v55, %v6458_v51  ;;  %v6463_v51 = vld [vmem:[%s12505_s3 + $0x3e8] sm:$0xff] }
 0x4b0   : > { %8589 = vmatprep.mubr.f32.mxu1 %v9922_v54  ;;  %9310 = vmatpush3.bf16.msra.mxu1 %v9307_v17  ;;  %v6460_v54 = vld [vmem:[%s12505_s3 + $0x3d0] sm:$0xff]  ;;  %v6461_v17 = vld [vmem:[%s12505_s3 + $0x3d8] sm:$0xff]  ;;  %v9927_v55 = vld [vmem:[#allocation3 + $0x98] sm:$0xff] }
 0x4b1   : > { %9312 = vmatprep.subr.bf16.mxu1 %v9311_v60 }
 0x4b3   : > { %8590 = vmatmul.mubr.f32.gmra.mrb[4].mxu1 %v9923_v37  ;;  %v9323_v37 = vpack.c.bf16 %v6461_v17, %v6460_v54  ;;  %v6465_v54 = vld [vmem:[%s12505_s3 + $0x3f8] sm:$0xff]  ;;  %v9929_v17 = vld [vmem:[#allocation3 + $0xb0] sm:$0xff] }
 0x4b4   : > { %8592 = vmatprep.mubr.f32.mxu1 %v9924_v58  ;;  %9314 = vmatpush3.bf16.msra.mxu1 %v9311_v60  ;;  %v6462_v60 = vld [vmem:[%s12505_s3 + $0x3e0] sm:$0xff]  ;;  %v9928_v58 = vld [vmem:[#allocation3 + $0xa8] sm:$0xff] }
 0x4b5   : > { %9316 = vmatprep.subr.bf16.mxu1 %v9315_v21 }
 0x4b7   : > { %8593 = vmatmul.mubr.f32.gmra.mrb[6].mxu1 %v9925_v27  ;;  %v9327_v27 = vpack.c.bf16 %v6463_v51, %v6462_v60  ;;  %v6467_v60 = vld [vmem:[%s12505_s3 + $0x408] sm:$0xff]  ;;  %v9931_v51 = vld [vmem:[#allocation3 + $0xc8] sm:$0xff] }
 0x4b8   : > { %8595 = vmatprep.mubr.f32.mxu1 %v9926_v53  ;;  %9318 = vmatpush3.bf16.msra.mxu1 %v9315_v21  ;;  %v6464_v21 = vld [vmem:[%s12505_s3 + $0x3f0] sm:$0xff] }
 0x4b9   : > { %9320 = vmatprep.subr.bf16.mxu1 %v9319_v22  ;;  %v9930_v53 = vld [vmem:[#allocation3 + $0xc0] sm:$0xff] }
 0x4bb   : > { %8596 = vmatmul.mubr.f32.gmra.mrb[8].mxu1 %v9927_v55  ;;  %v9331_v55 = vpack.c.bf16 %v6465_v54, %v6464_v21  ;;  %v9935_v21 = vld [vmem:[#allocation3 + $0xf8] sm:$0xff]  ;;  %v9936_v54 = vld [vmem:[#allocation3 + $0x108] sm:$0xff] }
 0x4bc   : > { %8598 = vmatprep.mubr.f32.mxu1 %v9928_v58  ;;  %9322 = vmatpush3.bf16.msra.mxu1 %v9319_v22  ;;  %v6466_v22 = vld [vmem:[%s12505_s3 + $0x400] sm:$0xff]  ;;  %v9932_v58 = vld [vmem:[#allocation3 + $0xd8] sm:$0xff] }
 0x4bd   : > { %9324 = vmatprep.subr.bf16.mxu1 %v9323_v37 }
 0x4bf   : > { %8599 = vmatmul.mubr.f32.gmra.mrb[10].mxu1 %v9929_v17  ;;  %v9335_v17 = vpack.c.bf16 %v6467_v60, %v6466_v22  ;;  %v9942_v22 = vld [vmem:[#allocation3 + $0x150] sm:$0xff] }
 0x4c0   : > { %8601 = vmatprep.mubr.f32.mxu1 %v9930_v53  ;;  %9326 = vmatpush3.bf16.msra.mxu1 %v9323_v37  ;;  %v9934_v37 = vld [vmem:[#allocation3 + $0xf0] sm:$0xff] }
 0x4c1   : > { %9328 = vmatprep.subr.bf16.mxu1 %v9327_v27  ;;  %v9937_v53 = vld [vmem:[#allocation3 + $0x110] sm:$0xff] }
 0x4c2   : > { %v9945_v60 = vld [vmem:[#allocation3 + $0x170] sm:$0xff] }
 0x4c3   : > { %8602 = vmatmul.mubr.f32.gmra.mrb[12].mxu1 %v9931_v51  ;;  %v9939_v51 = vld [vmem:[#allocation3 + $0x128] sm:$0xff] }
 0x4c4   : > { %8604 = vmatprep.mubr.f32.mxu1 %v9932_v58  ;;  %9330 = vmatpush3.bf16.msra.mxu1 %v9327_v27  ;;  %v9940_v58 = vld [vmem:[#allocation3 + $0x138] sm:$0xff]  ;;  %v9941_v27 = vld [vmem:[#allocation3 + $0x140] sm:$0xff] }
 0x4c5   : > { %9332 = vmatprep.subr.bf16.mxu1 %v9331_v55 }
 0x4c7   : > { %8605 = vmatmul.mubr.f32.gmra.mrb[14].mxu1 %v9933_v1  ;;  %v9943_v1 = vld [vmem:[#allocation3 + $0x158] sm:$0xff] }
 0x4c8   : > { %8607 = vmatprep.mubr.f32.mxu1 %v9934_v37  ;;  %9334 = vmatpush3.bf16.msra.mxu1 %v9331_v55  ;;  %v9944_v55 = vld [vmem:[#allocation3 + $0x168] sm:$0xff]  ;;  %v12312_v37 = vld [vmem:[#allocation2] sm:$0xff] }
 0x4c9   : > { %9336 = vmatprep.subr.bf16.mxu1 %v9335_v17 }
 0x4cb   : > { %8608 = vmatmul.mubr.f32.gmra.mrb[16].mxu1 %v9935_v21  ;;  %v6469_v21 = vld [vmem:[%s12505_s3 + $0x418] sm:$0xff] }
 0x4cc   : > { %8610 = vmatprep.mubr.f32.mxu1 %v9936_v54 }
 0x4cf   : > { %8611 = vmatmul.mubr.f32.gmra.mrb[18].mxu1 %v9937_v53 }
 0x4d0   : > { %8613 = vmatprep.mubr.f32.mxu1 %v9938_v45  ;;  %v6468_v45 = vld [vmem:[%s12505_s3 + $0x410] sm:$0xff] }
 0x4d1   : > { %v9339_v54 = vpack.c.bf16 %v6469_v21, %v6468_v45  ;;  %v9951_v45 = vld [vmem:[#allocation2 + $0x51] sm:$0xff] }
 0x4d3   : > { %8614 = vmatmul.mubr.f32.gmra.mrb[20].mxu1 %v9939_v51  ;;  %v6473_v51 = vld [vmem:[%s12505_s3 + $0x438] sm:$0xff] }
 0x4d4   : > { %8616 = vmatprep.mubr.f32.mxu1 %v9940_v58  ;;  %v6477_v58 = vld [vmem:[%s12505_s3 + $0x458] sm:$0xff] }
 0x4d7   : > { %8617 = vmatmul.mubr.f32.gmra.mrb[22].mxu1 %v9941_v27  ;;  %v6479_v27 = vld [vmem:[%s12505_s3 + $0x468] sm:$0xff] }
 0x4d8   : > { %8619 = vmatprep.mubr.f32.mxu1 %v9942_v22  ;;  %v6481_v22 = vld [vmem:[%s12505_s3 + $0x478] sm:$0xff] }
 0x4db   : > { %8620 = vmatmul.mubr.f32.gmra.mrb[24].mxu1 %v9943_v1 }
 0x4dc   : > { %8622 = vmatprep.mubr.f32.mxu1 %v9944_v55 }
 0x4df   : > { %8623 = vmatmul.mubr.f32.gmra.mrb[26].mxu1 %v9945_v60 }
 0x4e0   : > { %8625 = vmatprep.mubr.f32.mxu1 %v12076_v35  ;;  %v6470_v35 = vld [vmem:[%s12505_s3 + $0x420] sm:$0xff] }
 0x4e3   : > { %8626 = vmatmul.mubr.f32.gmra.mrb[28].mxu1 %v12079_v25  ;;  %v6471_v25 = vld [vmem:[%s12505_s3 + $0x428] sm:$0xff] }
 0x4e4   : > { %8628 = vmatprep.mubr.f32.mxu1 %v12312_v37  ;;  %v9343_v53 = vpack.c.bf16 %v6471_v25, %v6470_v35 }
 0x4e7   : > { %8629 = vmatmul.mubr.f32.gmra.mrb[30].mxu1 %v12312_v37 }
 0x4e8   : > { %8663 = vmatprep.mubr.f32.mxu1 %v11441_v3  ;;  %v6472_v3 = vld [vmem:[%s12505_s3 + $0x430] sm:$0xff] }
 0x4eb   : > { %8664 = vmatmul.mubr.f32.vlgmr.msra.gmra.mrb[0].mxu1 %v11444_v11  ;;  %v9347_v11 = vpack.c.bf16 %v6473_v51, %v6472_v3 }
 0x4ec   : > { %8666 = vmatprep.mubr.f32.mxu1 %v12810_v46  ;;  %9338 = vmatpush3.bf16.msra.mxu1 %v9335_v17  ;;  %v6474_v46 = vld [vmem:[%s12505_s3 + $0x440] sm:$0xff]  ;;  %v6475_v17 = vld [vmem:[%s12505_s3 + $0x448] sm:$0xff] }
 0x4ed   : > { %9340 = vmatprep.subr.bf16.mxu1 %v9339_v54 }
 0x4ef   : > { %8667 = vmatmul.mubr.f32.gmra.mrb[2].mxu1 %v12811_v6  ;;  %v9351_v6 = vpack.c.bf16 %v6475_v17, %v6474_v46  ;;  %v9953_v17 = vld [vmem:[#allocation2 + $0x69] sm:$0xff] }
 0x4f0   : > { %8669 = vmatprep.mubr.f32.mxu1 %v12812_v38  ;;  %9342 = vmatpush3.bf16.msra.mxu1 %v9339_v54  ;;  %v6476_v38 = vld [vmem:[%s12505_s3 + $0x450] sm:$0xff] }
 0x4f1   : > { %9344 = vmatprep.subr.bf16.mxu1 %v9343_v53  ;;  %v9952_v54 = vld [vmem:[#allocation2 + $0x49] sm:$0xff] }
 0x4f3   : > { %8670 = vmatmul.mubr.f32.gmra.mrb[4].mxu1 %v12813_v18  ;;  %v9355_v18 = vpack.c.bf16 %v6477_v58, %v6476_v38  ;;  %v9954_v38 = vld [vmem:[#allocation2 + $0x61] sm:$0xff] }
 0x4f4   : > { %8672 = vmatprep.mubr.f32.mxu1 %v12814_v41  ;;  %9346 = vmatpush3.bf16.msra.mxu1 %v9343_v53  ;;  %v6478_v41 = vld [vmem:[%s12505_s3 + $0x460] sm:$0xff] }
 0x4f5   : > { %9348 = vmatprep.subr.bf16.mxu1 %v9347_v11 }
 0x4f7   : > { %8673 = vmatmul.mubr.f32.gmra.mrb[6].mxu1 %v12815_v24  ;;  %v9359_v24 = vpack.c.bf16 %v6479_v27, %v6478_v41 }
 0x4f8   : > { %8675 = vmatprep.mubr.f32.mxu1 %v12816_v42  ;;  %9350 = vmatpush3.bf16.msra.mxu1 %v9347_v11  ;;  %v6480_v42 = vld [vmem:[%s12505_s3 + $0x470] sm:$0xff] }
 0x4f9   : > { %9352 = vmatprep.subr.bf16.mxu1 %v9351_v6 }
 0x4fb   : > { %8676 = vmatmul.mubr.f32.gmra.mrb[8].mxu1 %v12817_v39  ;;  %v9363_v39 = vpack.c.bf16 %v6481_v22, %v6480_v42 }
 0x4fc   : > { %8678 = vmatprep.mubr.f32.mxu1 %v12818_v8  ;;  %9354 = vmatpush3.bf16.msra.mxu1 %v9351_v6  ;;  %v5465_v8 = vrot.slane %v12312_v37, 1 }
 0x4fd   : > { %9356 = vmatprep.subr.bf16.mxu1 %v9355_v18 }
 0x4ff   : > { %8679 = vmatmul.mubr.f32.gmra.mrb[10].mxu1 %v12819_v16  ;;  %v3318_v16 = vld [vmem:[#allocation3 + $0x1a8] sm:$0x3] }
 0x500   : > { %8681 = vmatprep.mubr.f32.mxu1 %v12820_v12  ;;  %9358 = vmatpush3.bf16.msra.mxu1 %v9355_v18  ;;  %v5468_v12 = vrot.slane %v3318_v16, 1 }
 0x501   : > { %9360 = vmatprep.subr.bf16.mxu1 %v9359_v24 }
 0x503   : > { %8682 = vmatmul.mubr.f32.gmra.mrb[12].mxu1 %v12821_v34  ;;  %v5469_v34 = vsel %vm463_vm0, %v5465_v8, %v5468_v12 }
 0x504   : > { %8684 = vmatprep.mubr.f32.mxu1 %v12822_v9  ;;  %9362 = vmatpush3.bf16.msra.mxu1 %v9359_v24  ;;  %v12847_v9 = vld [vmem:[#allocation35_spill] sm:$0xff] }
 0x505   : > { %9364 = vmatprep.subr.bf16.mxu1 %v9363_v39 }
 0x507   : > { %8685 = vmatmul.mubr.f32.gmra.mrb[14].mxu1 %v12823_v56 }
 0x508   : > { %8687 = vmatprep.mubr.f32.mxu1 %v12824_v43  ;;  %9366 = vmatpush3.bf16.msra.mxu1 %v9363_v39  ;;  %v12426_v43 = vld [vmem:[%s12506_s4] ss:$0 sm:$0xff]  ;;  %v9955_v39 = vld [vmem:[#allocation2 + $0x81] sm:$0xff] }
 0x50b   : > { %8688 = vmatmul.mubr.f32.gmra.mrb[16].mxu1 %v12825_v59 }
 0x50c   : > { %8690 = vmatprep.mubr.f32.mxu1 %v12826_v5 }
 0x50f   : > { %8691 = vmatmul.mubr.f32.gmra.mrb[18].mxu1 %v12827_v49 }
 0x510   : > { %8693 = vmatprep.mubr.f32.mxu1 %v12828_v14 }
 0x513   : > { %8694 = vmatmul.mubr.f32.gmra.mrb[20].mxu1 %v12829_v48  ;;  %v9947_v48 = vld [vmem:[#allocation2 + $0x21] sm:$0xff] }
 0x514   : > { %8696 = vmatprep.mubr.f32.mxu1 %v12830_v61 }
 0x517   : > { %8697 = vmatmul.mubr.f32.gmra.mrb[22].mxu1 %v12831_v10  ;;  %v9948_v10 = vld [vmem:[#allocation2 + $0x19] sm:$0xff] }
 0x518   : > { %8699 = vmatprep.mubr.f32.mxu1 %v12832_v62 }
 0x51b   : > { %8700 = vmatmul.mubr.f32.gmra.mrb[24].mxu1 %v12833_v36 }
 0x51c   : > { %8702 = vmatprep.mubr.f32.mxu1 %v12834_v63 }
 0x51f   : > { %8703 = vmatmul.mubr.f32.gmra.mrb[26].mxu1 %v12835_v20 }
 0x520   : > { %8705 = vmatprep.mubr.f32.mxu1 %v12166_v15 }
 0x523   : > { %8706 = vmatmul.mubr.f32.gmra.mrb[28].mxu1 %v12170_v40 }
 0x524   : > { %8708 = vmatprep.mubr.f32.mxu1 %v5465_v8 }
 0x527   : > { %8709 = vmatmul.mubr.f32.gmra.mrb[30].mxu1 %v5469_v34 }
 0x528   : > { %8743 = vmatprep.mubr.f32.mxu1 %v11814_v19  ;;  %v12848_v19 = vld [vmem:[#allocation42_spill] sm:$0xff] }
 0x52b   : > { %8744 = vmatmul.mubr.f32.vlgmr.msra.gmra.mrb[0].mxu1 %v11820_v50  ;;  %v12850_v50 = vld [vmem:[#allocation44_spill] sm:$0xff] }
 0x52c   : > { %8746 = vmatprep.mubr.f32.mxu1 %v12836_v28 }
 0x52f   : > { %8747 = vmatmul.mubr.f32.gmra.mrb[2].mxu1 %v11837_v31  ;;  %v12851_v31 = vld [vmem:[#allocation45_spill] sm:$0xff] }
 0x530   : > { %8749 = vmatprep.mubr.f32.mxu1 %v12837_v52  ;;  %v9949_v52 = vld [vmem:[#allocation2 + $0x39] sm:$0xff] }
 0x533   : > { %8750 = vmatmul.mubr.f32.gmra.mrb[4].mxu1 %v11854_v30  ;;  %v12852_v30 = vld [vmem:[#allocation46_spill] sm:$0xff] }
 0x534   : > { %8752 = vmatprep.mubr.f32.mxu1 %v12838_v4 }
 0x537   : > { %8753 = vmatmul.mubr.f32.gmra.mrb[6].mxu1 %v12847_v9 }
 0x538   : > { %8755 = vmatprep.mubr.f32.mxu1 %v12839_v7  ;;  %v9950_v7 = vld [vmem:[#allocation2 + $0x31] sm:$0xff] }
 0x53b   : > { %8756 = vmatmul.mubr.f32.gmra.mrb[8].mxu1 %v12840_v2 }
 0x53c   : > { %8758 = vmatprep.mubr.f32.mxu1 %v11899_v57  ;;  %v12849_v57 = vld [vmem:[#allocation43_spill] sm:$0xff] }
 0x53f   : > { %8759 = vmatmul.mubr.f32.gmra.mrb[10].mxu1 %v11907_v47  ;;  %v12853_v47 = vld [vmem:[#allocation4_spill] sm:$0xff] }
 0x540   : > { %8761 = vmatprep.mubr.f32.mxu1 %v11912_v32  ;;  %v12854_v32 = vld [vmem:[#allocation5_spill] sm:$0xff] }
 0x543   : > { %8762 = vmatmul.mubr.f32.gmra.mrb[12].mxu1 %v11919_v13  ;;  %v12855_v13 = vld [vmem:[#allocation30_spill] sm:$0xff] }
 0x544   : > { %8764 = vmatprep.mubr.f32.mxu1 %v11924_v23  ;;  %v12856_v23 = vld [vmem:[#allocation6_spill] sm:$0xff] }
 0x547   : > { %8765 = vmatmul.mubr.f32.gmra.mrb[14].mxu1 %v11930_v44  ;;  %v5749_v44 = vrot.slane %v3318_v16, 2  ;;  %v9956_v16 = vld [vmem:[#allocation2 + $0x79] sm:$0xff] }
 0x548   : > { %8767 = vmatprep.mubr.f32.mxu1 %v12841_v33 }
 0x54b   : > { %8768 = vmatmul.mubr.f32.gmra.mrb[16].mxu1 %v11941_v0  ;;  %v12857_v0 = vld [vmem:[#allocation7_spill] sm:$0xff] }
 0x54c   : > { %8770 = vmatprep.mubr.f32.mxu1 %v12842_v29 }
 0x54f   : > { %8771 = vmatmul.mubr.f32.gmra.mrb[18].mxu1 %v11952_v26  ;;  %v12858_v26 = vld [vmem:[#allocation33_spill] sm:$0xff] }
 0x550   : > { %8773 = vmatprep.mubr.f32.mxu1 %v12848_v19  ;;  %v5750_v56 = vsel %vm1043_vm1, %v12858_v26, %v5749_v44 }
 0x553   : > { %8774 = vmatmul.mubr.f32.gmra.mrb[20].mxu1 %v12849_v57 }
 0x554   : > { %8776 = vmatprep.mubr.f32.mxu1 %v12850_v50 }
 0x557   : > { %8777 = vmatmul.mubr.f32.gmra.mrb[22].mxu1 %v12851_v31 }
 0x558   : > { %8779 = vmatprep.mubr.f32.mxu1 %v12852_v30  ;;  %v9957_v30 = vld [vmem:[#allocation2 + $0x99] sm:$0xff] }
 0x55b   : > { %8780 = vmatmul.mubr.f32.gmra.mrb[24].mxu1 %v12853_v47 }
 0x55c   : > { %8782 = vmatprep.mubr.f32.mxu1 %v12854_v32  ;;  %v9958_v32 = vld [vmem:[#allocation2 + $0x91] sm:$0xff] }
 0x55f   : > { %8783 = vmatmul.mubr.f32.gmra.mrb[26].mxu1 %v12855_v13 }
 0x560   : > { %8785 = vmatprep.mubr.f32.mxu1 %v12856_v23 }
 0x563   : > { %8786 = vmatmul.mubr.f32.gmra.mrb[28].mxu1 %v12857_v0 }
 0x564   : > { %8788 = vmatprep.mubr.f32.mxu1 %v12858_v26 }
 0x567   : > { %8789 = vmatmul.mubr.f32.gmra.mrb[30].mxu1 %v5750_v56 }
 0x5fe   : > { %v8745_v59 = vpop.f32.mrb[0].mxu1 }
 0x5ff   : > { %v6034_v5 = vadd.f32 %v8745_v59, %v12426_v43  ;;  %v5836_v49 = vpop.f32.mrb[1].mxu1 }
 0x600   : > { %v6033_v14 = vadd.f32 %v12426_v43, %v5836_v49 }
 0x601   : > { %v6066_v61 = vadd.f32 %v9947_v48, %v6034_v5  ;;  %v9959_v5 = vld [vmem:[#allocation2 + $0xb1] sm:$0xff] }
 0x602   : > { %v6065_v62 = vadd.f32 %v9948_v10, %v6033_v14  ;;  %v8748_v36 = vpop.f32.mrb[2].mxu1  ;;  %v9960_v14 = vld [vmem:[#allocation2 + $0xa9] sm:$0xff] }
 0x603   : > { %v6098_v63 = vmax.f32 %v6066_v61, 0.0  ;;  %v6036_v20 = vadd.f32 %v8748_v36, %v12426_v43  ;;  %v5846_v15 = vpop.f32.mrb[3].mxu1 }
 0x604   : > { %v6097_v40 = vmax.f32 %v6065_v62, 0.0  ;;  %v6035_v28 = vadd.f32 %v12426_v43, %v5846_v15  ;;  %v9961_v15 = vld [vmem:[#allocation2 + $0xc9] sm:$0xff] }
 0x605   : > { %6130 = vst [vmem:[%s12435_s13 + $0x8] sm:$0xff] %v6098_v63  ;;  %v6068_v4 = vadd.f32 %v9949_v52, %v6036_v20 }
 0x606   : > { %6129 = vst [vmem:[%s12435_s13] sm:$0xff] %v6097_v40  ;;  %v6067_v2 = vadd.f32 %v9950_v7, %v6035_v28  ;;  %v8751_v33 = vpop.f32.mrb[4].mxu1  ;;  %v9962_v28 = vld [vmem:[#allocation2 + $0xc1] sm:$0xff] }
 0x607   : > { %v6100_v29 = vmax.f32 %v6068_v4, 0.0  ;;  %v6038_v1 = vadd.f32 %v8751_v33, %v12426_v43  ;;  %v5856_v55 = vpop.f32.mrb[5].mxu1 }
 0x608   : > { %v6099_v60 = vmax.f32 %v6067_v2, 0.0  ;;  %v6037_v37 = vadd.f32 %v12426_v43, %v5856_v55  ;;  %v9963_v55 = vld [vmem:[#allocation2 + $0xe1] sm:$0xff] }
 0x609   : > { %6132 = vst [vmem:[%s12435_s13 + $0x18] sm:$0xff] %v6100_v29  ;;  %v6070_v21 = vadd.f32 %v9951_v45, %v6038_v1 }
 0x60a   : > { %6131 = vst [vmem:[%s12435_s13 + $0x10] sm:$0xff] %v6099_v60  ;;  %v6069_v35 = vadd.f32 %v9952_v54, %v6037_v37  ;;  %v8754_v25 = vpop.f32.mrb[6].mxu1  ;;  %v9964_v37 = vld [vmem:[#allocation2 + $0xd9] sm:$0xff] }
 0x60b   : > { %v6102_v53 = vmax.f32 %v6070_v21, 0.0  ;;  %v6040_v3 = vadd.f32 %v8754_v25, %v12426_v43  ;;  %v5866_v51 = vpop.f32.mrb[7].mxu1 }
 0x60c   : > { %v6101_v11 = vmax.f32 %v6069_v35, 0.0  ;;  %v6039_v46 = vadd.f32 %v12426_v43, %v5866_v51  ;;  %v9965_v51 = vld [vmem:[#allocation2 + $0xf9] sm:$0xff] }
 0x60d   : > { %6134 = vst [vmem:[%s12435_s13 + $0x28] sm:$0xff] %v6102_v53  ;;  %v6072_v6 = vadd.f32 %v9953_v17, %v6040_v3 }
 0x60e   : > { %6133 = vst [vmem:[%s12435_s13 + $0x20] sm:$0xff] %v6101_v11  ;;  %v6071_v58 = vadd.f32 %v9954_v38, %v6039_v46  ;;  %v8757_v18 = vpop.f32.mrb[8].mxu1  ;;  %v9966_v46 = vld [vmem:[#allocation2 + $0xf1] sm:$0xff] }
 0x60f   : > { %v6104_v41 = vmax.f32 %v6072_v6, 0.0  ;;  %v6042_v27 = vadd.f32 %v8757_v18, %v12426_v43  ;;  %v5876_v24 = vpop.f32.mrb[9].mxu1 }
 0x610   : > { %v6103_v42 = vmax.f32 %v6071_v58, 0.0  ;;  %v6041_v22 = vadd.f32 %v12426_v43, %v5876_v24  ;;  %v9967_v24 = vld [vmem:[#allocation2 + $0x111] sm:$0xff] }
 0x611   : > { %6136 = vst [vmem:[%s12435_s13 + $0x38] sm:$0xff] %v6104_v41  ;;  %v6074_v8 = vadd.f32 %v9955_v39, %v6042_v27 }
 0x612   : > { %6135 = vst [vmem:[%s12435_s13 + $0x30] sm:$0xff] %v6103_v42  ;;  %v6073_v12 = vadd.f32 %v9956_v16, %v6041_v22  ;;  %v8760_v34 = vpop.f32.mrb[10].mxu1  ;;  %v9968_v22 = vld [vmem:[#allocation2 + $0x109] sm:$0xff] }
 0x613   : > { %v6106_v9 = vmax.f32 %v6074_v8, 0.0  ;;  %v6044_v19 = vadd.f32 %v8760_v34, %v12426_v43  ;;  %v5886_v57 = vpop.f32.mrb[11].mxu1 }
 0x614   : > { %v6105_v50 = vmax.f32 %v6073_v12, 0.0  ;;  %v6043_v31 = vadd.f32 %v12426_v43, %v5886_v57  ;;  %v9969_v57 = vld [vmem:[#allocation2 + $0x129] sm:$0xff] }
 0x615   : > { %6138 = vst [vmem:[%s12435_s13 + $0x48] sm:$0xff] %v6106_v9  ;;  %v6076_v47 = vadd.f32 %v9957_v30, %v6044_v19 }
 0x616   : > { %6137 = vst [vmem:[%s12435_s13 + $0x40] sm:$0xff] %v6105_v50  ;;  %v6075_v13 = vadd.f32 %v9958_v32, %v6043_v31  ;;  %v8763_v23 = vpop.f32.mrb[12].mxu1  ;;  %v9970_v31 = vld [vmem:[#allocation2 + $0x121] sm:$0xff] }
 0x617   : > { %v6108_v44 = vmax.f32 %v6076_v47, 0.0  ;;  %v6046_v0 = vadd.f32 %v8763_v23, %v12426_v43  ;;  %v5896_v26 = vpop.f32.mrb[13].mxu1 }
 0x618   : > { %v6107_v56 = vmax.f32 %v6075_v13, 0.0  ;;  %v6045_v59 = vadd.f32 %v12426_v43, %v5896_v26  ;;  %v9971_v26 = vld [vmem:[#allocation2 + $0x141] sm:$0xff] }
 0x619   : > { %6140 = vst [vmem:[%s12435_s13 + $0x58] sm:$0xff] %v6108_v44  ;;  %v6078_v49 = vadd.f32 %v9959_v5, %v6046_v0 }
 0x61a   : > { %6139 = vst [vmem:[%s12435_s13 + $0x50] sm:$0xff] %v6107_v56  ;;  %v6077_v48 = vadd.f32 %v9960_v14, %v6045_v59  ;;  %v8766_v61 = vpop.f32.mrb[14].mxu1  ;;  %v9972_v59 = vld [vmem:[#allocation2 + $0x139] sm:$0xff] }
 0x61b   : > { %v6110_v10 = vmax.f32 %v6078_v49, 0.0  ;;  %v6048_v62 = vadd.f32 %v8766_v61, %v12426_v43  ;;  %v5906_v36 = vpop.f32.mrb[15].mxu1 }
 0x61c   : > { %v6109_v63 = vmax.f32 %v6077_v48, 0.0  ;;  %v6047_v20 = vadd.f32 %v12426_v43, %v5906_v36  ;;  %v9973_v36 = vld [vmem:[#allocation2 + $0x159] sm:$0xff] }
 0x61d   : > { %6142 = vst [vmem:[%s12435_s13 + $0x68] sm:$0xff] %v6110_v10  ;;  %v6080_v40 = vadd.f32 %v9961_v15, %v6048_v62 }
 0x61e   : > { %6141 = vst [vmem:[%s12435_s13 + $0x60] sm:$0xff] %v6109_v63  ;;  %v6079_v52 = vadd.f32 %v9962_v28, %v6047_v20  ;;  %v8769_v4 = vpop.f32.mrb[16].mxu1  ;;  %v9974_v20 = vld [vmem:[#allocation2 + $0x151] sm:$0xff] }
 0x61f   : > { %v6112_v7 = vmax.f32 %v6080_v40, 0.0  ;;  %v6050_v2 = vadd.f32 %v8769_v4, %v12426_v43  ;;  %v5916_v33 = vpop.f32.mrb[17].mxu1 }
 0x620   : > { %v6111_v29 = vmax.f32 %v6079_v52, 0.0  ;;  %v6049_v1 = vadd.f32 %v12426_v43, %v5916_v33  ;;  %v9975_v33 = vld [vmem:[#allocation2 + $0x171] sm:$0xff] }
 0x621   : > { %6144 = vst [vmem:[%s12435_s13 + $0x78] sm:$0xff] %v6112_v7  ;;  %v6082_v60 = vadd.f32 %v9963_v55, %v6050_v2 }
 0x622   : > { %6143 = vst [vmem:[%s12435_s13 + $0x70] sm:$0xff] %v6111_v29  ;;  %v6081_v45 = vadd.f32 %v9964_v37, %v6049_v1  ;;  %v8772_v21 = vpop.f32.mrb[18].mxu1  ;;  %v9976_v1 = vld [vmem:[#allocation2 + $0x169] sm:$0xff] }
 0x623   : > { %v6114_v54 = vmax.f32 %v6082_v60, 0.0  ;;  %v6052_v35 = vadd.f32 %v8772_v21, %v12426_v43  ;;  %v5926_v25 = vpop.f32.mrb[19].mxu1 }
 0x624   : > { %v6113_v53 = vmax.f32 %v6081_v45, 0.0  ;;  %v6051_v3 = vadd.f32 %v12426_v43, %v5926_v25  ;;  %v9977_v25 = vld [vmem:[#allocation2 + $0x189] sm:$0xff] }
 0x625   : > { %6146 = vst [vmem:[%s12435_s13 + $0x88] sm:$0xff] %v6114_v54  ;;  %v6084_v11 = vadd.f32 %v9965_v51, %v6052_v35 }
 0x626   : > { %6145 = vst [vmem:[%s12435_s13 + $0x80] sm:$0xff] %v6113_v53  ;;  %v6083_v17 = vadd.f32 %v9966_v46, %v6051_v3  ;;  %v8775_v6 = vpop.f32.mrb[20].mxu1  ;;  %v9978_v3 = vld [vmem:[#allocation2 + $0x181] sm:$0xff] }
 0x627   : > { %v6116_v38 = vmax.f32 %v6084_v11, 0.0  ;;  %v6054_v58 = vadd.f32 %v8775_v6, %v12426_v43  ;;  %v5936_v18 = vpop.f32.mrb[21].mxu1 }
 0x628   : > { %v6115_v41 = vmax.f32 %v6083_v17, 0.0  ;;  %v6053_v27 = vadd.f32 %v12426_v43, %v5936_v18 }
 0x629   : > { %6148 = vst [vmem:[%s12435_s13 + $0x98] sm:$0xff] %v6116_v38  ;;  %v6086_v42 = vadd.f32 %v9967_v24, %v6054_v58 }
 0x62a   : > { %6147 = vst [vmem:[%s12435_s13 + $0x90] sm:$0xff] %v6115_v41  ;;  %v6085_v39 = vadd.f32 %v9968_v22, %v6053_v27  ;;  %v8778_v8 = vpop.f32.mrb[22].mxu1 }
 0x62b   : > { %v6118_v16 = vmax.f32 %v6086_v42, 0.0  ;;  %v6056_v12 = vadd.f32 %v8778_v8, %v12426_v43  ;;  %v5946_v34 = vpop.f32.mrb[23].mxu1 }
 0x62c   : > { %v6117_v9 = vmax.f32 %v6085_v39, 0.0  ;;  %v6055_v19 = vadd.f32 %v12426_v43, %v5946_v34 }
 0x62d   : > { %6150 = vst [vmem:[%s12435_s13 + $0xa8] sm:$0xff] %v6118_v16  ;;  %v6088_v50 = vadd.f32 %v9969_v57, %v6056_v12 }
 0x62e   : > { %6149 = vst [vmem:[%s12435_s13 + $0xa0] sm:$0xff] %v6117_v9  ;;  %v6087_v30 = vadd.f32 %v9970_v31, %v6055_v19  ;;  %v8781_v47 = vpop.f32.mrb[24].mxu1 }
 0x62f   : > { %v6120_v32 = vmax.f32 %v6088_v50, 0.0  ;;  %v6058_v13 = vadd.f32 %v8781_v47, %v12426_v43  ;;  %v5956_v23 = vpop.f32.mrb[25].mxu1 }
 0x630   : > { %v6119_v44 = vmax.f32 %v6087_v30, 0.0  ;;  %v6057_v0 = vadd.f32 %v12426_v43, %v5956_v23 }
 0x631   : > { %6152 = vst [vmem:[%s12435_s13 + $0xb8] sm:$0xff] %v6120_v32  ;;  %v6090_v56 = vadd.f32 %v9971_v26, %v6058_v13 }
 0x632   : > { %6151 = vst [vmem:[%s12435_s13 + $0xb0] sm:$0xff] %v6119_v44  ;;  %v6089_v5 = vadd.f32 %v9972_v59, %v6057_v0  ;;  %v8784_v49 = vpop.f32.mrb[26].mxu1 }
 0x633   : > { %v6122_v14 = vmax.f32 %v6090_v56, 0.0  ;;  %v6060_v48 = vadd.f32 %v8784_v49, %v12426_v43  ;;  %v5966_v61 = vpop.f32.mrb[27].mxu1 }
 0x634   : > { %v6121_v10 = vmax.f32 %v6089_v5, 0.0  ;;  %v6059_v62 = vadd.f32 %v12426_v43, %v5966_v61 }
 0x635   : > { %6154 = vst [vmem:[%s12435_s13 + $0xc8] sm:$0xff] %v6122_v14  ;;  %v6092_v63 = vadd.f32 %v9973_v36, %v6060_v48 }
 0x636   : > { %6153 = vst [vmem:[%s12435_s13 + $0xc0] sm:$0xff] %v6121_v10  ;;  %v6091_v15 = vadd.f32 %v9974_v20, %v6059_v62  ;;  %v8787_v40 = vpop.f32.mrb[28].mxu1 }
 0x637   : > { %v6124_v28 = vmax.f32 %v6092_v63, 0.0  ;;  %v6062_v52 = vadd.f32 %v8787_v40, %v12426_v43  ;;  %v5976_v4 = vpop.f32.mrb[29].mxu1 }
 0x638   : > { %v6123_v7 = vmax.f32 %v6091_v15, 0.0  ;;  %v6061_v2 = vadd.f32 %v12426_v43, %v5976_v4 }
 0x639   : > { %6156 = vst [vmem:[%s12435_s13 + $0xd8] sm:$0xff] %v6124_v28  ;;  %v6094_v29 = vadd.f32 %v9975_v33, %v6062_v52 }
 0x63a   : > { %6155 = vst [vmem:[%s12435_s13 + $0xd0] sm:$0xff] %v6123_v7  ;;  %v6093_v55 = vadd.f32 %v9976_v1, %v6061_v2  ;;  %v8790_v60 = vpop.f32.mrb[30].mxu1 }
 0x63b   : > { %v6126_v37 = vmax.f32 %v6094_v29, 0.0  ;;  %v6064_v45 = vadd.f32 %v8790_v60, %v12426_v43  ;;  %v5986_v21 = vpop.f32.mrb[31].mxu1 }
 0x63c   : > { %v6125_v54 = vmax.f32 %v6093_v55, 0.0  ;;  %v6063_v35 = vadd.f32 %v12426_v43, %v5986_v21 }
 0x63d   : > { %6158 = vst [vmem:[%s12435_s13 + $0xe8] sm:$0xff] %v6126_v37  ;;  %v6096_v53 = vadd.f32 %v9977_v25, %v6064_v45 }
 0x63e   : > { %6157 = vst [vmem:[%s12435_s13 + $0xe0] sm:$0xff] %v6125_v54  ;;  %v6095_v51 = vadd.f32 %v9978_v3, %v6063_v35 }
 0x63f   : > { %v6128_v11 = vmax.f32 %v6096_v53, 0.0 }
 0x640   : > { %v6127_v46 = vmax.f32 %v6095_v51, 0.0 }
 0x641   : > { %6160 = vst [vmem:[%s12435_s13 + $0xf8] sm:$0xff] %v6128_v11 }
 0x642   : > { %6159 = vst [vmem:[%s12435_s13 + $0xf0] sm:$0xff] %v6127_v46 }
 0x643 PF: > { %s15_s18 = sadd.s32 1, %s9985_s18  }
 0x644   : > { %p12_p4 = scmp.ge.s32.totalorder %s15_s18, 4  }
 0x646   :  { %14 = sbr.rel (!%p12_p4) target bundleno = 1 (0x1), region = 88 }

</bundles_post_ra>
